<compile_context>
chip_gen: v7x
topology: tpu7x:2x2x1
jax: 0.10.0
libtpu: 0.0.40
codegen_flags: <defaults>
</compile_context>

<pallas_src>
import jax
import jax.numpy as jnp
from jax.experimental import pallas as pl
from jax.experimental.pallas import tpu as pltpu


# ----------------------------------------------------------------------------
# VMEM budgeting / H-tile selection (generation-safe budget)
# ----------------------------------------------------------------------------
def _conv_step_vmem_bytes(ht, W, Cin, Cout, pool):
    """Approximate per-grid-step VMEM working set, incl. double buffering."""
    b_in = (ht + 2) * W * Cin * 4                # center tile + 2 halo rows (f32)
    b_wts = 9 * Cin * Cout * 2 + Cout * 4        # bf16 weights + f32 bias
    b_out = ht * W * Cout * 4                    # conv output tile (f32)
    b_pool = (ht // 2) * (W // 2) * Cout * 4 if pool else 0
    b_xp = (ht + 2) * (W + 2) * Cin * 2          # bf16 padded scratch (1 buffer)
    return 2 * (b_in + b_wts + b_out + b_pool) + b_xp


def _pick_h_tile(H, W, Cin, Cout, pool, budget_bytes=8 * 2**20):
    """Largest H tile (divisor of H, even when pooling) whose double-buffered
    working set fits a budget that is safe on v5e/v6e/v7x.
    TODO(synk): query pltpu.get_tpu_info() and raise the budget on
    128-MiB-VMEM parts (v5e/v6e); keep it low on v7x (64 MiB physical)."""
    valid = [d for d in range(1, H + 1)
             if H % d == 0 and (not pool or d % 2 == 0)]
    assert valid, "MaxPool2x2 (floor mode) needs even H here"
    fitting = [d for d in valid
               if _conv_step_vmem_bytes(d, W, Cin, Cout, pool) <= budget_bytes]
    return max(fitting) if fitting else min(valid)


# ----------------------------------------------------------------------------
# Kernel: 3x3 conv (stride 1, pad 1) + bias + ReLU, optional fused MaxPool2x2.
# Grid = (batch, H-tiles); both axes "parallel".
# ----------------------------------------------------------------------------
def _conv3x3_body(xc_ref, xt_ref, xb_ref, w_ref, b_ref, o_ref, p_ref, xp_ref):
    # xc_ref : (1, Ht, W, Cin)       center rows of the input tile (f32)
    # xt_ref : (1, 1,  W, Cin)       row above the tile (clamped at the edge)
    # xb_ref : (1, 1,  W, Cin)       row below the tile (clamped at the edge)
    # w_ref  : (3, 3, Cin, Cout)     HWIO weights (bf16)
    # b_ref  : (1, Cout)             bias (f32)
    # o_ref  : (1, Ht, W, Cout)      conv+ReLU output tile
    # p_ref  : (1, Ht/2, W/2, Cout)  fused 2x2 max-pool output tile (or None)
    # xp_ref : (Ht+2, W+2, Cin)      bf16 VMEM scratch with a 1-px halo
    Ht, W, Cout = o_ref.shape[1], o_ref.shape[2], o_ref.shape[3]
    Cin = xc_ref.shape[3]
    cdt = xp_ref.dtype

    h = pl.program_id(1)
    is_first = h == 0
    is_last = h == pl.num_programs(1) - 1

    # Zero only the 1-px left/right halo columns (cheap, grid-order
    # independent -> safe with both grid axes marked "parallel").
    zcol = jnp.zeros((Ht + 2, 1, Cin), cdt)
    xp_ref[:, pl.ds(0, 1), :] = zcol
    xp_ref[:, pl.ds(W + 1, 1), :] = zcol

    # Top / bottom halo rows from the neighbouring tiles; force to zero at the
    # image boundary.
    xp_ref[pl.ds(0, 1), pl.ds(1, W), :] = xt_ref[0].astype(cdt)
    xp_ref[pl.ds(Ht + 1, 1), pl.ds(1, W), :] = xb_ref[0].astype(cdt)

    @pl.when(is_first)
    def _():
        xp_ref[pl.ds(0, 1), pl.ds(1, W), :] = jnp.zeros((1, W, Cin), cdt)

    @pl.when(is_last)
    def _():
        xp_ref[pl.ds(Ht + 1, 1), pl.ds(1, W), :] = jnp.zeros((1, W, Cin), cdt)

    # Interior rows (cast to bf16 once, on the store into the scratch).
    xp_ref[pl.ds(1, Ht), pl.ds(1, W), :] = xc_ref[0].astype(cdt)

    # Row-batched conv: 9 tap matmuls (bf16 x bf16 -> f32 accumulate) into a
    # single accumulator chain, initialised by the first tap (no zeros + add).
    acc = None
    for dh in range(3):
        for dw in range(3):
            slab = xp_ref[pl.ds(dh, Ht), pl.ds(dw, W), :]        # (Ht, W, Cin)
            part = jnp.dot(slab.reshape(Ht * W, Cin), w_ref[dh, dw],
                           preferred_element_type=jnp.float32)
            acc = part if acc is None else acc + part

    y = jnp.maximum(acc + b_ref[...], 0.0)                       # f32 epilogue
    o_ref[0] = y.reshape(Ht, W, Cout).astype(o_ref.dtype)

    if p_ref is not None:                                        # fused MaxPool2x2
        Ho, Wo = Ht // 2, W // 2
        r = jnp.max(y.reshape(Ho, 2, W, Cout), axis=1)           # row-pair max
        p = jnp.max(r.reshape(Ho, Wo, 2, Cout), axis=2)          # col-pair max
        p_ref[0] = p.astype(p_ref.dtype)


def _conv3x3_relu_kernel(xc_ref, xt_ref, xb_ref, w_ref, b_ref, o_ref, xp_ref):
    _conv3x3_body(xc_ref, xt_ref, xb_ref, w_ref, b_ref, o_ref, None, xp_ref)


def _conv3x3_relu_pool_kernel(xc_ref, xt_ref, xb_ref, w_ref, b_ref, o_ref,
                              p_ref, xp_ref):
    _conv3x3_body(xc_ref, xt_ref, xb_ref, w_ref, b_ref, o_ref, p_ref, xp_ref)


def conv3x3_relu(x_nhwc, w_hwio, b, *, pool=False, compute_dtype=jnp.bfloat16):
    """3x3 conv (stride 1, pad 1) + bias + ReLU.  If pool=True, additionally
    returns the 2x2 max-pooled result computed in the same kernel."""
    N, H, W, Cin = x_nhwc.shape
    Cout = w_hwio.shape[-1]
    if pool:
        # TODO(synk): PyTorch MaxPool2d(2) floor-crops odd sizes; unsupported here.
        assert H % 2 == 0 and W % 2 == 0, "MaxPool2x2 needs even H, W here"

    Ht = _pick_h_tile(H, W, Cin, Cout, pool)
    n_ht = H // Ht

    w_c = w_hwio.astype(compute_dtype)               # bf16 weight DMA
    b2 = b.reshape(1, Cout).astype(jnp.float32)

    in_specs = [
        pl.BlockSpec((1, Ht, W, Cin), lambda n, h: (n, h, 0, 0)),
        # Row above the tile (element index; block size 1 on the H dim).
        pl.BlockSpec((1, 1, W, Cin),
                     lambda n, h: (n, jnp.maximum(h * Ht - 1, 0), 0, 0)),
        # Row below the tile.
        pl.BlockSpec((1, 1, W, Cin),
                     lambda n, h: (n, jnp.minimum((h + 1) * Ht, H - 1), 0, 0)),
        pl.BlockSpec((3, 3, Cin, Cout), lambda n, h: (0, 0, 0, 0)),
        pl.BlockSpec((1, Cout), lambda n, h: (0, 0)),
    ]
    out_spec_full = pl.BlockSpec((1, Ht, W, Cout), lambda n, h: (n, h, 0, 0))

    if pool:
        kernel = _conv3x3_relu_pool_kernel
        out_shape = (jax.ShapeDtypeStruct((N, H, W, Cout), x_nhwc.dtype),
                     jax.ShapeDtypeStruct((N, H // 2, W // 2, Cout), x_nhwc.dtype))
        out_specs = (out_spec_full,
                     pl.BlockSpec((1, Ht // 2, W // 2, Cout),
                                  lambda n, h: (n, h, 0, 0)))
    else:
        kernel = _conv3x3_relu_kernel
        out_shape = jax.ShapeDtypeStruct((N, H, W, Cout), x_nhwc.dtype)
        out_specs = out_spec_full

    vmem_limit = int(min(48 * 2**20,                 # stay below v7x physical
                         max(32 * 2**20,
                             2 * _conv_step_vmem_bytes(Ht, W, Cin, Cout, pool))))

    return pl.pallas_call(
        kernel,
        out_shape=out_shape,
        grid=(N, n_ht),
        in_specs=in_specs,
        out_specs=out_specs,
        scratch_shapes=[pltpu.VMEM((Ht + 2, W + 2, Cin), compute_dtype)],
        compiler_params=pltpu.CompilerParams(
            dimension_semantics=("parallel", "parallel"),   # batch + H tiles (v7x 2 TCs)
            vmem_limit_bytes=vmem_limit),
    )(x_nhwc, x_nhwc, x_nhwc, w_c, b2)


# ----------------------------------------------------------------------------
# Parameter init (deterministic, He-style), matching nn.Conv2d(3x3) shapes
# ----------------------------------------------------------------------------
def init_params(key, in_channels, channels):
    def conv_init(k, cin, cout):
        kw, kb = jax.random.split(k)
        scale = (2.0 / (cin * 9)) ** 0.5
        w = scale * jax.random.normal(kw, (3, 3, cin, cout), jnp.float32)  # HWIO
        b = 0.01 * jax.random.normal(kb, (cout,), jnp.float32)
        return w, b

    n_convs = 1 + 2 * (len(channels) - 1)
    keys = jax.random.split(key, n_convs)
    params = [[conv_init(keys[0], in_channels, channels[0])]]  # stage 0
    ki = 1
    for i in range(len(channels) - 1):                         # middle stages
        params.append([conv_init(keys[ki], channels[i], channels[i + 1]),
                       conv_init(keys[ki + 1], channels[i + 1], channels[i + 1])])
        ki += 2
    return params


# ----------------------------------------------------------------------------
# YNetEncoder.forward — returns list of per-stage features (NCHW, like PyTorch)
#
# Stage structure of the PyTorch module:
#   stage0:        Conv+ReLU                         -> feature[0]
#   stage1..n-1:   MaxPool -> Conv+ReLU -> Conv+ReLU -> feature[i]
#   stage n:       MaxPool                           -> feature[n]
# Every MaxPool consumes the previous stage's feature, so each pool is fused
# into the conv kernel that produces that feature.
# ----------------------------------------------------------------------------
def ynet_encoder_forward(x_nchw, params, channels, compute_dtype=jnp.bfloat16):
    x = jnp.transpose(x_nchw, (0, 2, 3, 1))                 # NCHW -> NHWC once
    feats = []
    feat, pooled = conv3x3_relu(x, *params[0][0], pool=True,
                                compute_dtype=compute_dtype)       # stage 0
    feats.append(feat)
    for i in range(1, len(channels)):                              # middle stages
        # TODO(synk): fuse these two convs into one pallas_call (halo recompute)
        # so the intermediate `y` never round-trips HBM.
        y = conv3x3_relu(pooled, *params[i][0], pool=False,
                         compute_dtype=compute_dtype)
        feat, pooled = conv3x3_relu(y, *params[i][1], pool=True,
                                    compute_dtype=compute_dtype)
        feats.append(feat)
    feats.append(pooled)                                           # final MaxPool stage
    # Return NCHW to match the PyTorch interface.
    # TODO(synk): keep features NHWC (and bf16) when the consumer allows it —
    # these transposes cost an extra full-tensor HBM pass per feature.
    return [jnp.transpose(f, (0, 3, 1, 2)) for f in feats]


# ----------------------------------------------------------------------------
# Pure-JAX reference (same bf16-input / f32-accumulate math, for correctness)
# ----------------------------------------------------------------------------
def _ref_forward(x_nchw, params, channels, compute_dtype=jnp.bfloat16):
    def conv(x, w, b):
        y = jax.lax.conv_general_dilated(
            x.astype(compute_dtype), w.astype(compute_dtype), (1, 1), "SAME",
            dimension_numbers=("NHWC", "HWIO", "NHWC"),
            preferred_element_type=jnp.float32)
        return jnp.maximum(y + b, 0.0)

    def pool(x):
        return jax.lax.reduce_window(x, -jnp.inf, jax.lax.max,
                                     (1, 2, 2, 1), (1, 2, 2, 1), "VALID")

    x = jnp.transpose(x_nchw, (0, 2, 3, 1))
    feats = []
    x = conv(x, *params[0][0]); feats.append(x)
    for i in range(1, len(channels)):
        x = pool(x)
        x = conv(x, *params[i][0])
        x = conv(x, *params[i][1])
        feats.append(x)
    x = pool(x); feats.append(x)
    return [jnp.transpose(f, (0, 3, 1, 2)) for f in feats]


if __name__ == "__main__":
    key = jax.random.PRNGKey(0)
    kx, kp = jax.random.split(key)

    # Small shapes consistent with the module: in_channels = semantic + obs_len.
    # NOTE: real YNet channels are (64, 128, 256, 512, 512); the toy Cout<128
    # leaves lanes under-filled — benchmark with real channel counts.
    batch, in_channels, H, W = 2, 4, 16, 16
    channels = (8, 16, 32)

    x = jax.random.normal(kx, (batch, in_channels, H, W), jnp.float32)
    params = init_params(kp, in_channels, channels)

    feats = ynet_encoder_forward(x, params, channels)
    feats = jax.block_until_ready(feats)

    # Expected feature shapes (NCHW): stage outputs of the encoder.
    expected = [(batch, channels[0], H, W),
                (batch, channels[1], H // 2, W // 2),
                (batch, channels[2], H // 4, W // 4),
                (batch, channels[2], H // 8, W // 8)]
    ref = _ref_forward(x, params, channels)
    assert len(feats) == len(expected) == len(ref)
    for f, r, shp in zip(feats, ref, expected):
        assert f.shape == shp, (f.shape, shp)
        denom = jnp.maximum(1.0, jnp.abs(r))
        err = float(jnp.max(jnp.abs(f - r) / denom))
        assert err < 2e-2, f"max rel err {err}"

    print("KERNEL_OK")
</pallas_src>

<mosaic_0001>
module attributes {stable_mosaic.version = 11 : i64} {
  func.func @_conv3x3_relu_pool_kernel(%arg0: i32, %arg1: i32, %arg2: memref<1x16x16x4xf32, #tpu.memory_space<vmem>>, %arg3: memref<1x1x16x4xf32, #tpu.memory_space<vmem>>, %arg4: memref<1x1x16x4xf32, #tpu.memory_space<vmem>>, %arg5: memref<3x3x4x8xbf16, #tpu.memory_space<vmem>>, %arg6: memref<1x8xf32, #tpu.memory_space<vmem>>, %arg7: memref<1x16x16x8xf32, #tpu.memory_space<vmem>>, %arg8: memref<1x8x8x8xf32, #tpu.memory_space<vmem>>, %arg9: memref<18x18x4xbf16, #tpu.memory_space<vmem>>) attributes {dimension_semantics = [#tpu.dimension_semantics<parallel>, #tpu.dimension_semantics<parallel>], iteration_bounds = array<i64: 2, 1>, scalar_prefetch = 0 : i64, scratch_operands = 1 : i64, tpu.core_type = #tpu.core_type<tc>, window_params = [{transform_indices = @transform_0, window_bounds = array<i64: 1, 16, 16, 4>}, {transform_indices = @transform_1, window_bounds = array<i64: 1, 1, 16, 4>}, {transform_indices = @transform_2, window_bounds = array<i64: 1, 1, 16, 4>}, {pipeline_mode = #tpu.pipeline_mode<synchronous>, transform_indices = @transform_3, window_bounds = array<i64: 3, 3, 4, 8>}, {pipeline_mode = #tpu.pipeline_mode<synchronous>, transform_indices = @transform_4, window_bounds = array<i64: 1, 8>}, {transform_indices = @transform_5, window_bounds = array<i64: 1, 16, 16, 8>}, {transform_indices = @transform_6, window_bounds = array<i64: 1, 8, 8, 8>}]} {
    %c0_i32 = arith.constant 0 : i32
    %0 = arith.cmpi eq, %arg1, %c0_i32 : i32
    %c0_i32_0 = arith.constant 0 : i32
    %1 = arith.cmpi eq, %arg1, %c0_i32_0 : i32
    %cst = arith.constant 0.000000e+00 : bf16
    %2 = vector.broadcast %cst : bf16 to vector<18x1x4xbf16>
    %c0 = arith.constant 0 : index
    %c0_1 = arith.constant 0 : index
    %c0_2 = arith.constant 0 : index
    %3 = vector.load %arg9[%c0, %c0_1, %c0_2] : memref<18x18x4xbf16, #tpu.memory_space<vmem>>, vector<18x1x4xbf16>
    tpu.vector_store %arg9[%c0, %c0_1, %c0_2], %2 {strides = array<i32>} : memref<18x18x4xbf16, #tpu.memory_space<vmem>>, vector<18x1x4xbf16>,
    %c0_3 = arith.constant 0 : index
    %c17 = arith.constant 17 : index
    %c0_4 = arith.constant 0 : index
    %4 = vector.load %arg9[%c0_3, %c17, %c0_4] : memref<18x18x4xbf16, #tpu.memory_space<vmem>>, vector<18x1x4xbf16>
    tpu.vector_store %arg9[%c0_3, %c17, %c0_4], %2 {strides = array<i32>} : memref<18x18x4xbf16, #tpu.memory_space<vmem>>, vector<18x1x4xbf16>,
    %c0_5 = arith.constant 0 : index
    %c0_6 = arith.constant 0 : index
    %c0_7 = arith.constant 0 : index
    %c0_8 = arith.constant 0 : index
    %5 = vector.load %arg3[%c0_5, %c0_6, %c0_7, %c0_8] : memref<1x1x16x4xf32, #tpu.memory_space<vmem>>, vector<1x1x16x4xf32>
    %6 = vector.shape_cast %5 : vector<1x1x16x4xf32> to vector<1x16x4xf32>
    %7 = arith.truncf %6 : vector<1x16x4xf32> to vector<1x16x4xbf16>
    %c0_9 = arith.constant 0 : index
    %c1 = arith.constant 1 : index
    %c0_10 = arith.constant 0 : index
    %8 = vector.load %arg9[%c0_9, %c1, %c0_10] : memref<18x18x4xbf16, #tpu.memory_space<vmem>>, vector<1x16x4xbf16>
    tpu.vector_store %arg9[%c0_9, %c1, %c0_10], %7 {strides = array<i32>} : memref<18x18x4xbf16, #tpu.memory_space<vmem>>, vector<1x16x4xbf16>,
    %c0_11 = arith.constant 0 : index
    %c0_12 = arith.constant 0 : index
    %c0_13 = arith.constant 0 : index
    %c0_14 = arith.constant 0 : index
    %9 = vector.load %arg4[%c0_11, %c0_12, %c0_13, %c0_14] : memref<1x1x16x4xf32, #tpu.memory_space<vmem>>, vector<1x1x16x4xf32>
    %10 = vector.shape_cast %9 : vector<1x1x16x4xf32> to vector<1x16x4xf32>
    %11 = arith.truncf %10 : vector<1x16x4xf32> to vector<1x16x4xbf16>
    %c17_15 = arith.constant 17 : index
    %c1_16 = arith.constant 1 : index
    %c0_17 = arith.constant 0 : index
    %12 = vector.load %arg9[%c17_15, %c1_16, %c0_17] : memref<18x18x4xbf16, #tpu.memory_space<vmem>>, vector<1x16x4xbf16>
    tpu.vector_store %arg9[%c17_15, %c1_16, %c0_17], %11 {strides = array<i32>} : memref<18x18x4xbf16, #tpu.memory_space<vmem>>, vector<1x16x4xbf16>,
    %13 = arith.extui %0 : i1 to i32
    %c0_i32_18 = arith.constant 0 : i32
    %14 = arith.cmpi ne, %13, %c0_i32_18 : i32
    scf.if %14 {
      %cst_111 = arith.constant 0.000000e+00 : bf16
      %90 = vector.broadcast %cst_111 : bf16 to vector<1x16x4xbf16>
      %c0_112 = arith.constant 0 : index
      %c1_113 = arith.constant 1 : index
      %c0_114 = arith.constant 0 : index
      %91 = vector.load %arg9[%c0_112, %c1_113, %c0_114] : memref<18x18x4xbf16, #tpu.memory_space<vmem>>, vector<1x16x4xbf16>
      tpu.vector_store %arg9[%c0_112, %c1_113, %c0_114], %90 {strides = array<i32>} : memref<18x18x4xbf16, #tpu.memory_space<vmem>>, vector<1x16x4xbf16>,
    } else {
    }
    %15 = arith.extui %1 : i1 to i32
    %c0_i32_19 = arith.constant 0 : i32
    %16 = arith.cmpi ne, %15, %c0_i32_19 : i32
    scf.if %16 {
      %cst_111 = arith.constant 0.000000e+00 : bf16
      %90 = vector.broadcast %cst_111 : bf16 to vector<1x16x4xbf16>
      %c17_112 = arith.constant 17 : index
      %c1_113 = arith.constant 1 : index
      %c0_114 = arith.constant 0 : index
      %91 = vector.load %arg9[%c17_112, %c1_113, %c0_114] : memref<18x18x4xbf16, #tpu.memory_space<vmem>>, vector<1x16x4xbf16>
      tpu.vector_store %arg9[%c17_112, %c1_113, %c0_114], %90 {strides = array<i32>} : memref<18x18x4xbf16, #tpu.memory_space<vmem>>, vector<1x16x4xbf16>,
    } else {
    }
    %c0_20 = arith.constant 0 : index
    %c0_21 = arith.constant 0 : index
    %c0_22 = arith.constant 0 : index
    %c0_23 = arith.constant 0 : index
    %17 = vector.load %arg2[%c0_20, %c0_21, %c0_22, %c0_23] : memref<1x16x16x4xf32, #tpu.memory_space<vmem>>, vector<1x16x16x4xf32>
    %18 = vector.shape_cast %17 : vector<1x16x16x4xf32> to vector<16x16x4xf32>
    %19 = arith.truncf %18 : vector<16x16x4xf32> to vector<16x16x4xbf16>
    %c1_24 = arith.constant 1 : index
    %c1_25 = arith.constant 1 : index
    %c0_26 = arith.constant 0 : index
    %20 = vector.load %arg9[%c1_24, %c1_25, %c0_26] : memref<18x18x4xbf16, #tpu.memory_space<vmem>>, vector<16x16x4xbf16>
    tpu.vector_store %arg9[%c1_24, %c1_25, %c0_26], %19 {strides = array<i32>} : memref<18x18x4xbf16, #tpu.memory_space<vmem>>, vector<16x16x4xbf16>,
    %c0_27 = arith.constant 0 : index
    %c0_28 = arith.constant 0 : index
    %c0_29 = arith.constant 0 : index
    %21 = vector.load %arg9[%c0_27, %c0_28, %c0_29] : memref<18x18x4xbf16, #tpu.memory_space<vmem>>, vector<16x16x4xbf16>
    %22 = vector.shape_cast %21 : vector<16x16x4xbf16> to vector<256x4xbf16>
    %c0_30 = arith.constant 0 : index
    %c0_31 = arith.constant 0 : index
    %c0_32 = arith.constant 0 : index
    %c0_33 = arith.constant 0 : index
    %23 = vector.load %arg5[%c0_30, %c0_31, %c0_32, %c0_33] : memref<3x3x4x8xbf16, #tpu.memory_space<vmem>>, vector<1x1x4x8xbf16>
    %24 = vector.shape_cast %23 : vector<1x1x4x8xbf16> to vector<4x8xbf16>
    %cst_34 = arith.constant dense<0.000000e+00> : vector<256x8xf32>
    %25 = tpu.matmul %22, %24, %cst_34 {dimension_numbers = #tpu.dot_dimension_numbers<[1], [0], [0], [1], [0, 0, 1, 1], [], []>} : vector<256x4xbf16>, vector<4x8xbf16>, vector<256x8xf32> -> vector<256x8xf32>
    %c0_35 = arith.constant 0 : index
    %c1_36 = arith.constant 1 : index
    %c0_37 = arith.constant 0 : index
    %26 = vector.load %arg9[%c0_35, %c1_36, %c0_37] : memref<18x18x4xbf16, #tpu.memory_space<vmem>>, vector<16x16x4xbf16>
    %27 = vector.shape_cast %26 : vector<16x16x4xbf16> to vector<256x4xbf16>
    %c0_38 = arith.constant 0 : index
    %c1_39 = arith.constant 1 : index
    %c0_40 = arith.constant 0 : index
    %c0_41 = arith.constant 0 : index
    %28 = vector.load %arg5[%c0_38, %c1_39, %c0_40, %c0_41] : memref<3x3x4x8xbf16, #tpu.memory_space<vmem>>, vector<1x1x4x8xbf16>
    %29 = vector.shape_cast %28 : vector<1x1x4x8xbf16> to vector<4x8xbf16>
    %cst_42 = arith.constant dense<0.000000e+00> : vector<256x8xf32>
    %30 = tpu.matmul %27, %29, %cst_42 {dimension_numbers = #tpu.dot_dimension_numbers<[1], [0], [0], [1], [0, 0, 1, 1], [], []>} : vector<256x4xbf16>, vector<4x8xbf16>, vector<256x8xf32> -> vector<256x8xf32>
    %31 = arith.addf %25, %30 : vector<256x8xf32>
    %c0_43 = arith.constant 0 : index
    %c2 = arith.constant 2 : index
    %c0_44 = arith.constant 0 : index
    %32 = vector.load %arg9[%c0_43, %c2, %c0_44] : memref<18x18x4xbf16, #tpu.memory_space<vmem>>, vector<16x16x4xbf16>
    %33 = vector.shape_cast %32 : vector<16x16x4xbf16> to vector<256x4xbf16>
    %c0_45 = arith.constant 0 : index
    %c2_46 = arith.constant 2 : index
    %c0_47 = arith.constant 0 : index
    %c0_48 = arith.constant 0 : index
    %34 = vector.load %arg5[%c0_45, %c2_46, %c0_47, %c0_48] : memref<3x3x4x8xbf16, #tpu.memory_space<vmem>>, vector<1x1x4x8xbf16>
    %35 = vector.shape_cast %34 : vector<1x1x4x8xbf16> to vector<4x8xbf16>
    %cst_49 = arith.constant dense<0.000000e+00> : vector<256x8xf32>
    %36 = tpu.matmul %33, %35, %cst_49 {dimension_numbers = #tpu.dot_dimension_numbers<[1], [0], [0], [1], [0, 0, 1, 1], [], []>} : vector<256x4xbf16>, vector<4x8xbf16>, vector<256x8xf32> -> vector<256x8xf32>
    %37 = arith.addf %31, %36 : vector<256x8xf32>
    %c1_50 = arith.constant 1 : index
    %c0_51 = arith.constant 0 : index
    %c0_52 = arith.constant 0 : index
    %38 = vector.load %arg9[%c1_50, %c0_51, %c0_52] : memref<18x18x4xbf16, #tpu.memory_space<vmem>>, vector<16x16x4xbf16>
    %39 = vector.shape_cast %38 : vector<16x16x4xbf16> to vector<256x4xbf16>
    %c1_53 = arith.constant 1 : index
    %c0_54 = arith.constant 0 : index
    %c0_55 = arith.constant 0 : index
    %c0_56 = arith.constant 0 : index
    %40 = vector.load %arg5[%c1_53, %c0_54, %c0_55, %c0_56] : memref<3x3x4x8xbf16, #tpu.memory_space<vmem>>, vector<1x1x4x8xbf16>
    %41 = vector.shape_cast %40 : vector<1x1x4x8xbf16> to vector<4x8xbf16>
    %cst_57 = arith.constant dense<0.000000e+00> : vector<256x8xf32>
    %42 = tpu.matmul %39, %41, %cst_57 {dimension_numbers = #tpu.dot_dimension_numbers<[1], [0], [0], [1], [0, 0, 1, 1], [], []>} : vector<256x4xbf16>, vector<4x8xbf16>, vector<256x8xf32> -> vector<256x8xf32>
    %43 = arith.addf %37, %42 : vector<256x8xf32>
    %c1_58 = arith.constant 1 : index
    %c1_59 = arith.constant 1 : index
    %c0_60 = arith.constant 0 : index
    %44 = vector.load %arg9[%c1_58, %c1_59, %c0_60] : memref<18x18x4xbf16, #tpu.memory_space<vmem>>, vector<16x16x4xbf16>
    %45 = vector.shape_cast %44 : vector<16x16x4xbf16> to vector<256x4xbf16>
    %c1_61 = arith.constant 1 : index
    %c1_62 = arith.constant 1 : index
    %c0_63 = arith.constant 0 : index
    %c0_64 = arith.constant 0 : index
    %46 = vector.load %arg5[%c1_61, %c1_62, %c0_63, %c0_64] : memref<3x3x4x8xbf16, #tpu.memory_space<vmem>>, vector<1x1x4x8xbf16>
    %47 = vector.shape_cast %46 : vector<1x1x4x8xbf16> to vector<4x8xbf16>
    %cst_65 = arith.constant dense<0.000000e+00> : vector<256x8xf32>
    %48 = tpu.matmul %45, %47, %cst_65 {dimension_numbers = #tpu.dot_dimension_numbers<[1], [0], [0], [1], [0, 0, 1, 1], [], []>} : vector<256x4xbf16>, vector<4x8xbf16>, vector<256x8xf32> -> vector<256x8xf32>
    %49 = arith.addf %43, %48 : vector<256x8xf32>
    %c1_66 = arith.constant 1 : index
    %c2_67 = arith.constant 2 : index
    %c0_68 = arith.constant 0 : index
    %50 = vector.load %arg9[%c1_66, %c2_67, %c0_68] : memref<18x18x4xbf16, #tpu.memory_space<vmem>>, vector<16x16x4xbf16>
    %51 = vector.shape_cast %50 : vector<16x16x4xbf16> to vector<256x4xbf16>
    %c1_69 = arith.constant 1 : index
    %c2_70 = arith.constant 2 : index
    %c0_71 = arith.constant 0 : index
    %c0_72 = arith.constant 0 : index
    %52 = vector.load %arg5[%c1_69, %c2_70, %c0_71, %c0_72] : memref<3x3x4x8xbf16, #tpu.memory_space<vmem>>, vector<1x1x4x8xbf16>
    %53 = vector.shape_cast %52 : vector<1x1x4x8xbf16> to vector<4x8xbf16>
    %cst_73 = arith.constant dense<0.000000e+00> : vector<256x8xf32>
    %54 = tpu.matmul %51, %53, %cst_73 {dimension_numbers = #tpu.dot_dimension_numbers<[1], [0], [0], [1], [0, 0, 1, 1], [], []>} : vector<256x4xbf16>, vector<4x8xbf16>, vector<256x8xf32> -> vector<256x8xf32>
    %55 = arith.addf %49, %54 : vector<256x8xf32>
    %c2_74 = arith.constant 2 : index
    %c0_75 = arith.constant 0 : index
    %c0_76 = arith.constant 0 : index
    %56 = vector.load %arg9[%c2_74, %c0_75, %c0_76] : memref<18x18x4xbf16, #tpu.memory_space<vmem>>, vector<16x16x4xbf16>
    %57 = vector.shape_cast %56 : vector<16x16x4xbf16> to vector<256x4xbf16>
    %c2_77 = arith.constant 2 : index
    %c0_78 = arith.constant 0 : index
    %c0_79 = arith.constant 0 : index
    %c0_80 = arith.constant 0 : index
    %58 = vector.load %arg5[%c2_77, %c0_78, %c0_79, %c0_80] : memref<3x3x4x8xbf16, #tpu.memory_space<vmem>>, vector<1x1x4x8xbf16>
    %59 = vector.shape_cast %58 : vector<1x1x4x8xbf16> to vector<4x8xbf16>
    %cst_81 = arith.constant dense<0.000000e+00> : vector<256x8xf32>
    %60 = tpu.matmul %57, %59, %cst_81 {dimension_numbers = #tpu.dot_dimension_numbers<[1], [0], [0], [1], [0, 0, 1, 1], [], []>} : vector<256x4xbf16>, vector<4x8xbf16>, vector<256x8xf32> -> vector<256x8xf32>
    %61 = arith.addf %55, %60 : vector<256x8xf32>
    %c2_82 = arith.constant 2 : index
    %c1_83 = arith.constant 1 : index
    %c0_84 = arith.constant 0 : index
    %62 = vector.load %arg9[%c2_82, %c1_83, %c0_84] : memref<18x18x4xbf16, #tpu.memory_space<vmem>>, vector<16x16x4xbf16>
    %63 = vector.shape_cast %62 : vector<16x16x4xbf16> to vector<256x4xbf16>
    %c2_85 = arith.constant 2 : index
    %c1_86 = arith.constant 1 : index
    %c0_87 = arith.constant 0 : index
    %c0_88 = arith.constant 0 : index
    %64 = vector.load %arg5[%c2_85, %c1_86, %c0_87, %c0_88] : memref<3x3x4x8xbf16, #tpu.memory_space<vmem>>, vector<1x1x4x8xbf16>
    %65 = vector.shape_cast %64 : vector<1x1x4x8xbf16> to vector<4x8xbf16>
    %cst_89 = arith.constant dense<0.000000e+00> : vector<256x8xf32>
    %66 = tpu.matmul %63, %65, %cst_89 {dimension_numbers = #tpu.dot_dimension_numbers<[1], [0], [0], [1], [0, 0, 1, 1], [], []>} : vector<256x4xbf16>, vector<4x8xbf16>, vector<256x8xf32> -> vector<256x8xf32>
    %67 = arith.addf %61, %66 : vector<256x8xf32>
    %c2_90 = arith.constant 2 : index
    %c2_91 = arith.constant 2 : index
    %c0_92 = arith.constant 0 : index
    %68 = vector.load %arg9[%c2_90, %c2_91, %c0_92] : memref<18x18x4xbf16, #tpu.memory_space<vmem>>, vector<16x16x4xbf16>
    %69 = vector.shape_cast %68 : vector<16x16x4xbf16> to vector<256x4xbf16>
    %c2_93 = arith.constant 2 : index
    %c2_94 = arith.constant 2 : index
    %c0_95 = arith.constant 0 : index
    %c0_96 = arith.constant 0 : index
    %70 = vector.load %arg5[%c2_93, %c2_94, %c0_95, %c0_96] : memref<3x3x4x8xbf16, #tpu.memory_space<vmem>>, vector<1x1x4x8xbf16>
    %71 = vector.shape_cast %70 : vector<1x1x4x8xbf16> to vector<4x8xbf16>
    %cst_97 = arith.constant dense<0.000000e+00> : vector<256x8xf32>
    %72 = tpu.matmul %69, %71, %cst_97 {dimension_numbers = #tpu.dot_dimension_numbers<[1], [0], [0], [1], [0, 0, 1, 1], [], []>} : vector<256x4xbf16>, vector<4x8xbf16>, vector<256x8xf32> -> vector<256x8xf32>
    %73 = arith.addf %67, %72 : vector<256x8xf32>
    %c0_98 = arith.constant 0 : index
    %c0_99 = arith.constant 0 : index
    %74 = vector.load %arg6[%c0_98, %c0_99] : memref<1x8xf32, #tpu.memory_space<vmem>>, vector<1x8xf32>
    %75 = vector.broadcast %74 : vector<1x8xf32> to vector<256x8xf32>
    %76 = arith.addf %73, %75 : vector<256x8xf32>
    %cst_100 = arith.constant 0.000000e+00 : f32
    %77 = vector.broadcast %cst_100 : f32 to vector<256x8xf32>
    %78 = arith.maximumf %76, %77 : vector<256x8xf32>
    %79 = vector.shape_cast %78 : vector<256x8xf32> to vector<16x16x8xf32>
    %c0_101 = arith.constant 0 : index
    %c0_102 = arith.constant 0 : index
    %c0_103 = arith.constant 0 : index
    %c0_104 = arith.constant 0 : index
    %80 = vector.load %arg7[%c0_101, %c0_102, %c0_103, %c0_104] : memref<1x16x16x8xf32, #tpu.memory_space<vmem>>, vector<1x16x16x8xf32>
    %81 = vector.shape_cast %80 : vector<1x16x16x8xf32> to vector<16x16x8xf32>
    %82 = vector.shape_cast %79 : vector<16x16x8xf32> to vector<1x16x16x8xf32>
    tpu.vector_store %arg7[%c0_101, %c0_102, %c0_103, %c0_104], %82 {strides = array<i32>} : memref<1x16x16x8xf32, #tpu.memory_space<vmem>>, vector<1x16x16x8xf32>,
    %83 = vector.shape_cast %78 : vector<256x8xf32> to vector<8x2x16x8xf32>
    %cst_105 = arith.constant dense<0xFF800000> : vector<8x16x8xf32>
    %84 = vector.multi_reduction <maximumf>, %83, %cst_105 [1] : vector<8x2x16x8xf32> to vector<8x16x8xf32>
    %85 = vector.shape_cast %84 : vector<8x16x8xf32> to vector<8x8x2x8xf32>
    %cst_106 = arith.constant dense<0xFF800000> : vector<8x8x8xf32>
    %86 = vector.multi_reduction <maximumf>, %85, %cst_106 [2] : vector<8x8x2x8xf32> to vector<8x8x8xf32>
    %c0_107 = arith.constant 0 : index
    %c0_108 = arith.constant 0 : index
    %c0_109 = arith.constant 0 : index
    %c0_110 = arith.constant 0 : index
    %87 = vector.load %arg8[%c0_107, %c0_108, %c0_109, %c0_110] : memref<1x8x8x8xf32, #tpu.memory_space<vmem>>, vector<1x8x8x8xf32>
    %88 = vector.shape_cast %87 : vector<1x8x8x8xf32> to vector<8x8x8xf32>
    %89 = vector.shape_cast %86 : vector<8x8x8xf32> to vector<1x8x8x8xf32>
    tpu.vector_store %arg8[%c0_107, %c0_108, %c0_109, %c0_110], %89 {strides = array<i32>} : memref<1x8x8x8xf32, #tpu.memory_space<vmem>>, vector<1x8x8x8xf32>,
    return
  }
  func.func @transform_0(%arg0: i32, %arg1: i32) -> (i32, i32, i32, i32) {
    %c0_i32 = arith.constant 0 : i32
    %c0_i32_0 = arith.constant 0 : i32
    %c0_i32_1 = arith.constant 0 : i32
    return %arg0, %arg1, %c0_i32, %c0_i32_0 : i32, i32, i32, i32
  }
  func.func @transform_1(%arg0: i32, %arg1: i32) -> (i32, i32, i32, i32) {
    %c16_i32 = arith.constant 16 : i32
    %0 = arith.muli %arg1, %c16_i32 : i32
    %c1_i32 = arith.constant 1 : i32
    %1 = arith.subi %0, %c1_i32 : i32
    %c0_i32 = arith.constant 0 : i32
    %2 = arith.maxsi %1, %c0_i32 : i32
    %c0_i32_0 = arith.constant 0 : i32
    %c0_i32_1 = arith.constant 0 : i32
    %c0_i32_2 = arith.constant 0 : i32
    return %arg0, %2, %c0_i32_0, %c0_i32_1 : i32, i32, i32, i32
  }
  func.func @transform_2(%arg0: i32, %arg1: i32) -> (i32, i32, i32, i32) {
    %c1_i32 = arith.constant 1 : i32
    %0 = arith.addi %arg1, %c1_i32 : i32
    %c16_i32 = arith.constant 16 : i32
    %1 = arith.muli %0, %c16_i32 : i32
    %c15_i32 = arith.constant 15 : i32
    %2 = arith.minsi %1, %c15_i32 : i32
    %c0_i32 = arith.constant 0 : i32
    %c0_i32_0 = arith.constant 0 : i32
    %c0_i32_1 = arith.constant 0 : i32
    return %arg0, %2, %c0_i32, %c0_i32_0 : i32, i32, i32, i32
  }
  func.func @transform_3(%arg0: i32, %arg1: i32) -> (i32, i32, i32, i32) {
    %c0_i32 = arith.constant 0 : i32
    %c0_i32_0 = arith.constant 0 : i32
    %c0_i32_1 = arith.constant 0 : i32
    %c0_i32_2 = arith.constant 0 : i32
    %c0_i32_3 = arith.constant 0 : i32
    return %c0_i32, %c0_i32_0, %c0_i32_1, %c0_i32_2 : i32, i32, i32, i32
  }
  func.func @transform_4(%arg0: i32, %arg1: i32) -> (i32, i32) {
    %c0_i32 = arith.constant 0 : i32
    %c0_i32_0 = arith.constant 0 : i32
    %c0_i32_1 = arith.constant 0 : i32
    return %c0_i32, %c0_i32_0 : i32, i32
  }
  func.func @transform_5(%arg0: i32, %arg1: i32) -> (i32, i32, i32, i32) {
    %c0_i32 = arith.constant 0 : i32
    %c0_i32_0 = arith.constant 0 : i32
    %c0_i32_1 = arith.constant 0 : i32
    return %arg0, %arg1, %c0_i32, %c0_i32_0 : i32, i32, i32, i32
  }
  func.func @transform_6(%arg0: i32, %arg1: i32) -> (i32, i32, i32, i32) {
    %c0_i32 = arith.constant 0 : i32
    %c0_i32_0 = arith.constant 0 : i32
    %c0_i32_1 = arith.constant 0 : i32
    return %arg0, %arg1, %c0_i32, %c0_i32_0 : i32, i32, i32, i32
  }
}

</mosaic_0001>

<bundles_post_ra>
// kernel: tpu_custom_call.1
= control target key start
LH: loop header
LB: loop body
LE: loop exit
PB: predicated region body
PF: predicated region fallthrough
CT: control target
= control target key end

     0   :  { %12 = vsyncpa [#allocation4], 0  ;;  %s10937_s0 = inlined_call_operand.vmem [shape: f32[2,16,16,4], index: 0, kind: input, shape index: {}]   ;;  %s10938_s1 = inlined_call_operand.vmem [shape: f32[2,16,16,4], index: 1, kind: input, shape index: {}]   ;;  %s10939_s2 = inlined_call_operand.vmem [shape: f32[2,16,16,4], index: 2, kind: input, shape index: {}]   ;;  %s10940_s3 = inlined_call_operand.vmem [shape: bf16[3,3,4,8], index: 3, kind: input, shape index: {}]   ;;  %s10941_s4 = inlined_call_operand.vmem [shape: f32[1,8], index: 4, kind: input, shape index: {}]   ;;  %s10942_s5 = inlined_call_operand.vmem [shape: f32[2,16,16,8], index: 5, kind: output, shape index: {0}]   ;;  %s10943_s6 = inlined_call_operand.hbm [shape: f32[2,8,8,8], index: 6, kind: output, shape index: {1}]  }
   0x1   :  { %14 = vsyncpa [#allocation4 + $0x1], 0  ;;  %s8502_s21 = smov 0   ;;  %s8504_s22 = smov 0  }
   0x2   :  { %s8506_s23 = smov 0   ;;  %s8508_s24 = smov 0  }
   0x3   :  { %s8510_s25 = smov 0   ;;  %s8512_s26 = smov 0  }
   0x4 LB: > { %s7053_s27 = sadd.s32 4294967295, %s8460_s26   ;;  %s7054_s28 = sadd.s32 4294967294, %s8460_s26   ;;  %s8460_s26 = sphi %s8512_s26, %s20_s26   ;;  %s8456_s25 = sphi %s8510_s25, %s11057_s25   ;;  %s8452_s24 = sphi %s8508_s24, %s11056_s24   ;;  %s8448_s23 = sphi %s8506_s23, %s11055_s23   ;;  %s8444_s22 = sphi %s8504_s22, %s11054_s22   ;;  %s8440_s21 = sphi %s8502_s21, %s11053_s21  }
   0x5   : > { %s32_s29 = sadd.s32 1, %s8456_s25  ;;  %s211_s30 = sadd.s32 1, %s8448_s23 }
   0x6   : > { %p34_p0 = scmp.ge.s32.totalorder %s32_s29, 2  ;;  %p221_p1 = scmp.ne.s32.totalorder %s8448_s23, %s8444_s22 }
   0x7   : > { %p222_p2 = scmp.eq.s32.totalorder %s7053_s27, 1  ;;  %p227_p3 = scmp.ne.s32.totalorder %s8444_s22, %s8440_s21 }
   0x8   : > { %s11059_s29 = smov (%p34_p0, %s32_s29), 0  ;;  %p228_p5 = scmp.eq.s32.totalorder %s7054_s28, 1 }
   0x9   : > { %p8542_p4 = por %p222_p2, %p221_p1  ;;  %s206_s8 = ssub.s32 %s8456_s25, %s11059_s29 }
   0xa   : > { %p7057_p6 = scmp.ge.s32.totalorder %s8460_s26, 1  ;;  %p209_p7 = scmp.eq.s32.totalorder %s206_s8, 0 }
   0xb   : > { %p8549_p8 = por %p228_p5, %p227_p3  ;;  %p306_p9 = scmp.lt.s32.totalorder %s8460_s26, 3 }
   0xc   : > { %s8555_s10 = scalar_select %p209_p7, %s8448_s23, %s211_s30  }
   0xd   : > { %p307_p10 = pnand %p7057_p6, %p306_p9 }
   0xf   : > { %310 = sbr.rel (%p307_p10) target bundleno = 813 (0x32d), region = 40 }
  0x16   : > { %vm1738_vm0 = vcmask 1041408   ;;  %v7250_v0 = vld [vmem:[%s10940_s3 + $0x8] sm:$0x3]  ;;  %p378_p11 = scmp.lt.s32.totalorder %s8452_s24, 1  ;;  %vm436_vm1 = vcmask 24576   ;;  %v10965_v3 = vmov 0 }
  0x17   : > { %8217 = vmatprep.subr.msk.bf16.mxu0 %vm1738_vm0, %v7250_v0  ;;  %v8563_v1 = vsel %vm1738_vm0, %v7250_v0, 0  ;;  %vm437_vm2 = vsmask.f32 256  ;;  %v442_v2 = vld [vmem:[#allocation2 + $0xc] sm:$0x1]  ;;  %v10968_v6 = vmov 0 }
  0x18   : > { %10964 = vst [vmem:[#allocation6_spill] sm:$0xff] %v8563_v1  ;;  %7786 = vmatpush3.bf16.msra.mxu0 %v8563_v1  ;;  %s379_s13 = scalar_select %p378_p11, %s8452_s24, 1  ;;  %vm8568_vm3 = vmand %vm436_vm1, %vm437_vm2  ;;  %vm493_vm4 = vsmask.f32 7938  ;;  %v498_v4 = vld [vmem:[#allocation2 + $0x14] sm:$0x1] }
  0x19   : > { %v10966_v3 = vsel %vm8568_vm3, 4294967295, %v10965_v3  ;;  %v443_v5 = vsel %vm8568_vm3, 0, %v442_v2  ;;  %vm8575_vm5 = vmand %vm436_vm1, %vm493_vm4  ;;  %v445_v8 = vld [vmem:[#allocation2 + $0x18] sm:$0x1]  ;;  %v501_v10 = vld [vmem:[#allocation2 + $0x20] sm:$0x1] }
  0x1a   : > { %10967 = vst [vmem:[#allocation7_spill] sm:$0xff] %v10966_v3  ;;  %v10969_v6 = vsel %vm8575_vm5, 4294967295, %v10968_v6  ;;  %s8579_s14 = sshll.u32 %s379_s13, 8  ;;  %444 = vst [vmem:[#allocation2 + $0xc] sm:$0x1] %v443_v5  ;;  %v499_v7 = vsel %vm8575_vm5, 0, %v498_v4 }
  0x1b   : > { %10970 = vst [vmem:[#allocation8_spill] sm:$0xff] %v10969_v6  ;;  %s8587_s17 = scalar_lea.vmem %s10937_s0, %s8579_s14  ;;  %500 = vst [vmem:[#allocation2 + $0x14] sm:$0x1] %v499_v7  ;;  %v446_v9 = vsel %vm8568_vm3, 0, %v445_v8  ;;  %v7103_v11 = vld [vmem:[%s10940_s3 + $0x2] sm:$0x3]  ;;  %s400_s28 = scalar_lea.vmem %s10938_s1, %s8579_s14 }
  0x1c   : > { %v642_v12 = vld [vmem:[%s8587_s17] sm:$0xff]  ;;  %v643_v13 = vld [vmem:[%s8587_s17 + $0x8] sm:$0xff]  ;;  %447 = vst [vmem:[#allocation2 + $0x18] sm:$0x1] %v446_v9  ;;  %v502_v14 = vsel %vm8575_vm5, 0, %v501_v10  ;;  %8213 = vmatprep.subr.msk.bf16.mxu1 %vm1738_vm0, %v7103_v11  ;;  %v1740_v15 = vsel %vm1738_vm0, %v7103_v11, 0  ;;  %s10402_s11 = scalar_lea.vmem %s10942_s5, %s8579_s14 }
  0x1d   : > { %vm557_vm6 = vsmask.f32 4368  ;;  %v7462_v16 = vpack.c.bf16 %v642_v12, %v642_v12  ;;  %v7463_v17 = vpack.c.bf16 %v643_v13, %v643_v13  ;;  %503 = vst [vmem:[#allocation2 + $0x20] sm:$0x1] %v502_v14  ;;  %v644_v18 = vld [vmem:[%s8587_s17 + $0x10] sm:$0xff]  ;;  %v645_v19 = vld [vmem:[%s8587_s17 + $0x18] sm:$0xff]  ;;  %7650 = vmatpush3.bf16.msra.mxu1 %v1740_v15 }
  0x1e   : > { %v448_v20 = vld [vmem:[#allocation2 + $0x24] sm:$0x1]  ;;  %vm579_vm7 = vcmask 27648   ;;  %v7464_v21 = vpack.c.bf16 %v644_v18, %v644_v18  ;;  %v7465_v22 = vpack.c.bf16 %v645_v19, %v645_v19  ;;  %v504_v24 = vld [vmem:[#allocation2 + $0x2c] sm:$0x1]  ;;  %vm8608_vm8 = vmor %vm437_vm2, %vm557_vm6  ;;  %vm1689_vm12 = vcmask 31744  }
  0x1f   : > { %v449_v23 = vsel %vm8568_vm3, 0, %v448_v20  ;;  %v646_v25 = vld [vmem:[%s8587_s17 + $0x20] sm:$0xff]  ;;  %v647_v26 = vld [vmem:[%s8587_s17 + $0x28] sm:$0xff]  ;;  %v771_v27 = vshrl.u32 %v7462_v16, 16  ;;  %v774_v28 = vshll.u32 %v7462_v16, 16  ;;  %v779_v29 = vshrl.u32 %v7463_v17, 16  ;;  %vm8620_vm9 = vmand %vm579_vm7, %vm493_vm4 }
  0x20   : > { %v782_v30 = vshll.u32 %v7463_v17, 16  ;;  %450 = vst [vmem:[#allocation2 + $0x24] sm:$0x1] %v449_v23  ;;  %v439_v31 = vld [vmem:[#allocation2] sm:$0x1]  ;;  %v788_v32 = vshrl.u32 %v7464_v21, 16  ;;  %v7466_v41 = vpack.c.bf16 %v646_v25, %v646_v25  ;;  %v7467_v46 = vpack.c.bf16 %v647_v26, %v647_v26 }
  0x21   : > { %v791_v33 = vshll.u32 %v7464_v21, 16  ;;  %v796_v34 = vshrl.u32 %v7465_v22, 16  ;;  %v799_v35 = vshll.u32 %v7465_v22, 16  ;;  %v773_v37 = vrot.slane %v771_v27, 7  ;;  %v1091_v39 = vld [vmem:[#allocation2 + $0xc] sm:$0xf] }
  0x22   : > { %v781_v38 = vrot.slane %v779_v29, 7  ;;  %v505_v40 = vsel %vm8575_vm5, 0, %v504_v24  ;;  %v1095_v43 = vld [vmem:[#allocation2 + $0x14] sm:$0x1]  ;;  %v790_v44 = vrot.slane %v788_v32, 7  ;;  %v440_v47 = vsel %vm8568_vm3, 0, %v439_v31 }
  0x23   : > { %v798_v45 = vrot.slane %v796_v34, 7  ;;  %506 = vst [vmem:[#allocation2 + $0x2c] sm:$0x1] %v505_v40  ;;  %v495_v48 = vld [vmem:[#allocation2 + $0x8] sm:$0x1]  ;;  %v776_v49 = vor.u32 %v774_v28, %v773_v37  ;;  %v777_v50 = vrot.slane %v773_v37, 4 }
  0x24   : > { %v784_v51 = vor.u32 %v782_v30, %v781_v38  ;;  %v786_v52 = vrot.slane %v781_v38, 4  ;;  %v1098_v53 = vld [vmem:[#allocation2 + $0x18] sm:$0xf]  ;;  %441 = vst [vmem:[#allocation2] sm:$0x1] %v440_v47  ;;  %v793_v55 = vor.u32 %v791_v33, %v790_v44  ;;  %v794_v56 = vrot.slane %v790_v44, 4 }
  0x25   : > { %v8629_v54 = vld [vmem:[%s10940_s3] sm:$0x3]  ;;  %v801_v57 = vor.u32 %v799_v35, %v798_v45  ;;  %v803_v58 = vrot.slane %v798_v45, 4  ;;  %v1092_v62 = vsel %vm8620_vm9, %v776_v49, %v1091_v39  ;;  %v805_v0 = vshrl.u32 %v7466_v41, 16  ;;  %v550_v2 = vld [vmem:[%s400_s28 + $0x8] sm:$0xff]  ;;  %v648_v11 = vld [vmem:[%s8587_s17 + $0x30] sm:$0xff] }
  0x26   : > { %v1102_v59 = vld [vmem:[#allocation2 + $0x20] sm:$0x1]  ;;  %8214 = vmatprep.subr.msk.bf16.mxu1 %vm1738_vm0, %v8629_v54  ;;  %v785_v61 = vsel %vm8608_vm8, %v777_v50, %v784_v51  ;;  %v1096_v63 = vsel %vm8568_vm3, %v786_v52, %v1095_v43  ;;  %v451_v4 = vld [vmem:[#allocation2 + $0x30] sm:$0x1]  ;;  %v507_v5 = vld [vmem:[#allocation2 + $0x38] sm:$0x1]  ;;  %v1099_v8 = vsel %vm8620_vm9, %v793_v55, %v1098_v53  ;;  %v8659_v19 = vpack.c.bf16 %v550_v2, %v550_v2 }
  0x27   : > { %v549_v60 = vld [vmem:[%s400_s28] sm:$0xff]  ;;  %1093 = vst [vmem:[#allocation2 + $0xc] sm:$0xf] %v1092_v62  ;;  %1094 = vst.msk [vmem:[#allocation2 + $0x10] sm:$0xf] %vm579_vm7, %v785_v61  ;;  %v802_v7 = vsel %vm8608_vm8, %v794_v56, %v801_v57  ;;  %v1103_v9 = vsel %vm8568_vm3, %v803_v58, %v1102_v59  ;;  %v808_v10 = vshll.u32 %v7466_v41, 16  ;;  %v8665_v25 = vpack.c.bf16 %v648_v11, %v648_v11 }
  0x28   : > { %1097 = vst [vmem:[#allocation2 + $0x14] sm:$0x1] %v1096_v63  ;;  %v8650_v12 = vld [vmem:[%s10940_s3 + $0xa] sm:$0x3]  ;;  %1100 = vst [vmem:[#allocation2 + $0x18] sm:$0xf] %v1099_v8  ;;  %v8657_v18 = vpack.c.bf16 %v549_v60, %v549_v60 }
  0x29   : > { %1101 = vst.msk [vmem:[#allocation2 + $0x1c] sm:$0xf] %vm579_vm7, %v802_v7  ;;  %1104 = vst [vmem:[#allocation2 + $0x20] sm:$0x1] %v1103_v9  ;;  %v807_v13 = vrot.slane %v805_v0, 7  ;;  %v813_v14 = vshrl.u32 %v7467_v46, 16  ;;  %8219 = vmatprep.subr.msk.bf16.mxu0 %vm1738_vm0, %v8650_v12 }
  0x2a   : > { %v816_v15 = vshll.u32 %v7467_v46, 16  ;;  %v496_v16 = vsel %vm8575_vm5, 0, %v495_v48  ;;  %vm1252_vm10 = vsmask.f32 3328  ;;  %vm1253_vm11 = vsmask.f32 7440 }
  0x2b   : > { %v1105_v17 = vld [vmem:[#allocation2 + $0x24] sm:$0xf]  ;;  %497 = vst [vmem:[#allocation2 + $0x8] sm:$0x1] %v496_v16  ;;  %v452_v20 = vsel %vm8568_vm3, 0, %v451_v4  ;;  %v508_v21 = vsel %vm8575_vm5, 0, %v507_v5  ;;  %v810_v22 = vor.u32 %v808_v10, %v807_v13  ;;  %vm8707_vm13 = vmor %vm1252_vm10, %vm1253_vm11 }
  0x2c   : > { %v811_v23 = vrot.slane %v807_v13, 4  ;;  %v815_v24 = vrot.slane %v813_v14, 7  ;;  %453 = vst [vmem:[#allocation2 + $0x30] sm:$0x1] %v452_v20  ;;  %509 = vst [vmem:[#allocation2 + $0x38] sm:$0x1] %v508_v21 }
  0x2d   : > { %v1109_v26 = vld [vmem:[#allocation2 + $0x2c] sm:$0x1]  ;;  %v560_v27 = vshrl.u32 %v8657_v18, 16  ;;  %v568_v28 = vshrl.u32 %v8659_v19, 16  ;;  %v649_v29 = vld [vmem:[%s8587_s17 + $0x38] sm:$0xff]  ;;  %v1106_v32 = vsel %vm8620_vm9, %v810_v22, %v1105_v17  ;;  %v563_v33 = vshll.u32 %v8657_v18, 16 }
  0x2e   : > { %v818_v30 = vor.u32 %v816_v15, %v815_v24  ;;  %v820_v31 = vrot.slane %v815_v24, 4  ;;  %1107 = vst [vmem:[#allocation2 + $0x24] sm:$0xf] %v1106_v32  ;;  %v571_v37 = vshll.u32 %v8659_v19, 16  ;;  %v822_v38 = vshrl.u32 %v8665_v25, 16  ;;  %v650_v39 = vld [vmem:[%s8587_s17 + $0x40] sm:$0xff] }
  0x2f   : > { %v8673_v34 = vrot.slane %v560_v27, 7  ;;  %v8675_v35 = vrot.slane %v568_v28, 7  ;;  %v3010_v40 = vld [vmem:[#allocation2 + $0xc] sm:$0xf]  ;;  %v8680_v41 = vld [vmem:[#allocation2 + $0x10] sm:$0xf]  ;;  %v8688_v46 = vpack.c.bf16 %v649_v29, %v649_v29  ;;  %v8698_v58 = vpack.c.bf16 %v650_v39, %v650_v39 }
  0x30   : > { %v8682_v43 = vld [vmem:[#allocation2 + $0x14] sm:$0x1]  ;;  %v819_v44 = vsel %vm8608_vm8, %v811_v23, %v818_v30  ;;  %v1110_v45 = vsel %vm8568_vm3, %v820_v31, %v1109_v26  ;;  %v3059_v47 = vshrl.u32 %v3010_v40, 16  ;;  %v3062_v48 = vshll.u32 %v3010_v40, 16  ;;  %v3013_v51 = vld [vmem:[#allocation2 + $0x18] sm:$0xf] }
  0x31   : > { %v3068_v49 = vshll.u32 %v8680_v41, 16  ;;  %v3072_v50 = vshrl.u32 %v8680_v41, 16  ;;  %1108 = vst.msk [vmem:[#allocation2 + $0x28] sm:$0xf] %vm579_vm7, %v819_v44  ;;  %1111 = vst [vmem:[#allocation2 + $0x2c] sm:$0x1] %v1110_v45  ;;  %v565_v29 = vor.u32 %v563_v33, %v8673_v34 }
  0x32   : > { %v3078_v52 = vshll.u32 %v8682_v43, 16  ;;  %v8694_v53 = vld [vmem:[#allocation2 + $0x1c] sm:$0xf]  ;;  %v3083_v55 = vshrl.u32 %v3013_v51, 16  ;;  %v825_v56 = vshll.u32 %v8665_v25, 16  ;;  %v651_v57 = vld [vmem:[%s8587_s17 + $0x48] sm:$0xff] }
  0x33   : > { %v3061_v59 = vrot.slane %v3059_v47, 4  ;;  %v3064_v60 = vrot.slane %v3062_v48, 5  ;;  %v3070_v61 = vrot.slane %v3068_v49, 5  ;;  %v3074_v62 = vrot.slane %v3072_v50, 4  ;;  %v8700_v63 = vld [vmem:[#allocation2 + $0x20] sm:$0x1] }
  0x34   : > { %v3080_v0 = vrot.slane %v3078_v52, 5  ;;  %v3085_v2 = vrot.slane %v3083_v55, 4  ;;  %v3086_v4 = vshll.u32 %v3013_v51, 16  ;;  %v3092_v5 = vshll.u32 %v8694_v53, 16  ;;  %v581_v33 = vld [vmem:[#allocation2] sm:$0xf] }
  0x35   : > { %v3065_v7 = vor.u32 %v3064_v60, %v3061_v59  ;;  %v3075_v8 = vor.u32 %v3074_v62, %v3070_v61  ;;  %v3096_v9 = vshrl.u32 %v8694_v53, 16  ;;  %v3102_v10 = vshll.u32 %v8700_v63, 16  ;;  %v3016_v16 = vld [vmem:[#allocation2 + $0x24] sm:$0xf]  ;;  %v10391_v11 = vld [vmem:[%s10941_s4] ss:$0 sm:$0xff] }
  0x36   : > { %v3802_v13 = vrot.slane %v8680_v41, 5  ;;  %v3088_v14 = vrot.slane %v3086_v4, 5  ;;  %v3094_v15 = vrot.slane %v3092_v5, 5  ;;  %v8712_v17 = vpack.c.bf16 %v651_v57, %v651_v57  ;;  %v1205_v4 = vld [vmem:[#allocation2 + $0xc] sm:$0xf]  ;;  %s7494_s18 = sshll.u32 %s8452_s24, 10 }
  0x37   : > { %v3066_v18 = vrot.slane %v3065_v7, 4  ;;  %v3076_v20 = vrot.slane %v3075_v8, 4  ;;  %v3098_v21 = vrot.slane %v3096_v9, 4  ;;  %v3809_v22 = vrot.slane %v8694_v53, 5  ;;  %v1112_v9 = vld [vmem:[#allocation2 + $0x30] sm:$0xf]  ;;  %s10881_s27 = scalar_lea.hbm %s10943_s6, %s7494_s18 }
  0x38   : > { %v3089_v23 = vor.u32 %v3088_v14, %v3085_v2  ;;  %v3104_v24 = vrot.slane %v3102_v10, 5  ;;  %v8715_v26 = vld [vmem:[#allocation2 + $0x28] sm:$0xf]  ;;  %v8717_v27 = vld [vmem:[#allocation2 + $0x2c] sm:$0x1]  ;;  %v3107_v28 = vshrl.u32 %v3016_v16, 16  ;;  %v573_v59 = vor.u32 %v571_v37, %v8675_v35 }
  0x39   : > { %v3071_v30 = vsel %vm8707_vm13, %v3066_v18, %v3070_v61  ;;  %v3081_v31 = vsel %vm8707_vm13, %v3076_v20, %v3080_v0  ;;  %v3099_v32 = vor.u32 %v3098_v21, %v3094_v15  ;;  %v3110_v39 = vshll.u32 %v3016_v16, 16  ;;  %v586_v2 = vld [vmem:[#allocation2 + $0x8] sm:$0x1]  ;;  %v1237_v20 = vld [vmem:[#allocation2 + $0x14] sm:$0x1] }
  0x3a   : > { %v7251_v40 = vcombine.low %v3071_v30, %v3081_v31  ;;  %v3090_v44 = vrot.slane %v3089_v23, 4  ;;  %v3109_v45 = vrot.slane %v3107_v28, 4  ;;  %v3116_v47 = vshll.u32 %v8715_v26, 16 }
  0x3b   : > { %v3100_v48 = vrot.slane %v3099_v32, 4  ;;  %v3112_v49 = vrot.slane %v3110_v39, 5  ;;  %v3120_v50 = vshrl.u32 %v8715_v26, 16  ;;  %v3126_v51 = vshll.u32 %v8717_v27, 16 }
  0x3c   : > { %7787 = vmatprep.mubr.msk.bf16.mxu0 %vm1689_vm12, %v7251_v40  ;;  %v3095_v52 = vsel %vm8707_vm13, %v3090_v44, %v3094_v15  ;;  %v3118_v55 = vrot.slane %v3116_v47, 5  ;;  %v566_v57 = vrot.slane %v8673_v34, 4  ;;  %v575_v8 = vrot.slane %v8675_v35, 4  ;;  %v1206_v15 = vld [vmem:[#allocation2 + $0x10] sm:$0xf] }
  0x3d   : > { %v3105_v60 = vsel %vm8707_vm13, %v3100_v48, %v3104_v24  ;;  %v3113_v61 = vor.u32 %v3112_v49, %v3109_v45  ;;  %v3122_v62 = vrot.slane %v3120_v50, 4  ;;  %v3128_v0 = vrot.slane %v3126_v51, 5  ;;  %v1116_v44 = vld [vmem:[#allocation2 + $0x38] sm:$0x1] }
  0x3e   : > { %v7252_v5 = vcombine.low %v3095_v52, %v3105_v60  ;;  %v574_v7 = vsel %vm8608_vm8, %v566_v57, %v573_v59  ;;  %v582_v34 = vsel %vm8620_vm9, %v565_v29, %v581_v33  ;;  %v824_v10 = vrot.slane %v822_v38, 7  ;;  %v510_v57 = vld [vmem:[#allocation2 + $0x44] sm:$0x1] }
  0x3f   : > { %v3114_v19 = vrot.slane %v3113_v61, 4  ;;  %v3123_v37 = vor.u32 %v3122_v62, %v3118_v55  ;;  %583 = vst [vmem:[#allocation2] sm:$0xf] %v582_v34  ;;  %585 = vst.msk [vmem:[#allocation2 + $0x4] sm:$0xf] %vm579_vm7, %v574_v7  ;;  %v830_v14 = vshrl.u32 %v8688_v46, 16  ;;  %v587_v35 = vsel %vm8568_vm3, %v575_v8, %v586_v2 }
  0x40   : > { %7788 = vmatmul.mubr.msk.bf16.vlgmr.msra.gmra.mrb[0].mxu0 %vm1689_vm12, %v7252_v5  ;;  %v8462_v16 = vmov 0   ;;  %v833_v18 = vshll.u32 %v8688_v46, 16  ;;  %v1280_v21 = vshrl.u32 %v1205_v4, 16  ;;  %v1283_v23 = vshll.u32 %v1205_v4, 16  ;;  %588 = vst [vmem:[#allocation2 + $0x8] sm:$0x1] %v587_v35 }
  0x41   : > { %631 = vst.msk [vmem:[#allocation2 + $0x4] sm:$0xf] %vm579_vm7, %v8462_v16  ;;  %v3119_v38 = vsel %vm8707_vm13, %v3114_v19, %v3118_v55  ;;  %v3124_v24 = vrot.slane %v3123_v37, 4  ;;  %v827_v28 = vor.u32 %v825_v56, %v824_v10  ;;  %v828_v29 = vrot.slane %v824_v10, 4  ;;  %v454_v56 = vld [vmem:[#allocation2 + $0x3c] sm:$0x1] }
  0x42   : > { %v832_v30 = vrot.slane %v830_v14, 7  ;;  %v1282_v31 = vrot.slane %v1280_v21, 4  ;;  %v1285_v32 = vrot.slane %v1283_v23, 5  ;;  %v1289_v39 = vshll.u32 %v1206_v15, 16  ;;  %v8770_v2 = vld [vmem:[#allocation2 + $0x18] sm:$0xf] }
  0x43   : > { %v3129_v40 = vsel %vm8707_vm13, %v3124_v24, %v3128_v0  ;;  %v1113_v46 = vsel %vm8620_vm9, %v827_v28, %v1112_v9  ;;  %v1293_v45 = vshrl.u32 %v1206_v15, 16  ;;  %v1299_v47 = vshll.u32 %v1237_v20, 16  ;;  %v8775_v4 = vld [vmem:[%s10940_s3 + $0xc] sm:$0x3] }
  0x44   : > { %v7253_v48 = vcombine.low %v3119_v38, %v3129_v40  ;;  %v835_v49 = vor.u32 %v833_v18, %v832_v30  ;;  %v837_v50 = vrot.slane %v832_v30, 4  ;;  %1114 = vst [vmem:[#allocation2 + $0x30] sm:$0xf] %v1113_v46  ;;  %v1286_v25 = vor.u32 %v1285_v32, %v1282_v31 }
  0x45   : > { %v3805_v51 = vrot.slane %v8682_v43, 5  ;;  %v3812_v33 = vrot.slane %v8700_v63, 5  ;;  %v1291_v52 = vrot.slane %v1289_v39, 5  ;;  %v1295_v55 = vrot.slane %v1293_v45, 4  ;;  %v652_v39 = vld [vmem:[%s8587_s17 + $0x50] sm:$0xff] }
  0x46   : > { %v8763_v59 = vrot.slane %v3809_v22, 4  ;;  %7791 = vmatprep.mubr.msk.bf16.mxu0 %vm1689_vm12, %v7253_v48  ;;  %v628_v60 = vld [vmem:[#allocation2] sm:$0xf]  ;;  %v836_v61 = vsel %vm8608_vm8, %v828_v29, %v835_v49  ;;  %v1117_v62 = vsel %vm8568_vm3, %v837_v50, %v1116_v44  ;;  %v1287_v0 = vrot.slane %v1286_v25, 4  ;;  %v653_v50 = vld [vmem:[%s8587_s17 + $0x58] sm:$0xff] }
  0x47   : > { %v629_v5 = vsel %vm8620_vm9, 0, %v628_v60  ;;  %1115 = vst.msk [vmem:[#allocation2 + $0x34] sm:$0xf] %vm579_vm7, %v836_v61  ;;  %1118 = vst [vmem:[#allocation2 + $0x38] sm:$0x1] %v1117_v62  ;;  %v1296_v8 = vor.u32 %v1295_v55, %v1291_v52  ;;  %v1301_v34 = vrot.slane %v1299_v47, 5 }
  0x48   : > { %v1204_v7 = vld [vmem:[#allocation2 + $0x4] sm:$0xf]  ;;  %v4011_v9 = vsel %vm1738_vm0, %v8650_v12, 0  ;;  %630 = vst [vmem:[#allocation2] sm:$0xf] %v629_v5  ;;  %v1292_v14 = vsel %vm8707_vm13, %v1287_v0, %v1291_v52  ;;  %v455_v15 = vsel %vm8568_vm3, 0, %v454_v56 }
  0x49   : > { %v632_v19 = vld [vmem:[#allocation2 + $0x8] sm:$0x1]  ;;  %v1265_v37 = vshll.u32 %v1204_v7, 16  ;;  %v1269_v10 = vshrl.u32 %v1204_v7, 16  ;;  %7820 = vmatpush3.bf16.msra.mxu0 %v4011_v9  ;;  %v1297_v18 = vrot.slane %v1296_v8, 4  ;;  %v511_v12 = vsel %vm8575_vm5, 0, %v510_v57 }
  0x4a   : > { %v633_v35 = vsel %vm8568_vm3, 0, %v632_v19  ;;  %456 = vst [vmem:[#allocation2 + $0x3c] sm:$0x1] %v455_v15  ;;  %v839_v20 = vshrl.u32 %v8698_v58, 16  ;;  %8220 = vmatprep.subr.msk.bf16.mxu0 %vm1738_vm0, %v8775_v4  ;;  %512 = vst [vmem:[#allocation2 + $0x44] sm:$0x1] %v511_v12  ;;  %v8816_v57 = vpack.c.bf16 %v652_v39, %v652_v39 }
  0x4b   : > { %634 = vst [vmem:[#allocation2 + $0x8] sm:$0x1] %v633_v35  ;;  %v8793_v21 = vrot.slane %v1265_v37, 5  ;;  %v1271_v23 = vrot.slane %v1269_v10, 4  ;;  %v842_v38 = vshll.u32 %v8698_v58, 16  ;;  %v847_v24 = vshrl.u32 %v8712_v17, 16 }
  0x4c   : > { %v3019_v28 = vld [vmem:[#allocation2 + $0x30] sm:$0xf]  ;;  %v1302_v29 = vsel %vm8707_vm13, %v1297_v18, %v1301_v34  ;;  %v8801_v30 = vsel %vm1738_vm0, %v8629_v54, 0  ;;  %v841_v31 = vrot.slane %v839_v20, 7  ;;  %v1304_v32 = vshrl.u32 %v8770_v2, 16 }
  0x4d   : > { %v1272_v40 = vor.u32 %v1271_v23, %v8793_v21  ;;  %v3131_v46 = vshrl.u32 %v3019_v28, 16  ;;  %v3134_v44 = vshll.u32 %v3019_v28, 16  ;;  %v850_v58 = vshll.u32 %v8712_v17, 16  ;;  %v1208_v15 = vld [vmem:[#allocation2 + $0x1c] sm:$0xf] }
  0x4e   : > { %v8807_v45 = vcombine.low %v1292_v14, %v1302_v29  ;;  %v845_v47 = vrot.slane %v841_v31, 4  ;;  %v849_v48 = vrot.slane %v847_v24, 7  ;;  %v8809_v49 = vrot.slane %v1304_v32, 4  ;;  %v8812_v54 = vld [vmem:[#allocation2 + $0x34] sm:$0xf] }
  0x4f   : > { %v1273_v25 = vrot.slane %v1272_v40, 4  ;;  %v8814_v56 = vld [vmem:[#allocation2 + $0x38] sm:$0x1]  ;;  %v3133_v52 = vrot.slane %v3131_v46, 4  ;;  %v844_v55 = vor.u32 %v842_v38, %v841_v31  ;;  %v1203_v60 = vld [vmem:[#allocation2] sm:$0xf]  ;;  %v8821_v35 = vpack.c.bf16 %v653_v50, %v653_v50 }
  0x50   : > { %v3136_v61 = vrot.slane %v3134_v44, 5  ;;  %v3140_v17 = vshll.u32 %v8812_v54, 16  ;;  %v3144_v62 = vshrl.u32 %v8812_v54, 16  ;;  %v3150_v0 = vshll.u32 %v8814_v56, 16  ;;  %v1238_v32 = vld [vmem:[#allocation2 + $0x20] sm:$0x1] }
  0x51   : > { %v1256_v5 = vshrl.u32 %v1203_v60, 16  ;;  %v1259_v7 = vshll.u32 %v1203_v60, 16  ;;  %v852_v8 = vor.u32 %v850_v58, %v849_v48  ;;  %v854_v34 = vrot.slane %v849_v48, 4  ;;  %v1119_v9 = vld [vmem:[#allocation2 + $0x3c] sm:$0xf] }
  0x52   : > { %v1236_v19 = vld [vmem:[#allocation2 + $0x8] sm:$0x1]  ;;  %v3137_v37 = vor.u32 %v3136_v61, %v3133_v52  ;;  %v3142_v10 = vrot.slane %v3140_v17, 5  ;;  %v3146_v14 = vrot.slane %v3144_v62, 4  ;;  %v3152_v23 = vrot.slane %v3150_v0, 5 }
  0x53   : > { %v1258_v18 = vrot.slane %v1256_v5, 4  ;;  %v1261_v12 = vrot.slane %v1259_v7, 5  ;;  %v1275_v20 = vshll.u32 %v1236_v19, 16  ;;  %v1123_v38 = vld [vmem:[#allocation2 + $0x44] sm:$0x1]  ;;  %v853_v29 = vsel %vm8608_vm8, %v845_v47, %v852_v8 }
  0x54   : > { %v3138_v24 = vrot.slane %v3137_v37, 4  ;;  %v3147_v28 = vor.u32 %v3146_v14, %v3142_v10  ;;  %v1120_v31 = vsel %vm8620_vm9, %v844_v55, %v1119_v9  ;;  %1122 = vst.msk [vmem:[#allocation2 + $0x40] sm:$0xf] %vm579_vm7, %v853_v29  ;;  %v1124_v46 = vsel %vm8568_vm3, %v854_v34, %v1123_v38  ;;  %v457_v58 = vld [vmem:[#allocation2 + $0x48] sm:$0x1]  ;;  %v654_v8 = vld [vmem:[%s8587_s17 + $0x60] sm:$0xff] }
  0x55   : > { %v1262_v39 = vor.u32 %v1261_v12, %v1258_v18  ;;  %v1277_v40 = vrot.slane %v1275_v20, 5  ;;  %1121 = vst [vmem:[#allocation2 + $0x3c] sm:$0xf] %v1120_v31  ;;  %v1307_v44 = vshll.u32 %v8770_v2, 16  ;;  %1125 = vst [vmem:[#allocation2 + $0x44] sm:$0x1] %v1124_v46  ;;  %v8855_v29 = vpack.c.bf16 %v654_v8, %v654_v8 }
  0x56   : > { %v3143_v48 = vsel %vm8707_vm13, %v3138_v24, %v3142_v10  ;;  %v3148_v47 = vrot.slane %v3147_v28, 4  ;;  %v1313_v50 = vshll.u32 %v1208_v15, 16  ;;  %v1317_v52 = vshrl.u32 %v1208_v15, 16  ;;  %v513_v62 = vld [vmem:[#allocation2 + $0x50] sm:$0x1]  ;;  %v655_v37 = vld [vmem:[%s8587_s17 + $0x68] sm:$0xff] }
  0x57   : > { %v1263_v55 = vrot.slane %v1262_v39, 4  ;;  %v1278_v60 = vsel %vm8707_vm13, %v1273_v25, %v1277_v40  ;;  %v1309_v61 = vrot.slane %v1307_v44, 5  ;;  %v1323_v17 = vshll.u32 %v1238_v32, 16  ;;  %v1239_v8 = vld [vmem:[#allocation2 + $0x2c] sm:$0x1] }
  0x58   : > { %v3153_v2 = vsel %vm8707_vm13, %v3148_v47, %v3152_v23  ;;  %v1315_v0 = vrot.slane %v1313_v50, 5  ;;  %v1319_v5 = vrot.slane %v1317_v52, 4  ;;  %v458_v7 = vsel %vm8568_vm3, 0, %v457_v58 }
  0x59   : > { %v1268_v34 = vsel %vm8707_vm13, %v1263_v55, %v8793_v21  ;;  %v7254_v9 = vcombine.low %v3143_v48, %v3153_v2  ;;  %v1310_v19 = vor.u32 %v1309_v61, %v8809_v49  ;;  %v1325_v25 = vrot.slane %v1323_v17, 5  ;;  %459 = vst [vmem:[#allocation2 + $0x48] sm:$0x1] %v458_v7 }
  0x5a   : > { %v7104_v10 = vcombine.low %v1268_v34, %v1278_v60  ;;  %v1320_v14 = vor.u32 %v1319_v5, %v1315_v0  ;;  %v514_v15 = vsel %vm8575_vm5, 0, %v513_v62  ;;  %v856_v18 = vshrl.u32 %v8816_v57, 16  ;;  %v1210_v60 = vld [vmem:[#allocation2 + $0x28] sm:$0xf] }
  0x5b   : > { %7792 = vmatmul.mubr.msk.bf16.gmra.mrb[4].mxu0 %vm1689_vm12, %v7254_v9  ;;  %v1311_v12 = vrot.slane %v1310_v19, 4  ;;  %515 = vst [vmem:[#allocation2 + $0x50] sm:$0x1] %v514_v15  ;;  %v859_v20 = vshll.u32 %v8816_v57, 16  ;;  %v864_v21 = vshrl.u32 %v8821_v35, 16  ;;  %v867_v49 = vshll.u32 %v8821_v35, 16 }
  0x5c   : > { %7651 = vmatprep.mubr.msk.bf16.mxu1 %vm1689_vm12, %v7104_v10  ;;  %v3022_v23 = vld [vmem:[#allocation2 + $0x3c] sm:$0xf]  ;;  %v8853_v38 = vld [vmem:[#allocation2 + $0x40] sm:$0xf]  ;;  %v1321_v24 = vrot.slane %v1320_v14, 4  ;;  %v858_v28 = vrot.slane %v856_v18, 7  ;;  %v8857_v31 = vpack.c.bf16 %v655_v37, %v655_v37 }
  0x5d   : > { %7652 = vmatmul.mubr.msk.bf16.vlgmr.msra.gmra.mrb[0].mxu1 %vm1689_vm12, %v8807_v45  ;;  %v8861_v32 = vld [vmem:[#allocation2 + $0x44] sm:$0x1]  ;;  %v3155_v57 = vshrl.u32 %v3022_v23, 16  ;;  %v3158_v39 = vshll.u32 %v3022_v23, 16  ;;  %v3164_v35 = vshll.u32 %v8853_v38, 16  ;;  %v3168_v40 = vshrl.u32 %v8853_v38, 16 }
  0x5e   : > { %7684 = vmatpush3.bf16.msra.mxu1 %v8801_v30  ;;  %v3174_v46 = vshll.u32 %v8861_v32, 16  ;;  %v1316_v44 = vsel %vm8707_vm13, %v1311_v12, %v1315_v0  ;;  %v1326_v58 = vsel %vm8707_vm13, %v1321_v24, %v1325_v25  ;;  %v861_v48 = vor.u32 %v859_v20, %v858_v28  ;;  %v1209_v45 = vld [vmem:[#allocation2 + $0x24] sm:$0xf]  ;;  %v460_v9 = vld [vmem:[#allocation2 + $0x54] sm:$0x1] }
  0x5f   : > { %v3157_v47 = vrot.slane %v3155_v57, 4  ;;  %v3160_v50 = vrot.slane %v3158_v39, 5  ;;  %v3166_v52 = vrot.slane %v3164_v35, 5  ;;  %v3170_v55 = vrot.slane %v3168_v40, 4  ;;  %v516_v19 = vld [vmem:[#allocation2 + $0x5c] sm:$0x1] }
  0x60   : > { %v3176_v61 = vrot.slane %v3174_v46, 5  ;;  %v7106_v17 = vcombine.low %v1316_v44, %v1326_v58  ;;  %v862_v62 = vrot.slane %v858_v28, 4  ;;  %v866_v2 = vrot.slane %v864_v21, 7  ;;  %v1126_v30 = vld [vmem:[#allocation2 + $0x48] sm:$0xf] }
  0x61   : > { %v3161_v5 = vor.u32 %v3160_v50, %v3157_v47  ;;  %v3171_v7 = vor.u32 %v3170_v55, %v3166_v52  ;;  %v1127_v0 = vsel %vm8620_vm9, %v861_v48, %v1126_v30  ;;  %v1328_v34 = vshrl.u32 %v1209_v45, 16  ;;  %v1211_v23 = vld [vmem:[#allocation2 + $0x30] sm:$0xf]  ;;  %v8878_v35 = vld [vmem:[#allocation2 + $0x34] sm:$0xf] }
  0x62   : > { %7655 = vmatprep.mubr.msk.bf16.mxu1 %vm1689_vm12, %v7106_v17  ;;  %v869_v25 = vor.u32 %v867_v49, %v866_v2  ;;  %v871_v37 = vrot.slane %v866_v2, 4  ;;  %1128 = vst [vmem:[#allocation2 + $0x48] sm:$0xf] %v1127_v0  ;;  %v1130_v10 = vld [vmem:[#allocation2 + $0x50] sm:$0x1]  ;;  %v1331_v14 = vshll.u32 %v1209_v45, 16 }
  0x63   : > { %v1337_v15 = vshll.u32 %v1210_v60, 16  ;;  %v3162_v18 = vrot.slane %v3161_v5, 4  ;;  %v3172_v12 = vrot.slane %v3171_v7, 4  ;;  %v1330_v20 = vrot.slane %v1328_v34, 4 }
  0x64   : > { %v1341_v21 = vshrl.u32 %v1210_v60, 16  ;;  %v870_v24 = vsel %vm8608_vm8, %v862_v62, %v869_v25  ;;  %v1131_v28 = vsel %vm8568_vm3, %v871_v37, %v1130_v10  ;;  %v1333_v57 = vrot.slane %v1331_v14, 5 }
  0x65   : > { %v1339_v39 = vrot.slane %v1337_v15, 5  ;;  %v3167_v49 = vsel %vm8707_vm13, %v3162_v18, %v3166_v52  ;;  %v3177_v40 = vsel %vm8707_vm13, %v3172_v12, %v3176_v61  ;;  %1129 = vst.msk [vmem:[#allocation2 + $0x4c] sm:$0xf] %vm579_vm7, %v870_v24  ;;  %1132 = vst [vmem:[#allocation2 + $0x50] sm:$0x1] %v1131_v28  ;;  %v1347_v44 = vshll.u32 %v1239_v8, 16 }
  0x66   : > { %v1343_v46 = vrot.slane %v1341_v21, 4  ;;  %v7255_v58 = vcombine.low %v3167_v49, %v3177_v40  ;;  %v1334_v48 = vor.u32 %v1333_v57, %v1330_v20  ;;  %v461_v45 = vsel %vm8568_vm3, 0, %v460_v9  ;;  %v519_v24 = vld [vmem:[#allocation2 + $0x68] sm:$0x1]  ;;  %v1240_v40 = vld [vmem:[#allocation2 + $0x38] sm:$0x1] }
  0x67   : > { %v517_v47 = vsel %vm8575_vm5, 0, %v516_v19  ;;  %v1349_v55 = vrot.slane %v1347_v44, 5  ;;  %462 = vst [vmem:[#allocation2 + $0x54] sm:$0x1] %v461_v45  ;;  %v873_v52 = vshrl.u32 %v8855_v29, 16  ;;  %v876_v60 = vshll.u32 %v8855_v29, 16 }
  0x68   : > { %v1344_v50 = vor.u32 %v1343_v46, %v1339_v39  ;;  %518 = vst [vmem:[#allocation2 + $0x5c] sm:$0x1] %v517_v47  ;;  %7795 = vmatprep.mubr.msk.bf16.mxu0 %vm1689_vm12, %v7255_v58  ;;  %v1335_v61 = vrot.slane %v1334_v48, 4  ;;  %v881_v17 = vshrl.u32 %v8857_v31, 16  ;;  %v884_v62 = vshll.u32 %v8857_v31, 16 }
  0x69   : > { %v1352_v2 = vshrl.u32 %v1211_v23, 16  ;;  %v3025_v30 = vld [vmem:[#allocation2 + $0x48] sm:$0xf]  ;;  %v875_v7 = vrot.slane %v873_v52, 7  ;;  %v1355_v0 = vshll.u32 %v1211_v23, 16  ;;  %v1361_v8 = vshll.u32 %v8878_v35, 16 }
  0x6a   : > { %v1345_v5 = vrot.slane %v1344_v50, 4  ;;  %v3179_v34 = vshrl.u32 %v3025_v30, 16  ;;  %v3182_v9 = vshll.u32 %v3025_v30, 16  ;;  %v1340_v19 = vsel %vm8707_vm13, %v1335_v61, %v1339_v39  ;;  %v463_v23 = vld [vmem:[#allocation2 + $0x60] sm:$0x1]  ;;  %v656_v61 = vld [vmem:[%s8587_s17 + $0x70] sm:$0xff] }
  0x6b   : > { %v883_v29 = vrot.slane %v881_v17, 7  ;;  %v878_v37 = vor.u32 %v876_v60, %v875_v7  ;;  %v879_v10 = vrot.slane %v875_v7, 4  ;;  %v1354_v14 = vrot.slane %v1352_v2, 4  ;;  %v657_v17 = vld [vmem:[%s8587_s17 + $0x78] sm:$0xff] }
  0x6c   : > { %v1350_v25 = vsel %vm8707_vm13, %v1345_v5, %v1349_v55  ;;  %v8899_v31 = vld [vmem:[#allocation2 + $0x4c] sm:$0xf]  ;;  %v8901_v15 = vld [vmem:[#allocation2 + $0x50] sm:$0x1]  ;;  %v3181_v18 = vrot.slane %v3179_v34, 4  ;;  %v3184_v12 = vrot.slane %v3182_v9, 5 }
  0x6d   : > { %v7107_v20 = vcombine.low %v1340_v19, %v1350_v25  ;;  %v886_v21 = vor.u32 %v884_v62, %v883_v29  ;;  %v3188_v28 = vshll.u32 %v8899_v31, 16  ;;  %v3192_v57 = vshrl.u32 %v8899_v31, 16  ;;  %v8919_v7 = vld [vmem:[#allocation2 + $0x3c] sm:$0xf] }
  0x6e   : > { %v3198_v39 = vshll.u32 %v8901_v15, 16  ;;  %v888_v49 = vrot.slane %v883_v29, 4  ;;  %v3185_v46 = vor.u32 %v3184_v12, %v3181_v18  ;;  %v1133_v58 = vld [vmem:[#allocation2 + $0x54] sm:$0xf]  ;;  %v1357_v45 = vrot.slane %v1355_v0, 5 }
  0x6f   : > { %7656 = vmatmul.mubr.msk.bf16.gmra.mrb[4].mxu1 %vm1689_vm12, %v7107_v20  ;;  %v887_v44 = vsel %vm8608_vm8, %v879_v10, %v886_v21  ;;  %v1137_v48 = vld [vmem:[#allocation2 + $0x5c] sm:$0x1]  ;;  %v8909_v47 = vrot.slane %v1361_v8, 5  ;;  %v3190_v50 = vrot.slane %v3188_v28, 5  ;;  %v3194_v55 = vrot.slane %v3192_v57, 4 }
  0x70   : > { %v3200_v52 = vrot.slane %v3198_v39, 5  ;;  %v1134_v60 = vsel %vm8620_vm9, %v878_v37, %v1133_v58  ;;  %1136 = vst.msk [vmem:[#allocation2 + $0x58] sm:$0xf] %vm579_vm7, %v887_v44  ;;  %v3186_v62 = vrot.slane %v3185_v46, 4  ;;  %v1138_v2 = vsel %vm8568_vm3, %v888_v49, %v1137_v48  ;;  %v7184_v20 = vld [vmem:[%s10940_s3 + $0x4] sm:$0x3] }
  0x71   : > { %1135 = vst [vmem:[#allocation2 + $0x54] sm:$0xf] %v1134_v60  ;;  %v1358_v30 = vor.u32 %v1357_v45, %v1354_v14  ;;  %v1365_v5 = vshrl.u32 %v8878_v35, 16  ;;  %v3195_v0 = vor.u32 %v3194_v55, %v3190_v50  ;;  %1139 = vst [vmem:[#allocation2 + $0x5c] sm:$0x1] %v1138_v2  ;;  %v1371_v8 = vshll.u32 %v1240_v40, 16  ;;  %8215 = vmatprep.subr.msk.bf16.mxu1 %vm1738_vm0, %v7184_v20 }
  0x72   : > { %v464_v34 = vsel %vm8568_vm3, 0, %v463_v23  ;;  %v520_v9 = vsel %vm8575_vm5, 0, %v519_v24  ;;  %v3191_v19 = vsel %vm8707_vm13, %v3186_v62, %v3190_v50  ;;  %v7476_v37 = vpack.c.bf16 %v656_v61, %v656_v61  ;;  %v8927_v35 = vld [vmem:[#allocation2 + $0x40] sm:$0xf] }
  0x73   : > { %v1359_v29 = vrot.slane %v1358_v30, 4  ;;  %v1367_v25 = vrot.slane %v1365_v5, 4  ;;  %465 = vst [vmem:[#allocation2 + $0x60] sm:$0x1] %v464_v34  ;;  %521 = vst [vmem:[#allocation2 + $0x68] sm:$0x1] %v520_v9  ;;  %v7477_v18 = vpack.c.bf16 %v657_v17, %v657_v17 }
  0x74   : > { %vm2243_vm14 = vcmask 1042432   ;;  %vm2244_vm15 = vcmask 1046532   ;;  %v3196_v10 = vrot.slane %v3195_v0, 4  ;;  %v1373_v14 = vrot.slane %v1371_v8, 5  ;;  %v1241_v5 = vld [vmem:[#allocation2 + $0x44] sm:$0x1] }
  0x75   : > { %v1376_v12 = vshrl.u32 %v8919_v7, 16  ;;  %v1364_v21 = vsel %vm8707_vm13, %v1359_v29, %v8909_v47  ;;  %v1368_v23 = vor.u32 %v1367_v25, %v8909_v47  ;;  %v890_v24 = vshrl.u32 %v7476_v37, 16  ;;  %vm8963_vm1 = vmor %vm2243_vm14, %vm2244_vm15 }
  0x76   : > { %v893_v28 = vshll.u32 %v7476_v37, 16  ;;  %v3201_v57 = vsel %vm8707_vm13, %v3196_v10, %v3200_v52  ;;  %v898_v39 = vshrl.u32 %v7477_v18, 16  ;;  %v901_v49 = vshll.u32 %v7477_v18, 16 }
  0x77   : > { %v1378_v40 = vrot.slane %v1376_v12, 4  ;;  %v7256_v46 = vcombine.low %v3191_v19, %v3201_v57  ;;  %v8940_v44 = vld [vmem:[#allocation2 + $0x58] sm:$0xf]  ;;  %v1369_v58 = vrot.slane %v1368_v23, 4  ;;  %v892_v48 = vrot.slane %v890_v24, 7 }
  0x78   : > { %v1379_v45 = vshll.u32 %v8919_v7, 16  ;;  %v3028_v50 = vld [vmem:[#allocation2 + $0x54] sm:$0xf]  ;;  %v3212_v47 = vshll.u32 %v8940_v44, 16  ;;  %v3216_v55 = vshrl.u32 %v8940_v44, 16  ;;  %v900_v60 = vrot.slane %v898_v39, 7 }
  0x79   : > { %v1385_v61 = vshll.u32 %v8927_v35, 16  ;;  %7796 = vmatmul.mubr.msk.bf16.gmra.mrb[8].mxu0 %vm1689_vm12, %v7256_v46  ;;  %v8947_v52 = vld [vmem:[#allocation2 + $0x5c] sm:$0x1]  ;;  %v3203_v17 = vshrl.u32 %v3028_v50, 16  ;;  %v3206_v62 = vshll.u32 %v3028_v50, 16  ;;  %v1374_v2 = vsel %vm8707_vm13, %v1369_v58, %v1373_v14 }
  0x7a   : > { %v895_v30 = vor.u32 %v893_v28, %v892_v48  ;;  %v3214_v7 = vrot.slane %v3212_v47, 5  ;;  %v3218_v0 = vrot.slane %v3216_v55, 4  ;;  %v3222_v8 = vshll.u32 %v8947_v52, 16  ;;  %v1140_v9 = vld [vmem:[#allocation2 + $0x60] sm:$0xf] }
  0x7b   : > { %v7108_v34 = vcombine.low %v1364_v21, %v1374_v2  ;;  %v3205_v19 = vrot.slane %v3203_v17, 4  ;;  %v3208_v29 = vrot.slane %v3206_v62, 5  ;;  %v896_v25 = vrot.slane %v892_v48, 4  ;;  %v1144_v10 = vld [vmem:[#allocation2 + $0x68] sm:$0x1] }
  0x7c   : > { %v903_v37 = vor.u32 %v901_v49, %v900_v60  ;;  %v3219_v18 = vor.u32 %v3218_v0, %v3214_v7  ;;  %v3224_v12 = vrot.slane %v3222_v8, 5  ;;  %v905_v20 = vrot.slane %v900_v60, 4  ;;  %v3736_v23 = vld [vmem:[#allocation2 + $0xc] sm:$0xe]  ;;  %v1215_v39 = vld [vmem:[#allocation2 + $0x48] sm:$0xf] }
  0x7d   : > { %7659 = vmatprep.mubr.msk.bf16.mxu1 %vm1689_vm12, %v7108_v34  ;;  %v1141_v14 = vsel %vm8620_vm9, %v895_v30, %v1140_v9  ;;  %v3209_v24 = vor.u32 %v3208_v29, %v3205_v19  ;;  %v1381_v21 = vrot.slane %v1379_v45, 5  ;;  %v1387_v57 = vrot.slane %v1385_v61, 5  ;;  %v1216_v47 = vld [vmem:[#allocation2 + $0x4c] sm:$0xf]  ;;  %v3737_v17 = vld [vmem:[#allocation2 + $0x18] sm:$0xe] }
  0x7e   : > { %v904_v28 = vsel %vm8608_vm8, %v896_v25, %v903_v37  ;;  %1142 = vst [vmem:[#allocation2 + $0x60] sm:$0xf] %v1141_v14  ;;  %v3220_v46 = vrot.slane %v3219_v18, 4  ;;  %v1145_v49 = vsel %vm8568_vm3, %v905_v20, %v1144_v10  ;;  %v1389_v58 = vshrl.u32 %v8927_v35, 16  ;;  %v1242_v34 = vld [vmem:[#allocation2 + $0x50] sm:$0x1] }
  0x7f   : > { %1143 = vst.msk [vmem:[#allocation2 + $0x64] sm:$0xf] %vm579_vm7, %v904_v28  ;;  %v1395_v48 = vshll.u32 %v1241_v5, 16  ;;  %v3210_v55 = vrot.slane %v3209_v24, 4  ;;  %1146 = vst [vmem:[#allocation2 + $0x68] sm:$0x1] %v1145_v49  ;;  %v1382_v45 = vor.u32 %v1381_v21, %v1378_v40 }
  0x80   : > { %v7283_v60 = vrot.slane %v3736_v23, 9  ;;  %v3804_v61 = vrot.slane %v3802_v13, 4  ;;  %v3225_v62 = vsel %vm8707_vm13, %v3220_v46, %v3224_v12  ;;  %v1391_v35 = vrot.slane %v1389_v58, 4  ;;  %v9413_v36 = vld [vmem:[#allocation2 + $0x58] sm:$0xf] }
  0x81   : > { %v1397_v2 = vrot.slane %v1395_v48, 5  ;;  %v1400_v30 = vshrl.u32 %v1215_v39, 16  ;;  %v3215_v5 = vsel %vm8707_vm13, %v3210_v55, %v3214_v7  ;;  %v1383_v0 = vrot.slane %v1382_v45, 4 }
  0x82   : > { %v8977_v40 = vsel %vm8963_vm1, %v7283_v60, %v3802_v13  ;;  %v8983_v8 = vsel %vm8963_vm1, %v3804_v61, %v3805_v51  ;;  %v7257_v9 = vcombine.low %v3215_v5, %v3225_v62  ;;  %v1392_v19 = vor.u32 %v1391_v35, %v1387_v57  ;;  %v1217_v60 = vld [vmem:[#allocation2 + $0x54] sm:$0xf]  ;;  %v1218_v61 = vld [vmem:[#allocation2 + $0x58] sm:$0xf] }
  0x83   : > { %v7300_v29 = vcombine.low %v8977_v40, %v8983_v8  ;;  %v1402_v7 = vrot.slane %v1400_v30, 4  ;;  %v1388_v41 = vsel %vm8707_vm13, %v1383_v0, %v1387_v57  ;;  %v1403_v25 = vshll.u32 %v1215_v39, 16 }
  0x84   : > { %v1409_v37 = vshll.u32 %v1216_v47, 16  ;;  %v1413_v13 = vshrl.u32 %v1216_v47, 16  ;;  %7799 = vmatprep.mubr.msk.bf16.mxu0 %vm1689_vm12, %v7257_v9  ;;  %v1393_v10 = vrot.slane %v1392_v19, 4  ;;  %v1419_v18 = vshll.u32 %v1242_v34, 16  ;;  %v1243_v19 = vld [vmem:[#allocation2 + $0x5c] sm:$0x1] }
  0x85   : > { %v3031_v43 = vld [vmem:[#allocation2 + $0x60] sm:$0xf]  ;;  %v7284_v51 = vrot.slane %v3737_v17, 9  ;;  %v8995_v12 = vsel %vm8963_vm1, %v8763_v59, %v3812_v33  ;;  %v1405_v24 = vrot.slane %v1403_v25, 5  ;;  %v1433_v25 = vshll.u32 %v1218_v61, 16 }
  0x86   : > { %v8997_v20 = vld [vmem:[#allocation2 + $0x64] sm:$0xf]  ;;  %v3227_v14 = vshrl.u32 %v3031_v43, 16  ;;  %v3230_v23 = vshll.u32 %v3031_v43, 16  ;;  %v1411_v28 = vrot.slane %v1409_v37, 5  ;;  %v1398_v63 = vsel %vm8707_vm13, %v1393_v10, %v1397_v2 }
  0x87   : > { %v8999_v21 = vld [vmem:[#allocation2 + $0x68] sm:$0x1]  ;;  %v3236_v57 = vshll.u32 %v8997_v20, 16  ;;  %v3240_v39 = vshrl.u32 %v8997_v20, 16  ;;  %v1415_v46 = vrot.slane %v1413_v13, 4  ;;  %v7109_v59 = vcombine.low %v1388_v41, %v1398_v63 }
  0x88   : > { %v3229_v49 = vrot.slane %v3227_v14, 4  ;;  %v3232_v58 = vrot.slane %v3230_v23, 5  ;;  %v3246_v33 = vshll.u32 %v8999_v21, 16  ;;  %v1406_v55 = vor.u32 %v1405_v24, %v1402_v7  ;;  %v3738_v43 = vld [vmem:[#allocation2 + $0x24] sm:$0xe] }
  0x89   : > { %v3238_v48 = vrot.slane %v3236_v57, 5  ;;  %v3242_v47 = vrot.slane %v3240_v39, 4  ;;  %v1416_v45 = vor.u32 %v1415_v46, %v1411_v28  ;;  %7660 = vmatmul.mubr.msk.bf16.gmra.mrb[8].mxu1 %vm1689_vm12, %v7109_v59  ;;  %v1421_v35 = vrot.slane %v1419_v18, 5  ;;  %v1219_v23 = vld [vmem:[#allocation2 + $0x60] sm:$0xf] }
  0x8a   : > { %v3233_v17 = vor.u32 %v3232_v58, %v3229_v49  ;;  %v3248_v62 = vrot.slane %v3246_v33, 5  ;;  %v9011_v2 = vsel %vm8963_vm1, %v7284_v51, %v3809_v22  ;;  %v1407_v5 = vrot.slane %v1406_v55, 4  ;;  %v1220_v33 = vld [vmem:[#allocation2 + $0x64] sm:$0xf]  ;;  %v1244_v55 = vld [vmem:[#allocation2 + $0x68] sm:$0x1] }
  0x8b   : > { %v3243_v30 = vor.u32 %v3242_v47, %v3238_v48  ;;  %v1417_v0 = vrot.slane %v1416_v45, 4  ;;  %v7301_v34 = vcombine.low %v9011_v2, %v8995_v12  ;;  %v1424_v7 = vshrl.u32 %v1217_v60, 16 }
  0x8c   : > { %v3234_v9 = vrot.slane %v3233_v17, 4  ;;  %v1427_v41 = vshll.u32 %v1217_v60, 16  ;;  %v1412_v13 = vsel %vm8707_vm13, %v1407_v5, %v1411_v28  ;;  %v1437_v22 = vshrl.u32 %v1218_v61, 16  ;;  %v3739_v5 = vld [vmem:[#allocation2 + $0x30] sm:$0xe] }
  0x8d   : > { %v3244_v37 = vrot.slane %v3243_v30, 4  ;;  %v1422_v53 = vsel %vm8707_vm13, %v1417_v0, %v1421_v35  ;;  %v1426_v51 = vrot.slane %v1424_v7, 4  ;;  %v1435_v57 = vrot.slane %v1433_v25, 5 }
  0x8e   : > { %v3239_v10 = vsel %vm8707_vm13, %v3234_v9, %v3238_v48  ;;  %v7110_v18 = vcombine.low %v1412_v13, %v1422_v53  ;;  %v1429_v14 = vrot.slane %v1427_v41, 5  ;;  %v1439_v39 = vrot.slane %v1437_v22, 4  ;;  %v466_v41 = vld [vmem:[#allocation2 + $0x6c] sm:$0x1]  ;;  %v658_v13 = vld [vmem:[%s8587_s17 + $0x80] sm:$0xff] }
  0x8f   : > { %v3249_v24 = vsel %vm8707_vm13, %v3244_v37, %v3248_v62  ;;  %v1443_v63 = vshll.u32 %v1243_v19, 16  ;;  %v7285_v49 = vrot.slane %v3738_v43, 9  ;;  %v3816_v58 = vrot.slane %v8715_v26, 5  ;;  %v522_v37 = vld [vmem:[#allocation2 + $0x74] sm:$0x1]  ;;  %v659_v53 = vld [vmem:[%s8587_s17 + $0x88] sm:$0xff] }
  0x90   : > { %v7258_v46 = vcombine.low %v3239_v10, %v3249_v24  ;;  %7663 = vmatprep.mubr.msk.bf16.mxu1 %vm1689_vm12, %v7110_v18  ;;  %v1430_v28 = vor.u32 %v1429_v14, %v1426_v51  ;;  %v1440_v59 = vor.u32 %v1439_v39, %v1435_v57  ;;  %v3819_v47 = vrot.slane %v8717_v27, 5 }
  0x91   : > { %v1445_v48 = vrot.slane %v1443_v63, 5  ;;  %v1448_v45 = vshrl.u32 %v1219_v23, 16  ;;  %v3817_v61 = vsel %vm8963_vm1, %v7285_v49, %v3816_v58  ;;  %v3818_v17 = vrot.slane %v3816_v58, 4  ;;  %v469_v49 = vld [vmem:[#allocation2 + $0x78] sm:$0x1] }
  0x92   : > { %7800 = vmatmul.mubr.msk.bf16.gmra.mrb[12].mxu0 %vm1689_vm12, %v7258_v46  ;;  %v1431_v60 = vrot.slane %v1430_v28, 4  ;;  %v1451_v62 = vshll.u32 %v1219_v23, 16  ;;  %v1441_v26 = vrot.slane %v1440_v59, 4  ;;  %v1457_v27 = vshll.u32 %v1220_v33, 16  ;;  %v3740_v28 = vld [vmem:[#allocation2 + $0x3c] sm:$0xe] }
  0x93   : > { %7821 = vmatprep.mubr.msk.bf16.mxu0 %vm1689_vm12, %v7300_v29  ;;  %v1450_v35 = vrot.slane %v1448_v45, 4  ;;  %v1461_v30 = vshrl.u32 %v1220_v33, 16  ;;  %v3820_v9 = vsel %vm8963_vm1, %v3818_v17, %v3819_v47  ;;  %v1467_v7 = vshll.u32 %v1244_v55, 16  ;;  %v7365_v59 = vld [vmem:[%s10940_s3 + $0xe] sm:$0x3] }
  0x94   : > { %v1436_v0 = vsel %vm8707_vm13, %v1431_v60, %v1435_v57  ;;  %v1453_v19 = vrot.slane %v1451_v62, 5  ;;  %v1446_v40 = vsel %vm8707_vm13, %v1441_v26, %v1445_v48  ;;  %v7302_v8 = vcombine.low %v3817_v61, %v3820_v9  ;;  %v525_v60 = vld [vmem:[#allocation2 + $0x80] sm:$0x1] }
  0x95   : > { %v1459_v29 = vrot.slane %v1457_v27, 5  ;;  %v1463_v25 = vrot.slane %v1461_v30, 4  ;;  %v7111_v22 = vcombine.low %v1436_v0, %v1446_v40  ;;  %v1469_v10 = vrot.slane %v1467_v7, 5  ;;  %v661_v27 = vld [vmem:[%s8587_s17 + $0x98] sm:$0xff] }
  0x96   : > { %v1454_v43 = vor.u32 %v1453_v19, %v1450_v35  ;;  %v7286_v18 = vrot.slane %v3739_v5, 9  ;;  %v3823_v14 = vrot.slane %v8812_v54, 5  ;;  %v3826_v23 = vrot.slane %v8814_v56, 5  ;;  %v660_v35 = vld [vmem:[%s8587_s17 + $0x90] sm:$0xff]  ;;  %v3741_v19 = vld [vmem:[#allocation2 + $0x48] sm:$0xe] }
  0x97   : > { %v1464_v51 = vor.u32 %v1463_v25, %v1459_v29  ;;  %v467_v24 = vsel %vm8568_vm3, 0, %v466_v41  ;;  %7664 = vmatmul.mubr.msk.bf16.gmra.mrb[12].mxu1 %vm1689_vm12, %v7111_v22  ;;  %v523_v39 = vsel %vm8575_vm5, 0, %v522_v37  ;;  %v7478_v63 = vpack.c.bf16 %v658_v13, %v658_v13 }
  0x98   : > { %v1455_v57 = vrot.slane %v1454_v43, 4  ;;  %468 = vst [vmem:[#allocation2 + $0x6c] sm:$0x1] %v467_v24  ;;  %v7479_v46 = vpack.c.bf16 %v659_v53, %v659_v53  ;;  %v3824_v54 = vsel %vm8963_vm1, %v7286_v18, %v3823_v14  ;;  %v3825_v33 = vrot.slane %v3823_v14, 4  ;;  %524 = vst [vmem:[#allocation2 + $0x74] sm:$0x1] %v523_v39 }
  0x99   : > { %v1465_v58 = vrot.slane %v1464_v51, 4  ;;  %v4370_v56 = vsel %vm1738_vm0, %v8775_v4, 0  ;;  %v907_v47 = vshrl.u32 %v7478_v63, 16  ;;  %v910_v55 = vshll.u32 %v7478_v63, 16  ;;  %v472_v18 = vld [vmem:[#allocation2 + $0x84] sm:$0x1] }
  0x9a   : > { %7822 = vmatmul.mubr.msk.bf16.vlgmr.msra.gmra.mrb[0].mxu0 %vm1689_vm12, %v7301_v34  ;;  %v1460_v48 = vsel %vm8707_vm13, %v1455_v57, %v1459_v29  ;;  %v915_v45 = vshrl.u32 %v7479_v46, 16  ;;  %v3827_v61 = vsel %vm8963_vm1, %v3825_v33, %v3826_v23  ;;  %v918_v12 = vshll.u32 %v7479_v46, 16  ;;  %v528_v57 = vld [vmem:[#allocation2 + $0x8c] sm:$0x1]  ;;  %v662_v39 = vld [vmem:[%s8587_s17 + $0xa0] sm:$0xff] }
  0x9b   : > { %7825 = vmatprep.mubr.msk.bf16.mxu0 %vm1689_vm12, %v7302_v8  ;;  %v1470_v4 = vsel %vm8707_vm13, %v1465_v58, %v1469_v10  ;;  %7854 = vmatpush3.bf16.msra.mxu0 %v4370_v56  ;;  %v7287_v2 = vrot.slane %v3740_v28, 9  ;;  %v7303_v17 = vcombine.low %v3824_v54, %v3827_v61  ;;  %v909_v62 = vrot.slane %v907_v47, 7  ;;  %v663_v63 = vld [vmem:[%s8587_s17 + $0xa8] sm:$0xff]  ;;  %v9093_v58 = vld [vmem:[#allocation2 + $0x54] sm:$0xe] }
  0x9c   : > { %v7112_v34 = vcombine.low %v1460_v48, %v1470_v4  ;;  %v917_v26 = vrot.slane %v915_v45, 7  ;;  %8221 = vmatprep.subr.msk.bf16.mxu0 %vm1738_vm0, %v7365_v59  ;;  %v3830_v30 = vrot.slane %v8853_v38, 5  ;;  %v3833_v5 = vrot.slane %v8861_v32, 5 }
  0x9d   : > { %v470_v0 = vsel %vm8568_vm3, 0, %v469_v49  ;;  %v526_v9 = vsel %vm8575_vm5, 0, %v525_v60  ;;  %v912_v7 = vor.u32 %v910_v55, %v909_v62  ;;  %v913_v41 = vrot.slane %v909_v62, 4 }
  0x9e   : > { %7667 = vmatprep.mubr.msk.bf16.mxu1 %vm1689_vm12, %v7112_v34  ;;  %v920_v40 = vor.u32 %v918_v12, %v917_v26  ;;  %v922_v8 = vrot.slane %v917_v26, 4  ;;  %471 = vst [vmem:[#allocation2 + $0x78] sm:$0x1] %v470_v0  ;;  %527 = vst [vmem:[#allocation2 + $0x80] sm:$0x1] %v526_v9  ;;  %v3831_v38 = vsel %vm8963_vm1, %v7287_v2, %v3830_v30  ;;  %v3832_v32 = vrot.slane %v3830_v30, 4 }
  0x9f   : > { %v1147_v29 = vld [vmem:[#allocation2 + $0x6c] sm:$0xf]  ;;  %v7480_v25 = vpack.c.bf16 %v660_v35, %v660_v35  ;;  %v7481_v37 = vpack.c.bf16 %v661_v27, %v661_v27  ;;  %v1151_v22 = vld [vmem:[#allocation2 + $0x74] sm:$0x1]  ;;  %v7288_v43 = vrot.slane %v3741_v19, 9  ;;  %v3837_v10 = vrot.slane %v8899_v31, 5 }
  0xa0   : > { %v921_v13 = vsel %vm8608_vm8, %v913_v41, %v920_v40  ;;  %v1148_v53 = vsel %vm8620_vm9, %v912_v7, %v1147_v29  ;;  %v1152_v51 = vsel %vm8568_vm3, %v922_v8, %v1151_v22  ;;  %v3834_v14 = vsel %vm8963_vm1, %v3832_v32, %v3833_v5 }
  0xa1   : > { %1149 = vst [vmem:[#allocation2 + $0x6c] sm:$0xf] %v1148_v53  ;;  %1150 = vst.msk [vmem:[#allocation2 + $0x70] sm:$0xf] %vm579_vm7, %v921_v13  ;;  %v924_v23 = vshrl.u32 %v7480_v25, 16  ;;  %v927_v24 = vshll.u32 %v7480_v25, 16  ;;  %v7304_v46 = vcombine.low %v3831_v38, %v3834_v14  ;;  %v3838_v49 = vsel %vm8963_vm1, %v7288_v43, %v3837_v10 }
  0xa2   : > { %7826 = vmatmul.mubr.msk.bf16.gmra.mrb[4].mxu0 %vm1689_vm12, %v7303_v17  ;;  %1153 = vst [vmem:[#allocation2 + $0x74] sm:$0x1] %v1152_v51  ;;  %v932_v31 = vshrl.u32 %v7481_v37, 16  ;;  %v935_v28 = vshll.u32 %v7481_v37, 16  ;;  %v3839_v33 = vrot.slane %v3837_v10, 4  ;;  %v3840_v56 = vrot.slane %v8901_v15, 5 }
  0xa3   : > { %v926_v54 = vrot.slane %v924_v23, 7  ;;  %v473_v59 = vsel %vm8568_vm3, 0, %v472_v18  ;;  %7829 = vmatprep.mubr.msk.bf16.mxu0 %vm1689_vm12, %v7304_v46  ;;  %v529_v47 = vsel %vm8575_vm5, 0, %v528_v57  ;;  %v7482_v55 = vpack.c.bf16 %v662_v39, %v662_v39  ;;  %v475_v37 = vld [vmem:[#allocation2 + $0x90] sm:$0x1] }
  0xa4   : > { %v934_v48 = vrot.slane %v932_v31, 7  ;;  %474 = vst [vmem:[#allocation2 + $0x84] sm:$0x1] %v473_v59  ;;  %v7483_v45 = vpack.c.bf16 %v663_v63, %v663_v63  ;;  %v3841_v2 = vsel %vm8963_vm1, %v3839_v33, %v3840_v56  ;;  %530 = vst [vmem:[#allocation2 + $0x8c] sm:$0x1] %v529_v47  ;;  %v7289_v15 = vrot.slane %v9093_v58, 9 }
  0xa5   : > { %v929_v60 = vor.u32 %v927_v24, %v926_v54  ;;  %v930_v4 = vrot.slane %v926_v54, 4  ;;  %v1154_v61 = vld [vmem:[#allocation2 + $0x78] sm:$0xf]  ;;  %v1158_v12 = vld [vmem:[#allocation2 + $0x80] sm:$0x1]  ;;  %v7305_v62 = vcombine.low %v3838_v49, %v3841_v2  ;;  %v941_v26 = vshrl.u32 %v7482_v55, 16 }
  0xa6   : > { %v937_v34 = vor.u32 %v935_v28, %v934_v48  ;;  %v939_v17 = vrot.slane %v934_v48, 4  ;;  %v944_v27 = vshll.u32 %v7482_v55, 16  ;;  %v949_v30 = vshrl.u32 %v7483_v45, 16  ;;  %v531_v43 = vld [vmem:[#allocation2 + $0x98] sm:$0x1]  ;;  %v664_v31 = vld [vmem:[%s8587_s17 + $0xb0] sm:$0xff] }
  0xa7   : > { %v1155_v35 = vsel %vm8620_vm9, %v929_v60, %v1154_v61  ;;  %v952_v5 = vshll.u32 %v7483_v45, 16  ;;  %v943_v41 = vrot.slane %v941_v26, 7  ;;  %v3844_v40 = vrot.slane %v8940_v44, 5  ;;  %v665_v33 = vld [vmem:[%s8587_s17 + $0xb8] sm:$0xff] }
  0xa8   : > { %v9106_v0 = vld [vmem:[#allocation2 + $0x6c] sm:$0xf]  ;;  %v9108_v9 = vld [vmem:[#allocation2 + $0x70] sm:$0xf]  ;;  %v938_v19 = vsel %vm8608_vm8, %v930_v4, %v937_v34  ;;  %1156 = vst [vmem:[#allocation2 + $0x78] sm:$0xf] %v1155_v35  ;;  %v1159_v7 = vsel %vm8568_vm3, %v939_v17, %v1158_v12  ;;  %v7484_v61 = vpack.c.bf16 %v664_v31, %v664_v31  ;;  %v7485_v17 = vpack.c.bf16 %v665_v33, %v665_v33 }
  0xa9   : > { %v1245_v8 = vld [vmem:[#allocation2 + $0x74] sm:$0x1]  ;;  %v1472_v29 = vshrl.u32 %v9106_v0, 16  ;;  %v1475_v38 = vshll.u32 %v9106_v0, 16  ;;  %v1481_v32 = vshll.u32 %v9108_v9, 16  ;;  %v1485_v25 = vshrl.u32 %v9108_v9, 16 }
  0xaa   : > { %1157 = vst.msk [vmem:[#allocation2 + $0x7c] sm:$0xf] %vm579_vm7, %v938_v19  ;;  %1160 = vst [vmem:[#allocation2 + $0x80] sm:$0x1] %v1159_v7  ;;  %v1491_v13 = vshll.u32 %v1245_v8, 16  ;;  %7830 = vmatmul.mubr.msk.bf16.gmra.mrb[8].mxu0 %vm1689_vm12, %v7305_v62  ;;  %v946_v53 = vor.u32 %v944_v27, %v943_v41  ;;  %v947_v22 = vrot.slane %v943_v41, 4  ;;  %v3845_v58 = vsel %vm8963_vm1, %v7289_v15, %v3844_v40 }
  0xab   : > { %v951_v44 = vrot.slane %v949_v30, 7  ;;  %v1474_v10 = vrot.slane %v1472_v29, 4  ;;  %v1477_v18 = vrot.slane %v1475_v38, 5  ;;  %v1483_v51 = vrot.slane %v1481_v32, 5  ;;  %v1161_v23 = vld [vmem:[#allocation2 + $0x84] sm:$0xf] }
  0xac   : > { %v1487_v14 = vrot.slane %v1485_v25, 4  ;;  %v1493_v24 = vrot.slane %v1491_v13, 5  ;;  %v1162_v63 = vsel %vm8620_vm9, %v946_v53, %v1161_v23  ;;  %v1165_v46 = vld [vmem:[#allocation2 + $0x8c] sm:$0x1]  ;;  %v3846_v54 = vrot.slane %v3844_v40, 4  ;;  %v666_v41 = vld [vmem:[%s8587_s17 + $0xc0] sm:$0xff] }
  0xad   : > { %v954_v57 = vor.u32 %v952_v5, %v951_v44  ;;  %v956_v39 = vrot.slane %v951_v44, 4  ;;  %v1478_v28 = vor.u32 %v1477_v18, %v1474_v10  ;;  %1163 = vst [vmem:[#allocation2 + $0x84] sm:$0xf] %v1162_v63  ;;  %v3847_v48 = vrot.slane %v8947_v52, 5  ;;  %v667_v32 = vld [vmem:[%s8587_s17 + $0xc8] sm:$0xff] }
  0xae   : > { %v1488_v49 = vor.u32 %v1487_v14, %v1483_v51  ;;  %v476_v47 = vsel %vm8568_vm3, 0, %v475_v37  ;;  %v532_v4 = vsel %vm8575_vm5, 0, %v531_v43  ;;  %v958_v38 = vshrl.u32 %v7484_v61, 16 }
  0xaf   : > { %v955_v56 = vsel %vm8608_vm8, %v947_v22, %v954_v57  ;;  %v1166_v59 = vsel %vm8568_vm3, %v956_v39, %v1165_v46  ;;  %v1479_v55 = vrot.slane %v1478_v28, 4  ;;  %v9134_v60 = vld [vmem:[#allocation2 + $0x78] sm:$0xf]  ;;  %477 = vst [vmem:[#allocation2 + $0x90] sm:$0x1] %v476_v47  ;;  %v3848_v34 = vsel %vm8963_vm1, %v3846_v54, %v3847_v48 }
  0xb0   : > { %v1489_v45 = vrot.slane %v1488_v49, 4  ;;  %1164 = vst.msk [vmem:[#allocation2 + $0x88] sm:$0xf] %vm579_vm7, %v955_v56  ;;  %1167 = vst [vmem:[#allocation2 + $0x8c] sm:$0x1] %v1166_v59  ;;  %v1496_v52 = vshrl.u32 %v9134_v60, 16  ;;  %v7306_v29 = vcombine.low %v3845_v58, %v3848_v34  ;;  %v9161_v57 = vpack.c.bf16 %v666_v41, %v666_v41 }
  0xb1   : > { %v9139_v12 = vld [vmem:[#allocation2 + $0x7c] sm:$0xf]  ;;  %v1246_v2 = vld [vmem:[#allocation2 + $0x80] sm:$0x1]  ;;  %v1499_v15 = vshll.u32 %v9134_v60, 16  ;;  %v1484_v62 = vsel %vm8707_vm13, %v1479_v55, %v1483_v51  ;;  %v961_v53 = vshll.u32 %v7484_v61, 16  ;;  %v9163_v39 = vpack.c.bf16 %v667_v32, %v667_v32 }
  0xb2   : > { %533 = vst [vmem:[#allocation2 + $0x98] sm:$0x1] %v532_v4  ;;  %v1494_v26 = vsel %vm8707_vm13, %v1489_v45, %v1493_v24  ;;  %v1505_v35 = vshll.u32 %v9139_v12, 16  ;;  %v1509_v27 = vshrl.u32 %v9139_v12, 16  ;;  %v1498_v5 = vrot.slane %v1496_v52, 4  ;;  %7833 = vmatprep.mubr.msk.bf16.mxu0 %vm1689_vm12, %v7306_v29  ;;  %v8307_v50 = vld [vmem:[#allocation2 + $0x78] sm:$0xff]  }
  0xb3   : > { %v7113_v30 = vcombine.low %v1484_v62, %v1494_v26  ;;  %v1501_v19 = vrot.slane %v1499_v15, 5  ;;  %v1515_v7 = vshll.u32 %v1246_v2, 16  ;;  %v966_v22 = vshrl.u32 %v7485_v17, 16  ;;  %v3743_v59 = vld [vmem:[#allocation2 + $0x60] sm:$0xe] }
  0xb4   : > { %v1507_v40 = vrot.slane %v1505_v35, 5  ;;  %v1511_v8 = vrot.slane %v1509_v27, 4  ;;  %v9154_v13 = vld [vmem:[#allocation2 + $0x84] sm:$0xf]  ;;  %v960_v18 = vrot.slane %v958_v38, 7  ;;  %v969_v62 = vshll.u32 %v7485_v17, 16 }
  0xb5   : > { %7668 = vmatmul.mubr.msk.bf16.gmra.mrb[16].mxu1 %vm1689_vm12, %v7113_v30  ;;  %v1502_v25 = vor.u32 %v1501_v19, %v1498_v5  ;;  %v1517_v37 = vrot.slane %v1515_v7, 5  ;;  %v1520_v43 = vshrl.u32 %v9154_v13, 16  ;;  %v1523_v10 = vshll.u32 %v9154_v13, 16  ;;  %v478_v48 = vld [vmem:[#allocation2 + $0x9c] sm:$0x1] }
  0xb6   : > { %v1512_v44 = vor.u32 %v1511_v8, %v1507_v40  ;;  %v968_v24 = vrot.slane %v966_v22, 7  ;;  %v963_v33 = vor.u32 %v961_v53, %v960_v18  ;;  %v1168_v56 = vld [vmem:[#allocation2 + $0x90] sm:$0xf]  ;;  %v534_v47 = vld [vmem:[#allocation2 + $0xa4] sm:$0x1]  ;;  %v964_v61 = vrot.slane %v960_v18, 4 }
  0xb7   : > { %v1503_v51 = vrot.slane %v1502_v25, 4  ;;  %v9159_v14 = vld [vmem:[#allocation2 + $0x88] sm:$0xf]  ;;  %v1247_v23 = vld [vmem:[#allocation2 + $0x8c] sm:$0x1]  ;;  %v1522_v46 = vrot.slane %v1520_v43, 4 }
  0xb8   : > { %v1513_v63 = vrot.slane %v1512_v44, 4  ;;  %v1525_v31 = vrot.slane %v1523_v10, 5  ;;  %v1529_v28 = vshll.u32 %v9159_v14, 16  ;;  %v1533_v58 = vshrl.u32 %v9159_v14, 16  ;;  %v3035_v38 = vld [vmem:[#allocation2 + $0x70] sm:$0xf] }
  0xb9   : > { %v1508_v49 = vsel %vm8707_vm13, %v1503_v51, %v1507_v40  ;;  %v1539_v54 = vshll.u32 %v1247_v23, 16  ;;  %v1172_v2 = vld [vmem:[#allocation2 + $0x98] sm:$0x1]  ;;  %v973_v35 = vrot.slane %v968_v24, 4  ;;  %v1169_v27 = vsel %vm8620_vm9, %v963_v33, %v1168_v56  ;;  %v3744_v32 = vld [vmem:[#allocation2 + $0x6c] sm:$0xe] }
  0xba   : > { %v1518_v55 = vsel %vm8707_vm13, %v1513_v63, %v1517_v37  ;;  %v1526_v45 = vor.u32 %v1525_v31, %v1522_v46  ;;  %v1531_v4 = vrot.slane %v1529_v28, 5  ;;  %v1535_v15 = vrot.slane %v1533_v58, 4  ;;  %1170 = vst [vmem:[#allocation2 + $0x90] sm:$0xf] %v1169_v27  ;;  %v481_v25 = vld [vmem:[#allocation2 + $0xa8] sm:$0x1] }
  0xbb   : > { %v7114_v52 = vcombine.low %v1508_v49, %v1518_v55  ;;  %v1541_v34 = vrot.slane %v1539_v54, 5  ;;  %v7290_v30 = vrot.slane %v3743_v59, 9  ;;  %v971_v19 = vor.u32 %v969_v62, %v968_v24  ;;  %v3036_v22 = vld [vmem:[#allocation2 + $0x74] sm:$0x1]  ;;  %v537_v51 = vld [vmem:[#allocation2 + $0xb0] sm:$0x1] }
  0xbc   : > { %v1527_v26 = vrot.slane %v1526_v45, 4  ;;  %v1536_v5 = vor.u32 %v1535_v15, %v1531_v4  ;;  %v3851_v7 = vrot.slane %v8997_v20, 5  ;;  %v3854_v41 = vrot.slane %v8999_v21, 5  ;;  %v668_v56 = vld [vmem:[%s8587_s17 + $0xd0] sm:$0xff]  ;;  %v669_v59 = vld [vmem:[%s8587_s17 + $0xd8] sm:$0xff] }
  0xbd   : > { %7671 = vmatprep.mubr.msk.bf16.mxu1 %vm1689_vm12, %v7114_v52  ;;  %v1173_v17 = vsel %vm8568_vm3, %v973_v35, %v1172_v2  ;;  %v479_v8 = vsel %vm8568_vm3, 0, %v478_v48  ;;  %v535_v29 = vsel %vm8575_vm5, 0, %v534_v47  ;;  %v972_v20 = vsel %vm8608_vm8, %v964_v61, %v971_v19 }
  0xbe   : > { %v1532_v40 = vsel %vm8707_vm13, %v1527_v26, %v1531_v4  ;;  %v1537_v37 = vrot.slane %v1536_v5, 4  ;;  %1174 = vst [vmem:[#allocation2 + $0x98] sm:$0x1] %v1173_v17  ;;  %v3852_v21 = vsel %vm8963_vm1, %v7290_v30, %v3851_v7  ;;  %v3853_v53 = vrot.slane %v3851_v7, 4  ;;  %480 = vst [vmem:[#allocation2 + $0x9c] sm:$0x1] %v479_v8 }
  0xbf   : > { %536 = vst [vmem:[#allocation2 + $0xa4] sm:$0x1] %v535_v29  ;;  %1171 = vst.msk [vmem:[#allocation2 + $0x94] sm:$0xf] %vm579_vm7, %v972_v20  ;;  %v975_v44 = vshrl.u32 %v9161_v57, 16  ;;  %v978_v43 = vshll.u32 %v9161_v57, 16  ;;  %v7488_v30 = vpack.c.bf16 %v668_v56, %v668_v56  ;;  %v7489_v5 = vpack.c.bf16 %v669_v59, %v669_v59 }
  0xc0   : > { %v983_v10 = vshrl.u32 %v9163_v39, 16  ;;  %v986_v18 = vshll.u32 %v9163_v39, 16  ;;  %v1542_v23 = vsel %vm8707_vm13, %v1537_v37, %v1541_v34  ;;  %v3855_v24 = vsel %vm8963_vm1, %v3853_v53, %v3854_v41 }
  0xc1   : > { %v7291_v63 = vrot.slane %v3744_v32, 9  ;;  %v3858_v46 = vrot.slane %v3035_v38, 5  ;;  %v7115_v31 = vcombine.low %v1532_v40, %v1542_v23  ;;  %v7307_v28 = vcombine.low %v3852_v21, %v3855_v24  ;;  %v9204_v48 = vld [vmem:[#allocation2 + $0x90] sm:$0xf] }
  0xc2   : > { %v977_v49 = vrot.slane %v975_v44, 7  ;;  %v985_v58 = vrot.slane %v983_v10, 7  ;;  %v3861_v33 = vrot.slane %v3036_v22, 5  ;;  %v482_v39 = vsel %vm8568_vm3, 0, %v481_v25 }
  0xc3   : > { %v3859_v57 = vsel %vm8963_vm1, %v7291_v63, %v3858_v46  ;;  %v3860_v54 = vrot.slane %v3858_v46, 4  ;;  %7672 = vmatmul.mubr.msk.bf16.gmra.mrb[20].mxu1 %vm1689_vm12, %v7115_v31  ;;  %7834 = vmatmul.mubr.msk.bf16.gmra.mrb[12].mxu0 %vm1689_vm12, %v7307_v28  ;;  %483 = vst [vmem:[#allocation2 + $0xa8] sm:$0x1] %v482_v39  ;;  %v1544_v61 = vshrl.u32 %v9204_v48, 16  ;;  %v1547_v2 = vshll.u32 %v9204_v48, 16 }
  0xc4   : > { %v980_v47 = vor.u32 %v978_v43, %v977_v49  ;;  %v981_v55 = vrot.slane %v977_v49, 4  ;;  %v988_v45 = vor.u32 %v986_v18, %v985_v58  ;;  %v990_v4 = vrot.slane %v985_v58, 4 }
  0xc5   : > { %v3862_v52 = vsel %vm8963_vm1, %v3860_v54, %v3861_v33  ;;  %v538_v15 = vsel %vm8575_vm5, 0, %v537_v51  ;;  %v1248_v34 = vld [vmem:[#allocation2 + $0x98] sm:$0x1]  ;;  %v1175_v26 = vld [vmem:[#allocation2 + $0x9c] sm:$0xf]  ;;  %v1546_v7 = vrot.slane %v1544_v61, 4 }
  0xc6   : > { %v989_v62 = vsel %vm8608_vm8, %v981_v55, %v988_v45  ;;  %v1179_v35 = vld [vmem:[#allocation2 + $0xa4] sm:$0x1]  ;;  %v7308_v27 = vcombine.low %v3859_v57, %v3862_v52  ;;  %539 = vst [vmem:[#allocation2 + $0xb0] sm:$0x1] %v538_v15  ;;  %v9215_v19 = vld [vmem:[#allocation2 + $0x94] sm:$0xf]  ;;  %v1176_v17 = vsel %vm8620_vm9, %v980_v47, %v1175_v26 }
  0xc7   : > { %v1549_v41 = vrot.slane %v1547_v2, 5  ;;  %v1563_v40 = vshll.u32 %v1248_v34, 16  ;;  %1178 = vst.msk [vmem:[#allocation2 + $0xa0] sm:$0xf] %vm579_vm7, %v989_v62  ;;  %v1553_v8 = vshll.u32 %v9215_v19, 16  ;;  %v1557_v29 = vshrl.u32 %v9215_v19, 16 }
  0xc8   : > { %1177 = vst [vmem:[#allocation2 + $0x9c] sm:$0xf] %v1176_v17  ;;  %v1180_v38 = vsel %vm8568_vm3, %v990_v4, %v1179_v35  ;;  %7837 = vmatprep.mubr.msk.bf16.mxu0 %vm1689_vm12, %v7308_v27  ;;  %v992_v32 = vshrl.u32 %v7488_v30, 16  ;;  %v995_v37 = vshll.u32 %v7488_v30, 16  ;;  %v1000_v20 = vshrl.u32 %v7489_v5, 16 }
  0xc9   : > { %v1550_v25 = vor.u32 %v1549_v41, %v1546_v7  ;;  %1181 = vst [vmem:[#allocation2 + $0xa4] sm:$0x1] %v1180_v38  ;;  %v1555_v21 = vrot.slane %v1553_v8, 5  ;;  %v1559_v53 = vrot.slane %v1557_v29, 4  ;;  %v1003_v44 = vshll.u32 %v7489_v5, 16  ;;  %v670_v5 = vld [vmem:[%s8587_s17 + $0xe0] sm:$0xff] }
  0xca   : > { %v994_v22 = vrot.slane %v992_v32, 7  ;;  %v1002_v10 = vrot.slane %v1000_v20, 7  ;;  %v1182_v18 = vld [vmem:[#allocation2 + $0xa8] sm:$0xf]  ;;  %v1565_v23 = vrot.slane %v1563_v40, 5  ;;  %vm6265_vm2 = vcmask 58368  }
  0xcb   : > { %v1551_v43 = vrot.slane %v1550_v25, 4  ;;  %v1560_v51 = vor.u32 %v1559_v53, %v1555_v21  ;;  %v9231_v33 = vld [vmem:[#allocation2 + $0x7c] sm:$0xf]  ;;  %v3745_v45 = vld [vmem:[#allocation2 + $0x78] sm:$0xe]  ;;  %v671_v8 = vld [vmem:[%s8587_s17 + $0xe8] sm:$0xff]  ;;  %v7490_v53 = vpack.c.bf16 %v670_v5, %v670_v5 }
  0xcc   : > { %v997_v24 = vor.u32 %v995_v37, %v994_v22  ;;  %v998_v63 = vrot.slane %v994_v22, 4  ;;  %v1005_v46 = vor.u32 %v1003_v44, %v1002_v10  ;;  %v1007_v31 = vrot.slane %v1002_v10, 4  ;;  %v484_v4 = vld [vmem:[#allocation2 + $0xb4] sm:$0x1]  ;;  %v540_v61 = vld [vmem:[#allocation2 + $0xbc] sm:$0x1] }
  0xcd   : > { %v1186_v28 = vld [vmem:[#allocation2 + $0xb0] sm:$0x1]  ;;  %v1556_v49 = vsel %vm8707_vm13, %v1551_v43, %v1555_v21  ;;  %v1561_v58 = vrot.slane %v1560_v51, 4  ;;  %v9246_v62 = vld [vmem:[#allocation2 + $0x80] sm:$0x1]  ;;  %v7292_v17 = vrot.slane %v3745_v45, 9  ;;  %v7491_v10 = vpack.c.bf16 %v671_v8, %v671_v8 }
  0xce   : > { %v9227_v57 = vld [vmem:[#allocation2 + $0xa0] sm:$0xf]  ;;  %v1183_v54 = vsel %vm8620_vm9, %v997_v24, %v1182_v18  ;;  %v1006_v47 = vsel %vm8608_vm8, %v998_v63, %v1005_v46  ;;  %v1187_v55 = vsel %vm8568_vm3, %v1007_v31, %v1186_v28  ;;  %v3746_v7 = vld [vmem:[#allocation2 + $0x84] sm:$0xe]  ;;  %v3865_v32 = vrot.slane %v9231_v33, 5 }
  0xcf   : > { %v9233_v39 = vld [vmem:[#allocation2 + $0x9c] sm:$0xf]  ;;  %v1577_v56 = vshll.u32 %v9227_v57, 16  ;;  %v1581_v59 = vshrl.u32 %v9227_v57, 16  ;;  %1184 = vst [vmem:[#allocation2 + $0xa8] sm:$0xf] %v1183_v54  ;;  %v1566_v2 = vsel %vm8707_vm13, %v1561_v58, %v1565_v23 }
  0xd0   : > { %v1249_v52 = vld [vmem:[#allocation2 + $0xa4] sm:$0x1]  ;;  %v1568_v15 = vshrl.u32 %v9233_v39, 16  ;;  %v1571_v34 = vshll.u32 %v9233_v39, 16  ;;  %1185 = vst.msk [vmem:[#allocation2 + $0xac] sm:$0xf] %vm579_vm7, %v1006_v47  ;;  %v7116_v26 = vcombine.low %v1556_v49, %v1566_v2  ;;  %v3866_v44 = vsel %vm8963_vm1, %v7292_v17, %v3865_v32 }
  0xd1   : > { %1188 = vst [vmem:[#allocation2 + $0xb0] sm:$0x1] %v1187_v55  ;;  %v1579_v35 = vrot.slane %v1577_v56, 5  ;;  %v1583_v27 = vrot.slane %v1581_v59, 4  ;;  %v1587_v30 = vshll.u32 %v1249_v52, 16  ;;  %v3868_v25 = vrot.slane %v9246_v62, 5 }
  0xd2   : > { %v1570_v41 = vrot.slane %v1568_v15, 4  ;;  %v1573_v40 = vrot.slane %v1571_v34, 5  ;;  %7675 = vmatprep.mubr.msk.bf16.mxu1 %vm1689_vm12, %v7116_v26  ;;  %v485_v20 = vsel %vm8568_vm3, 0, %v484_v4  ;;  %v541_v21 = vsel %vm8575_vm5, 0, %v540_v61  ;;  %v3041_v45 = vld [vmem:[#allocation2 + $0x88] sm:$0xf] }
  0xd3   : > { %v1584_v29 = vor.u32 %v1583_v27, %v1579_v35  ;;  %v1589_v38 = vrot.slane %v1587_v30, 5  ;;  %v3867_v43 = vrot.slane %v3865_v32, 4  ;;  %486 = vst [vmem:[#allocation2 + $0xb4] sm:$0x1] %v485_v20  ;;  %542 = vst [vmem:[#allocation2 + $0xbc] sm:$0x1] %v541_v21 }
  0xd4   : > { %v1574_v37 = vor.u32 %v1573_v40, %v1570_v41  ;;  %v1009_v23 = vshrl.u32 %v7490_v53, 16  ;;  %v1012_v24 = vshll.u32 %v7490_v53, 16  ;;  %v7293_v63 = vrot.slane %v3746_v7, 9  ;;  %v3042_v15 = vld [vmem:[#allocation2 + $0x8c] sm:$0x1] }
  0xd5   : > { %v1585_v22 = vrot.slane %v1584_v29, 4  ;;  %v3869_v54 = vsel %vm8963_vm1, %v3867_v43, %v3868_v25  ;;  %v3747_v34 = vld [vmem:[#allocation2 + $0x90] sm:$0xe]  ;;  %v1020_v41 = vshll.u32 %v7491_v10, 16  ;;  %v3872_v40 = vrot.slane %v3041_v45, 5 }
  0xd6   : > { %v1575_v18 = vrot.slane %v1574_v37, 4  ;;  %v9259_v51 = vld [vmem:[#allocation2 + $0xa8] sm:$0xf]  ;;  %v7309_v52 = vcombine.low %v3866_v44, %v3869_v54  ;;  %v1011_v5 = vrot.slane %v1009_v23, 7  ;;  %v3875_v32 = vrot.slane %v3042_v15, 5 }
  0xd7   : > { %v1590_v46 = vsel %vm8707_vm13, %v1585_v22, %v1589_v38  ;;  %v9263_v31 = vld [vmem:[#allocation2 + $0xac] sm:$0xf]  ;;  %v1592_v49 = vshrl.u32 %v9259_v51, 16  ;;  %v1595_v58 = vshll.u32 %v9259_v51, 16  ;;  %v3044_v25 = vld [vmem:[#allocation2 + $0x94] sm:$0xf]  ;;  %v3873_v21 = vsel %vm8963_vm1, %v7293_v63, %v3872_v40 }
  0xd8   : > { %v1250_v28 = vld [vmem:[#allocation2 + $0xb0] sm:$0x1]  ;;  %v1580_v56 = vsel %vm8707_vm13, %v1575_v18, %v1579_v35  ;;  %v1601_v59 = vshll.u32 %v9263_v31, 16  ;;  %v1605_v47 = vshrl.u32 %v9263_v31, 16  ;;  %7838 = vmatmul.mubr.msk.bf16.gmra.mrb[16].mxu0 %vm1689_vm12, %v7309_v52  ;;  %v1017_v35 = vshrl.u32 %v7491_v10, 16 }
  0xd9   : > { %v1611_v55 = vshll.u32 %v1250_v28, 16  ;;  %v7117_v4 = vcombine.low %v1580_v56, %v1590_v46  ;;  %v1594_v61 = vrot.slane %v1592_v49, 4  ;;  %v1597_v2 = vrot.slane %v1595_v58, 5  ;;  %v3045_v22 = vld [vmem:[#allocation2 + $0x98] sm:$0x1] }
  0xda   : > { %v1603_v26 = vrot.slane %v1601_v59, 5  ;;  %v1607_v27 = vrot.slane %v1605_v47, 4  ;;  %v1014_v8 = vor.u32 %v1012_v24, %v1011_v5  ;;  %v1015_v29 = vrot.slane %v1011_v5, 4  ;;  %v1189_v38 = vld [vmem:[#allocation2 + $0xb4] sm:$0xf] }
  0xdb   : > { %v1613_v30 = vrot.slane %v1611_v55, 5  ;;  %7676 = vmatmul.mubr.msk.bf16.gmra.mrb[24].mxu1 %vm1689_vm12, %v7117_v4  ;;  %v1598_v7 = vor.u32 %v1597_v2, %v1594_v61  ;;  %v1019_v20 = vrot.slane %v1017_v35, 7  ;;  %v3874_v53 = vrot.slane %v3872_v40, 4  ;;  %v1193_v18 = vld [vmem:[#allocation2 + $0xbc] sm:$0x1]  ;;  %v672_v35 = vld [vmem:[%s8587_s17 + $0xf0] sm:$0xff] }
  0xdc   : > { %v1608_v17 = vor.u32 %v1607_v27, %v1603_v26  ;;  %v1190_v43 = vsel %vm8620_vm9, %v1014_v8, %v1189_v38  ;;  %v7294_v10 = vrot.slane %v3747_v34, 9  ;;  %v3047_v49 = vld [vmem:[#allocation2 + $0xa0] sm:$0xf]  ;;  %v3748_v58 = vld [vmem:[#allocation2 + $0x9c] sm:$0xe]  ;;  %v3879_v56 = vrot.slane %v3044_v25, 5 }
  0xdd   : > { %v1599_v37 = vrot.slane %v1598_v7, 4  ;;  %v1022_v24 = vor.u32 %v1020_v41, %v1019_v20  ;;  %v1024_v46 = vrot.slane %v1019_v20, 4  ;;  %1191 = vst [vmem:[#allocation2 + $0xb4] sm:$0xf] %v1190_v43  ;;  %v3876_v28 = vsel %vm8963_vm1, %v3874_v53, %v3875_v32  ;;  %v3048_v47 = vld [vmem:[#allocation2 + $0xa4] sm:$0x1] }
  0xde   : > { %v1609_v44 = vrot.slane %v1608_v17, 4  ;;  %v7310_v54 = vcombine.low %v3873_v21, %v3876_v28  ;;  %v3882_v59 = vrot.slane %v3045_v22, 5  ;;  %v3749_v55 = vld [vmem:[#allocation2 + $0xa8] sm:$0xe]  ;;  %v3050_v2 = vld [vmem:[#allocation2 + $0xac] sm:$0xf]  ;;  %v3880_v15 = vsel %vm8963_vm1, %v7294_v10, %v3879_v56 }
  0xdf   : > { %v1604_v23 = vsel %vm8707_vm13, %v1599_v37, %v1603_v26  ;;  %v1023_v4 = vsel %vm8608_vm8, %v1015_v29, %v1022_v24  ;;  %v1194_v61 = vsel %vm8568_vm3, %v1024_v46, %v1193_v18  ;;  %v3051_v52 = vld [vmem:[#allocation2 + $0xb0] sm:$0x1]  ;;  %v3881_v34 = vrot.slane %v3879_v56, 4  ;;  %v487_v7 = vld [vmem:[#allocation2 + $0xc0] sm:$0x1]  ;;  %v673_v25 = vld [vmem:[%s8587_s17 + $0xf8] sm:$0xff] }
  0xe0   : > { %v1614_v63 = vsel %vm8707_vm13, %v1609_v44, %v1613_v30  ;;  %1192 = vst.msk [vmem:[#allocation2 + $0xb8] sm:$0xf] %vm579_vm7, %v1023_v4  ;;  %1195 = vst [vmem:[#allocation2 + $0xbc] sm:$0x1] %v1194_v61  ;;  %7841 = vmatprep.mubr.msk.bf16.mxu0 %vm1689_vm12, %v7310_v54  ;;  %v7295_v26 = vrot.slane %v3748_v58, 9  ;;  %v3886_v27 = vrot.slane %v3047_v49, 5  ;;  %v7492_v44 = vpack.c.bf16 %v672_v35, %v672_v35 }
  0xe1   : > { %v7118_v45 = vcombine.low %v1604_v23, %v1614_v63  ;;  %v3889_v30 = vrot.slane %v3048_v47, 5  ;;  %v7296_v5 = vrot.slane %v3749_v55, 9  ;;  %v3883_v41 = vsel %vm8963_vm1, %v3881_v34, %v3882_v59  ;;  %v543_v32 = vld [vmem:[#allocation2 + $0xc8] sm:$0x1]  ;;  %s7456_s17 = sadd.s32 240, %s8579_s14  ;;  %s374_s14 = sand.u32 1, %s8444_s22  }
  0xe2   : > { %v3893_v40 = vrot.slane %v3050_v2, 5  ;;  %v3896_v17 = vrot.slane %v3051_v52, 5  ;;  %v7311_v8 = vcombine.low %v3880_v15, %v3883_v41  ;;  %v3887_v29 = vsel %vm8963_vm1, %v7295_v26, %v3886_v27  ;;  %s417_s30 = scalar_lea.vmem %s10939_s2, %s7456_s17  ;;  %s10494_s12 = sshll.u32 %s374_s14, 6 }
  0xe3   : > { %7679 = vmatprep.mubr.msk.bf16.mxu1 %vm1689_vm12, %v7118_v45  ;;  %v3888_v38 = vrot.slane %v3886_v27, 4  ;;  %v488_v22 = vsel %vm8568_vm3, 0, %v487_v7  ;;  %v544_v28 = vsel %vm8575_vm5, 0, %v543_v32  ;;  %v7493_v49 = vpack.c.bf16 %v673_v25, %v673_v25  ;;  %s10526_s13 = scalar_lea.vmem [#allocation3], %s10494_s12  ;;  %s10891_s24 = scalar_lea.sflag [#allocation4], %s374_s14 }
  0xe4   : > { %v9300_v37 = vld [vmem:[#allocation2 + $0xb4] sm:$0xf]  ;;  %v3894_v20 = vsel %vm8963_vm1, %v7296_v5, %v3893_v40  ;;  %v3895_v21 = vrot.slane %v3893_v40, 4  ;;  %7842 = vmatmul.mubr.msk.bf16.gmra.mrb[20].mxu0 %vm1689_vm12, %v7311_v8  ;;  %489 = vst [vmem:[#allocation2 + $0xc0] sm:$0x1] %v488_v22  ;;  %v1026_v61 = vshrl.u32 %v7492_v44, 16 }
  0xe5   : > { %v3750_v53 = vld [vmem:[#allocation2 + $0xb4] sm:$0xe]  ;;  %v1616_v43 = vshrl.u32 %v9300_v37, 16  ;;  %v1619_v18 = vshll.u32 %v9300_v37, 16  ;;  %v3890_v10 = vsel %vm8963_vm1, %v3888_v38, %v3889_v30  ;;  %545 = vst [vmem:[#allocation2 + $0xc8] sm:$0x1] %v544_v28 }
  0xe6   : > { %v7297_v23 = vrot.slane %v3750_v53, 9  ;;  %v7312_v24 = vcombine.low %v3887_v29, %v3890_v10  ;;  %v3897_v46 = vsel %vm8963_vm1, %v3895_v21, %v3896_v17  ;;  %v1029_v34 = vshll.u32 %v7492_v44, 16  ;;  %v8315_v28 = vld [vmem:[#allocation2] sm:$0xf]  ;;  %s6887_s19 = sshll.u32 %s10526_s13, 4  ;;  %s10883_s19 = int_to_ptr.vmem [resolvable:$true] %s6887_s19 }
  0xe7   : > { %v9315_v58 = vld [vmem:[#allocation2 + $0xb8] sm:$0xf]  ;;  %v1251_v63 = vld [vmem:[#allocation2 + $0xbc] sm:$0x1]  ;;  %v1618_v54 = vrot.slane %v1616_v43, 4  ;;  %v1621_v56 = vrot.slane %v1619_v18, 5  ;;  %v7313_v59 = vcombine.low %v3894_v20, %v3897_v46 }
  0xe8   : > { %v1625_v47 = vshll.u32 %v9315_v58, 16  ;;  %v1629_v55 = vshrl.u32 %v9315_v58, 16  ;;  %v1635_v45 = vshll.u32 %v1251_v63, 16  ;;  %7845 = vmatprep.mubr.msk.bf16.mxu0 %vm1689_vm12, %v7312_v24  ;;  %v3053_v4 = vld [vmem:[#allocation2 + $0xb8] sm:$0xf]  ;;  %v1034_v26 = vshrl.u32 %v7493_v49, 16 }
  0xe9   : > { %v1622_v2 = vor.u32 %v1621_v56, %v1618_v54  ;;  %v3054_v52 = vld [vmem:[#allocation2 + $0xbc] sm:$0x1]  ;;  %v3900_v15 = vrot.slane %v3053_v4, 5  ;;  %v1028_v40 = vrot.slane %v1026_v61, 7  ;;  %v1037_v38 = vshll.u32 %v7493_v49, 16  ;;  %s8382_s28 = scalar_lea.vmem %s10883_s19, 1024 }
  0xea   : > { %v1627_v27 = vrot.slane %v1625_v47, 5  ;;  %v1631_v30 = vrot.slane %v1629_v55, 4  ;;  %v3903_v5 = vrot.slane %v3054_v52, 5  ;;  %v1637_v8 = vrot.slane %v1635_v45, 5  ;;  %v9332_v46 = vld [vmem:[#allocation2 + $0x4] sm:$0xf]  ;;  %p8383_p12 = scmp.ne.s32.totalorder %s10883_s19, %s8382_s28 }
  0xeb   : > { %v1623_v7 = vrot.slane %v1622_v2, 4  ;;  %v3901_v35 = vsel %vm8963_vm1, %v7297_v23, %v3900_v15  ;;  %v3902_v41 = vrot.slane %v3900_v15, 4  ;;  %v1036_v29 = vrot.slane %v1034_v26, 7  ;;  %v1196_v32 = vld [vmem:[#allocation2 + $0xc0] sm:$0xf]  ;;  %v590_v15 = vld [vmem:[%s417_s30 + $0x8] sm:$0xff] }
  0xec   : > { %v1632_v17 = vor.u32 %v1631_v30, %v1627_v27  ;;  %7846 = vmatmul.mubr.msk.bf16.gmra.mrb[24].mxu0 %vm1689_vm12, %v7313_v59  ;;  %v1031_v21 = vor.u32 %v1029_v34, %v1028_v40  ;;  %v1032_v53 = vrot.slane %v1028_v40, 4  ;;  %v1200_v10 = vld [vmem:[#allocation2 + $0xc8] sm:$0x1]  ;;  %v7136_v49 = vcombine.low %v8315_v28, %v9332_v46  ;;  %v589_v59 = vld [vmem:[%s417_s30] sm:$0xff]  ;;  %v490_v45 = vld [vmem:[#allocation2 + $0xcc] sm:$0x1]  ;;  %p8384_p13 = pnand %p8383_p12, %p8542_p4 }
  0xed   : > { %v1628_v25 = vsel %vm8707_vm13, %v1623_v7, %v1627_v27  ;;  %v3904_v20 = vsel %vm8963_vm1, %v3902_v41, %v3903_v5  ;;  %v1039_v43 = vor.u32 %v1037_v38, %v1036_v29  ;;  %v1041_v18 = vrot.slane %v1036_v29, 4  ;;  %v8316_v4 = vld [vmem:[#allocation2 + $0xc] sm:$0xf]  ;;  %v9348_v61 = vld [vmem:[#allocation2 + $0x10] sm:$0xf]  ;;  %s8464_s30 = smov [#allocation3]  }
  0xee   : > { %v1633_v22 = vrot.slane %v1632_v17, 4  ;;  %v7314_v44 = vcombine.low %v3901_v35, %v3904_v20  ;;  %v1197_v23 = vsel %vm8620_vm9, %v1031_v21, %v1196_v32  ;;  %v3284_v47 = vshll.u32 %v9231_v33, 16  ;;  %v8318_v26 = vld [vmem:[#allocation2 + $0x18] sm:$0xf]  ;;  %v9351_v27 = vld [vmem:[#allocation2 + $0x1c] sm:$0xf]  ;;  %p8385_p0 = pneg %p8384_p13 }
  0xef   : > { %v1040_v63 = vsel %vm8608_vm8, %v1032_v53, %v1039_v43  ;;  %1198 = vst [vmem:[#allocation2 + $0xc0] sm:$0xf] %v1197_v23  ;;  %v1201_v54 = vsel %vm8568_vm3, %v1041_v18, %v1200_v10  ;;  %v3288_v55 = vshrl.u32 %v9231_v33, 16  ;;  %v7137_v2 = vcombine.low %v8316_v4, %v9348_v61  ;;  %v8320_v33 = vld [vmem:[%s10940_s3 + $0x4] sm:$0x3]  ;;  %v8282_v43 = vld [vmem:[#allocation2 + $0x18] sm:$0xff]  }
  0xf0   : > { %v1638_v24 = vsel %vm8707_vm13, %v1633_v22, %v1637_v8  ;;  %7849 = vmatprep.mubr.msk.bf16.mxu0 %vm1689_vm12, %v7314_v44  ;;  %1199 = vst.msk [vmem:[#allocation2 + $0xc4] sm:$0xf] %vm579_vm7, %v1040_v63  ;;  %1202 = vst [vmem:[#allocation2 + $0xc8] sm:$0x1] %v1201_v54  ;;  %v7460_v34 = vpack.c.bf16 %v589_v59, %v589_v59  ;;  %v7138_v30 = vcombine.low %v8318_v26, %v9351_v27  ;;  %v9363_v38 = vld [vmem:[%s10940_s3 + $0x6] sm:$0x3] }
  0xf1   : > { %v7119_v56 = vcombine.low %v1628_v25, %v1638_v24  ;;  %v2457_v41 = vsel %vm1738_vm0, %v8320_v33, 0  ;;  %v9358_v8 = vrot.slane %v3284_v47, 5  ;;  %v3290_v29 = vrot.slane %v3288_v55, 4  ;;  %v8321_v54 = vld [vmem:[#allocation2 + $0x24] sm:$0xf]  ;;  %s8386_s8 = sshll.u32 %s8464_s30, 4  ;;  %s8387_s8 = int_to_ptr.vmem [resolvable:$false] %s8386_s8 }
  0xf2   : > { %v491_v32 = vsel %vm8568_vm3, 0, %v490_v45  ;;  %v7461_v25 = vpack.c.bf16 %v590_v15, %v590_v15  ;;  %v598_v53 = vshrl.u32 %v7460_v34, 16  ;;  %v601_v22 = vshll.u32 %v7460_v34, 16  ;;  %v8323_v4 = vld [vmem:[#allocation2 + $0x30] sm:$0xf]  ;;  %p8389_p1 = scmp.lt.s32.totalorder %s10883_s19, %s8387_s8 }
  0xf3   : > { %7680 = vmatmul.mubr.msk.bf16.gmra.mrb[28].mxu1 %vm1689_vm12, %v7119_v56  ;;  %10979 = vst [vmem:[#allocation9_spill] sm:$0xff] %v9358_v8  ;;  %492 = vst [vmem:[#allocation2 + $0xcc] sm:$0x1] %v491_v32  ;;  %v2255_v24 = vrot.slane %v9348_v61, 5  ;;  %v3291_v28 = vor.u32 %v3290_v29, %v9358_v8  ;;  %v9378_v56 = vld [vmem:[#allocation2 + $0x28] sm:$0xf] }
  0xf4   : > { %7685 = vmatprep.mubr.msk.bf16.mxu1 %vm1689_vm12, %v7136_v49  ;;  %v600_v18 = vrot.slane %v598_v53, 7  ;;  %v606_v10 = vshrl.u32 %v7461_v25, 16  ;;  %v609_v23 = vshll.u32 %v7461_v25, 16  ;;  %v3294_v49 = vshll.u32 %v9246_v62, 16  ;;  %v2196_v15 = vld [vmem:[#allocation2 + $0xc] sm:$0xe] }
  0xf5   : > { %v7139_v59 = vcombine.low %v8321_v54, %v9378_v56  ;;  %v8325_v34 = vld [vmem:[#allocation2 + $0x14] sm:$0x1]  ;;  %v2248_v33 = vrot.slane %v9332_v46, 5  ;;  %v2257_v29 = vrot.slane %v2255_v24, 4  ;;  %v2197_v32 = vld [vmem:[#allocation2 + $0x18] sm:$0xe] }
  0xf6   : > { %v3751_v52 = vld [vmem:[#allocation2 + $0xc0] sm:$0xe]  ;;  %v603_v47 = vor.u32 %v601_v22, %v600_v18  ;;  %v604_v55 = vrot.slane %v600_v18, 4  ;;  %v9381_v45 = vrot.slane %v606_v10, 7  ;;  %v2258_v62 = vrot.slane %v8325_v34, 5  ;;  %v8283_v18 = vld [vmem:[#allocation2 + $0x24] sm:$0xff]  }
  0xf7   : > { %v3056_v5 = vld [vmem:[#allocation2 + $0xc4] sm:$0xf]  ;;  %v3057_v7 = vld [vmem:[#allocation2 + $0xc8] sm:$0x1]  ;;  %v7298_v35 = vrot.slane %v3751_v52, 9  ;;  %v8284_v54 = vld [vmem:[#allocation2 + $0x30] sm:$0xff]  }
  0xf8   : > { %v3907_v40 = vrot.slane %v3056_v5, 5  ;;  %v3910_v17 = vrot.slane %v3057_v7, 5  ;;  %10980 = vst [vmem:[#allocation10_spill] sm:$0xff] %v9381_v45  ;;  %v611_v26 = vor.u32 %v609_v23, %v9381_v45  ;;  %v9392_v7 = vrot.slane %v3291_v28, 4  ;;  %v9405_v53 = vld [vmem:[#allocation2 + $0x40] sm:$0xf] }
  0xf9   : > { %v8329_v22 = vld [vmem:[#allocation2 + $0x48] sm:$0xf]  ;;  %v9411_v10 = vld [vmem:[#allocation2 + $0x54] sm:$0xf]  ;;  %v2262_v28 = vrot.slane %v9351_v27, 5  ;;  %vm6780_vm4 = vcmask 1042434  }
  0xfa   : > { %v3908_v20 = vsel %vm8963_vm1, %v7298_v35, %v3907_v40  ;;  %v3909_v21 = vrot.slane %v3907_v40, 4  ;;  %10981 = vst [vmem:[#allocation11_spill] sm:$0xff] %v9392_v7  ;;  %v9394_v35 = vrot.slane %v3294_v49, 5  ;;  %v2195_v40 = vld [vmem:[#allocation2] sm:$0xe]  ;;  %v612_v25 = vsel %vm8608_vm8, %v604_v55, %v611_v26 }
  0xfb   : > { %7686 = vmatmul.mubr.msk.bf16.vlgmr.msra.gmra.mrb[0].mxu1 %vm1689_vm12, %v7137_v2  ;;  %v9383_v2 = vld [vmem:[#allocation2 + $0x34] sm:$0xf]  ;;  %v9418_v49 = vld [vmem:[#allocation2 + $0x24] sm:$0xe]  ;;  %621 = vst.msk [vmem:[#allocation2 + $0xd0] sm:$0xf] %vm579_vm7, %v612_v25 }
  0xfc   : > { %7718 = vmatpush3.bf16.msra.mxu1 %v2457_v41  ;;  %7689 = vmatprep.mubr.msk.bf16.mxu1 %vm1689_vm12, %v7138_v30  ;;  %v3911_v44 = vsel %vm8963_vm1, %v3909_v21, %v3910_v17  ;;  %v7140_v52 = vcombine.low %v8323_v4, %v9383_v2  ;;  %v9389_v30 = vld [vmem:[#allocation2 + $0x8] sm:$0x1]  ;;  %10982 = vst [vmem:[#allocation12_spill] sm:$0xff] %v9394_v35  ;;  %v618_v41 = vld [vmem:[#allocation2 + $0xcc] sm:$0xf]  ;;  %v7169_v17 = vrot.slane %v2196_v15, 9 }
  0xfd   : > { %8216 = vmatprep.subr.msk.bf16.mxu1 %vm1738_vm0, %v9363_v38  ;;  %v7315_v63 = vcombine.low %v3908_v20, %v3911_v44  ;;  %v2251_v5 = vrot.slane %v9389_v30, 5  ;;  %v619_v20 = vsel %vm8620_vm9, %v603_v47, %v618_v41  ;;  %v8327_v21 = vld [vmem:[#allocation2 + $0x3c] sm:$0xf]  ;;  %v9408_v44 = vld [vmem:[#allocation2 + $0x4c] sm:$0xf]  ;;  %v7168_v41 = vrot.slane %v2195_v40, 9 }
  0xfe   : > { %v7141_v46 = vcombine.low %v8327_v21, %v9405_v53  ;;  %620 = vst [vmem:[#allocation2 + $0xcc] sm:$0xf] %v619_v20  ;;  %v9423_v47 = vld [vmem:[#allocation2 + $0x64] sm:$0xf]  ;;  %v8335_v27 = vld [vmem:[%s10940_s3 + $0xe] sm:$0x3]  ;;  %v9443_v21 = vsel %vm8963_vm1, %v7169_v17, %v2255_v24 }
  0xff   : > { %7850 = vmatmul.mubr.msk.bf16.gmra.mrb[28].mxu0 %vm1689_vm12, %v7315_v63  ;;  %v4565_v63 = vld [vmem:[#allocation2 + $0x18] sm:$0xf]  ;;  %638 = vst.msk [vmem:[#allocation2 + $0xd0] sm:$0xf] %vm579_vm7, %v8462_v16  ;;  %v4566_v34 = vld [vmem:[#allocation2 + $0x1c] sm:$0xf] }
 0x100   : > { %7855 = vmatprep.mubr.msk.bf16.mxu0 %vm1689_vm12, %v8282_v43  ;;  %v7142_v43 = vcombine.low %v8329_v22, %v9408_v44  ;;  %v2250_v25 = vrot.slane %v2248_v33, 4  ;;  %v7170_v20 = vrot.slane %v2197_v32, 9  ;;  %v9447_v22 = vsel %vm8963_vm1, %v2257_v29, %v2258_v62  ;;  %v9450_v4 = vld [vmem:[#allocation2 + $0x30] sm:$0xe]  ;;  %v4569_v62 = vld [vmem:[#allocation2 + $0x28] sm:$0xf] }
 0x101   : > { %v7171_v16 = vrot.slane %v9418_v49, 9  ;;  %v9455_v40 = vld [vmem:[%s10940_s3 + $0x10] sm:$0x3]  ;;  %v2264_v61 = vrot.slane %v2262_v28, 4  ;;  %v2269_v24 = vrot.slane %v9378_v56, 5  ;;  %v4614_v17 = vshrl.u32 %v4565_v63, 16 }
 0x102   : > { %v4617_v32 = vshll.u32 %v4565_v63, 16  ;;  %v4623_v49 = vshll.u32 %v4566_v34, 16  ;;  %v9470_v56 = vsel %vm8963_vm1, %v7168_v41, %v2248_v33  ;;  %v9476_v63 = vsel %vm8963_vm1, %v2250_v25, %v2251_v5  ;;  %v8285_v41 = vld [vmem:[#allocation2 + $0x3c] sm:$0xff]   ;;  %v8337_v25 = vld [vmem:[#allocation2 + $0x2c] sm:$0x1] }
 0x103   : > { %7690 = vmatmul.mubr.msk.bf16.gmra.mrb[4].mxu1 %vm1689_vm12, %v7139_v59  ;;  %v9421_v59 = vld [vmem:[#allocation2 + $0x60] sm:$0xf]  ;;  %v9489_v33 = vsel %vm8963_vm1, %v7170_v20, %v2262_v28  ;;  %v2276_v30 = vrot.slane %v9383_v2, 5  ;;  %v2200_v28 = vld [vmem:[#allocation2 + $0x3c] sm:$0xe]  ;;  %v8286_v20 = vld [vmem:[#allocation2 + $0x48] sm:$0xff]  }
 0x104   : > { %7693 = vmatprep.mubr.msk.bf16.mxu1 %vm1689_vm12, %v7140_v52  ;;  %v5096_v52 = vsel %vm1738_vm0, %v8335_v27, 0  ;;  %v8336_v27 = vld [vmem:[#allocation2 + $0x20] sm:$0x1]  ;;  %v4616_v26 = vrot.slane %v4614_v17, 4  ;;  %v4619_v29 = vrot.slane %v4617_v32, 5  ;;  %v4651_v1 = vshrl.u32 %v4569_v62, 16 }
 0x105   : > { %v2265_v15 = vrot.slane %v8336_v27, 5  ;;  %v4627_v27 = vshrl.u32 %v4566_v34, 16  ;;  %v635_v5 = vld [vmem:[#allocation2 + $0xcc] sm:$0xf]  ;;  %v4568_v34 = vld [vmem:[#allocation2 + $0x24] sm:$0xf] }
 0x106   : > { %v2278_v55 = vrot.slane %v2276_v30, 4  ;;  %v8338_v2 = vld [vmem:[#allocation2 + $0x38] sm:$0x1]  ;;  %v2201_v17 = vld [vmem:[#allocation2 + $0x48] sm:$0xe]  ;;  %v4638_v32 = vshrl.u32 %v4568_v34, 16  ;;  %v4620_v7 = vor.u32 %v4619_v29, %v4616_v26 }
 0x107   : > { %7856 = vmatmul.mubr.msk.bf16.vlgmr.msra.gmra.mrb[0].mxu0 %vm1689_vm12, %v8283_v18  ;;  %v636_v18 = vsel %vm8620_vm9, 0, %v635_v5  ;;  %v4629_v42 = vrot.slane %v4627_v27, 4  ;;  %v4641_v23 = vshll.u32 %v4568_v34, 16  ;;  %v8339_v27 = vld [vmem:[#allocation2 + $0x44] sm:$0x1]  ;;  %v7174_v29 = vrot.slane %v2201_v17, 9 }
 0x108   : > { %7859 = vmatprep.mubr.msk.bf16.mxu0 %vm1689_vm12, %v8284_v54  ;;  %7888 = vmatpush3.bf16.msra.mxu0 %v5096_v52  ;;  %v9485_v52 = vsel %vm1738_vm0, %v9363_v38, 0  ;;  %v2272_v54 = vrot.slane %v8337_v25, 5  ;;  %v7172_v38 = vrot.slane %v9450_v4, 9  ;;  %637 = vst [vmem:[#allocation2 + $0xcc] sm:$0xf] %v636_v18  ;;  %v9507_v25 = vrot.slane %v4623_v49, 5 }
 0x109   : > { %8222 = vmatprep.subr.msk.bf16.mxu0 %vm1738_vm0, %v9455_v40  ;;  %v4567_v4 = vld [vmem:[#allocation2 + $0x20] sm:$0x1]  ;;  %v2279_v18 = vrot.slane %v8338_v2, 5  ;;  %v2286_v8 = vrot.slane %v8339_v27, 5  ;;  %v4570_v2 = vld [vmem:[#allocation2 + $0x2c] sm:$0x1] }
 0x10a   : > { %v4633_v34 = vshll.u32 %v4567_v4, 16  ;;  %v10984_v4 = vcombine.low %v9421_v59, %v9423_v47  ;;  %v4643_v27 = vrot.slane %v4641_v23, 5  ;;  %v8288_v35 = vld [vmem:[#allocation2 + $0x60] sm:$0xff]   ;;  %v9547_v59 = vrot.slane %v4620_v7, 4 }
 0x10b   : > { %7694 = vmatmul.mubr.msk.bf16.gmra.mrb[8].mxu1 %vm1689_vm12, %v7141_v46  ;;  %v9495_v46 = vsel %vm8963_vm1, %v2264_v61, %v2265_v15  ;;  %v9505_v15 = vsel %vm8963_vm1, %v7171_v16, %v2269_v24  ;;  %v2271_v61 = vrot.slane %v2269_v24, 4  ;;  %v4647_v16 = vshll.u32 %v4569_v62, 16  ;;  %v4571_v62 = vld [vmem:[#allocation2 + $0x30] sm:$0xf] }
 0x10c   : > { %7697 = vmatprep.mubr.msk.bf16.mxu1 %vm1689_vm12, %v7142_v43  ;;  %v2283_v43 = vrot.slane %v9405_v53, 5  ;;  %v2290_v53 = vrot.slane %v9408_v44, 5  ;;  %v7173_v24 = vrot.slane %v2200_v28, 9  ;;  %v9520_v44 = vsel %vm8963_vm1, %v7172_v38, %v2276_v30  ;;  %v4572_v38 = vld [vmem:[#allocation2 + $0x34] sm:$0xf] }
 0x10d   : > { %v9516_v5 = vsel %vm8963_vm1, %v2271_v61, %v2272_v54  ;;  %v10983_v28 = vcombine.low %v9411_v10, %v9413_v36  ;;  %v9529_v26 = vsel %vm8963_vm1, %v2278_v55, %v2279_v18  ;;  %v8340_v61 = vld [vmem:[#allocation2 + $0x50] sm:$0x1]  ;;  %v9535_v10 = vrot.slane %v4647_v16, 5  ;;  %v9555_v55 = vld [vmem:[#allocation2 + $0x54] sm:$0xe] }
 0x10e   : > { %v2285_v49 = vrot.slane %v2283_v43, 4  ;;  %v2292_v54 = vrot.slane %v2290_v53, 4  ;;  %v2293_v30 = vrot.slane %v8340_v61, 5  ;;  %v9541_v18 = vsel %vm8963_vm1, %v7173_v24, %v2283_v43  ;;  %v8341_v16 = vld [vmem:[#allocation2 + $0x5c] sm:$0x1] }
 0x10f   : > { %7860 = vmatmul.mubr.msk.bf16.gmra.mrb[4].mxu0 %vm1689_vm12, %v8285_v41  ;;  %v4630_v41 = vor.u32 %v4629_v42, %v9507_v25  ;;  %v4640_v42 = vrot.slane %v4638_v32, 4  ;;  %v9551_v23 = vrot.slane %v4633_v34, 5  ;;  %v4662_v32 = vshrl.u32 %v4571_v62, 16 }
 0x110   : > { %7863 = vmatprep.mubr.msk.bf16.mxu0 %vm1689_vm12, %v8286_v20  ;;  %v8287_v20 = vld [vmem:[#allocation2 + $0x54] sm:$0xff]   ;;  %v9545_v17 = vsel %vm8963_vm1, %v2285_v49, %v2286_v8  ;;  %v4671_v43 = vshll.u32 %v4572_v38, 16  ;;  %v4675_v24 = vshrl.u32 %v4572_v38, 16  ;;  %v9560_v8 = vsel %vm8963_vm1, %v7174_v29, %v2290_v53  ;;  %v4574_v29 = vld [vmem:[#allocation2 + $0x3c] sm:$0xf] }
 0x111   : > { %10985 = vst [vmem:[#allocation13_spill] sm:$0xff] %v9545_v17  ;;  %v9549_v61 = vrot.slane %v4630_v41, 4  ;;  %10986 = vst [vmem:[#allocation14_spill] sm:$0xff] %v9560_v8  ;;  %v9564_v7 = vsel %vm8963_vm1, %v2292_v54, %v2293_v30  ;;  %v4644_v49 = vor.u32 %v4643_v27, %v4640_v42  ;;  %v4626_v53 = vsel %vm8707_vm13, %v9547_v59, %v9507_v25  ;;  %v4575_v42 = vld [vmem:[#allocation2 + $0x40] sm:$0xf]  ;;  %v8289_v25 = vld [vmem:[#allocation2 + $0x6c] sm:$0xff]  }
 0x112   : > { %10987 = vst [vmem:[#allocation15_spill] sm:$0xff] %v9564_v7  ;;  %v4664_v30 = vrot.slane %v4662_v32, 4  ;;  %v10988_v27 = vcombine.low %v9106_v0, %v9108_v9  ;;  %v9587_v59 = vrot.slane %v4671_v43, 5  ;;  %v4677_v34 = vrot.slane %v4675_v24, 4  ;;  %v4578_v9 = vld [vmem:[#allocation2 + $0x4c] sm:$0xf] }
 0x113   : > { %7698 = vmatmul.mubr.msk.bf16.gmra.mrb[12].mxu1 %vm1689_vm12, %v10983_v28  ;;  %v4653_v28 = vrot.slane %v4651_v1, 4  ;;  %v4665_v1 = vshll.u32 %v4571_v62, 16  ;;  %v2297_v62 = vrot.slane %v9413_v36, 5  ;;  %v4636_v54 = vsel %vm8707_vm13, %v9549_v61, %v9551_v23  ;;  %v2203_v24 = vld [vmem:[#allocation2 + $0x60] sm:$0xe] }
 0x114   : > { %7701 = vmatprep.mubr.msk.bf16.mxu1 %vm1689_vm12, %v10984_v4  ;;  %v4657_v4 = vshll.u32 %v4570_v2, 16  ;;  %v4577_v2 = vld [vmem:[#allocation2 + $0x48] sm:$0xf]  ;;  %v4645_v61 = vrot.slane %v4644_v49, 4  ;;  %v4686_v32 = vshrl.u32 %v4574_v29, 16  ;;  %v4689_v0 = vshll.u32 %v4574_v29, 16 }
 0x115   : > { %v4654_v41 = vor.u32 %v4653_v28, %v9535_v10  ;;  %v4667_v38 = vrot.slane %v4665_v1, 5  ;;  %v8290_v1 = vld [vmem:[#allocation2 + $0x78] sm:$0xff]   ;;  %v2300_v3 = vrot.slane %v8341_v16, 5  ;;  %v4695_v36 = vshll.u32 %v4575_v42, 16 }
 0x116   : > { %v4659_v28 = vrot.slane %v4657_v4, 5  ;;  %v4699_v4 = vshrl.u32 %v4575_v42, 16  ;;  %v4710_v6 = vshrl.u32 %v4577_v2, 16  ;;  %v4713_v7 = vshll.u32 %v4577_v2, 16  ;;  %v4576_v42 = vld [vmem:[#allocation2 + $0x44] sm:$0x1] }
 0x117   : > { %7864 = vmatmul.mubr.msk.bf16.gmra.mrb[8].mxu0 %vm1689_vm12, %v8287_v20  ;;  %v4573_v20 = vld [vmem:[#allocation2 + $0x38] sm:$0x1]  ;;  %v4655_v23 = vrot.slane %v4654_v41, 4  ;;  %v4668_v43 = vor.u32 %v4667_v38, %v4664_v30  ;;  %v4719_v49 = vshll.u32 %v4578_v9, 16  ;;  %v4723_v41 = vshrl.u32 %v4578_v9, 16 }
 0x118   : > { %7867 = vmatprep.mubr.msk.bf16.mxu0 %vm1689_vm12, %v8288_v35  ;;  %v7175_v35 = vrot.slane %v9555_v55, 9  ;;  %v10989_v55 = vcombine.low %v9134_v60, %v9139_v12  ;;  %v4681_v45 = vshll.u32 %v4573_v20, 16  ;;  %v4678_v60 = vor.u32 %v4677_v34, %v9587_v59  ;;  %v8342_v38 = vld [vmem:[#allocation2 + $0x68] sm:$0x1] }
 0x119   : > { %v2304_v12 = vrot.slane %v9423_v47, 5  ;;  %v4650_v29 = vsel %vm8707_vm13, %v4645_v61, %v9535_v10  ;;  %v4660_v16 = vsel %vm8707_vm13, %v4655_v23, %v4659_v28  ;;  %v4688_v30 = vrot.slane %v4686_v32, 4 }
 0x11a   : > { %v4691_v20 = vrot.slane %v4689_v0, 5  ;;  %v7176_v2 = vrot.slane %v2203_v24, 9  ;;  %v2307_v34 = vrot.slane %v8342_v38, 5  ;;  %v9602_v47 = vrot.slane %v4695_v36, 5  ;;  %v8291_v36 = vld [vmem:[#allocation2 + $0x84] sm:$0xff]  }
 0x11b   : > { %7702 = vmatmul.mubr.msk.bf16.gmra.mrb[16].mxu1 %vm1689_vm12, %v10988_v27  ;;  %v2299_v27 = vrot.slane %v2297_v62, 4  ;;  %v4669_v9 = vrot.slane %v4668_v43, 4  ;;  %v4712_v8 = vrot.slane %v4710_v6, 4  ;;  %v4715_v17 = vrot.slane %v4713_v7, 5  ;;  %v8292_v7 = vld [vmem:[#allocation2 + $0x90] sm:$0xff]  }
 0x11c   : > { %7705 = vmatprep.mubr.msk.bf16.mxu1 %vm1689_vm12, %v10989_v55  ;;  %v4701_v55 = vrot.slane %v4699_v4, 4  ;;  %v10990_v10 = vcombine.low %v9154_v13, %v9159_v14  ;;  %v4679_v28 = vrot.slane %v4678_v60, 4  ;;  %v2306_v61 = vrot.slane %v2304_v12, 4  ;;  %v2205_v60 = vld [vmem:[#allocation2 + $0x78] sm:$0xe] }
 0x11d   : > { %v9608_v23 = vrot.slane %v4719_v49, 5  ;;  %v4725_v32 = vrot.slane %v4723_v41, 4  ;;  %v10991_v0 = vcombine.low %v9204_v48, %v9215_v19  ;;  %v9618_v6 = vsel %vm8963_vm1, %v7175_v35, %v2297_v62  ;;  %v2204_v19 = vld [vmem:[#allocation2 + $0x6c] sm:$0xe]  ;;  %v8344_v49 = vld [vmem:[#allocation2 + $0x7c] sm:$0xf] }
 0x11e   : > { %v4692_v13 = vor.u32 %v4691_v20, %v4688_v30  ;;  %v4705_v14 = vshll.u32 %v4576_v42, 16  ;;  %v9622_v4 = vcombine.low %v4650_v29, %v4660_v16  ;;  %v9626_v43 = vsel %vm8963_vm1, %v2299_v27, %v2300_v3 }
 0x11f   : > { %7868 = vmatmul.mubr.msk.bf16.gmra.mrb[12].mxu0 %vm1689_vm12, %v8289_v25  ;;  %v4683_v25 = vrot.slane %v4681_v45, 5  ;;  %v9620_v45 = vld [vmem:[#allocation2 + $0x50] sm:$0x1]  ;;  %v4702_v48 = vor.u32 %v4701_v55, %v9602_v47  ;;  %v4674_v62 = vsel %vm8707_vm13, %v4669_v9, %v9587_v59  ;;  %v9634_v35 = vsel %vm8963_vm1, %v7176_v2, %v2304_v12  ;;  %v4580_v59 = vld [vmem:[#allocation2 + $0x54] sm:$0xf] }
 0x120   : > { %7871 = vmatprep.mubr.msk.bf16.mxu0 %vm1689_vm12, %v8290_v1  ;;  %v9614_v1 = vcombine.low %v4626_v53, %v4636_v54  ;;  %10992 = vst [vmem:[#allocation16_spill] sm:$0xff] %v9620_v45  ;;  %v8343_v53 = vld [vmem:[#allocation2 + $0x70] sm:$0xf]  ;;  %v4716_v24 = vor.u32 %v4715_v17, %v4712_v8  ;;  %v2318_v41 = vrot.slane %v8344_v49, 5  ;;  %v9640_v27 = vsel %vm8963_vm1, %v2306_v61, %v2307_v34  ;;  %v8345_v8 = vld [vmem:[#allocation2 + $0x74] sm:$0x1] }
 0x121   : > { %v2311_v54 = vrot.slane %v8343_v53, 5  ;;  %v4684_v3 = vsel %vm8707_vm13, %v4679_v28, %v4683_v25  ;;  %v4726_v29 = vor.u32 %v4725_v32, %v9608_v23  ;;  %v4729_v16 = vshll.u32 %v9620_v45, 16  ;;  %v9645_v2 = vld [vmem:[#allocation2 + $0x58] sm:$0xf]  ;;  %v8346_v55 = vld [vmem:[#allocation2 + $0x80] sm:$0x1] }
 0x122   : > { %v4693_v12 = vrot.slane %v4692_v13, 4  ;;  %v4707_v30 = vrot.slane %v4705_v14, 5  ;;  %v7177_v17 = vrot.slane %v2204_v19, 9  ;;  %v2314_v20 = vrot.slane %v8345_v8, 5 }
 0x123   : > { %7706 = vmatmul.mubr.msk.bf16.gmra.mrb[20].mxu1 %vm1689_vm12, %v10990_v10  ;;  %v4703_v38 = vrot.slane %v4702_v48, 4  ;;  %v2313_v42 = vrot.slane %v2311_v54, 4  ;;  %v7178_v34 = vrot.slane %v2205_v60, 9  ;;  %v2321_v9 = vrot.slane %v8346_v55, 5  ;;  %v8293_v48 = vld [vmem:[#allocation2 + $0x9c] sm:$0xff]   ;;  %v8294_v60 = vld [vmem:[#allocation2 + $0xa8] sm:$0xff]  }
 0x124   : > { %7709 = vmatprep.mubr.msk.bf16.mxu1 %vm1689_vm12, %v10991_v0  ;;  %v4717_v25 = vrot.slane %v4716_v24, 4  ;;  %v2320_v10 = vrot.slane %v2318_v41, 4  ;;  %v4734_v28 = vshrl.u32 %v4580_v59, 16  ;;  %v4737_v61 = vshll.u32 %v4580_v59, 16  ;;  %v9668_v24 = vld [vmem:[#allocation2 + $0x5c] sm:$0x1] }
 0x125   : > { %v10993_v32 = vcombine.low %v9233_v39, %v9227_v57  ;;  %v4727_v0 = vrot.slane %v4726_v29, 4  ;;  %v4743_v13 = vshll.u32 %v9645_v2, 16  ;;  %v4747_v14 = vshrl.u32 %v9645_v2, 16  ;;  %v9734_v55 = vld [vmem:[#allocation2 + $0x74] sm:$0x1] }
 0x126   : > { %v9660_v53 = vcombine.low %v4674_v62, %v4684_v3  ;;  %v9666_v39 = vsel %vm8963_vm1, %v7177_v17, %v2311_v54  ;;  %v9677_v62 = vsel %vm8963_vm1, %v2313_v42, %v2314_v20  ;;  %v9681_v49 = vsel %vm8963_vm1, %v7178_v34, %v2318_v41  ;;  %v4583_v54 = vld [vmem:[#allocation2 + $0x60] sm:$0xf]  ;;  %v9683_v3 = vld [vmem:[#allocation2 + $0x64] sm:$0xf]  ;;  %v9697_v20 = vld [vmem:[#allocation2 + $0x70] sm:$0xf] }
 0x127   : > { %7872 = vmatmul.mubr.msk.bf16.gmra.mrb[16].mxu0 %vm1689_vm12, %v8291_v36  ;;  %v4731_v36 = vrot.slane %v4729_v16, 5  ;;  %v4722_v29 = vsel %vm8707_vm13, %v4717_v25, %v9608_v23  ;;  %v4736_v16 = vrot.slane %v4734_v28, 4  ;;  %v4739_v59 = vrot.slane %v4737_v61, 5  ;;  %10995 = vst [vmem:[#allocation17_spill] sm:$0xff] %v9697_v20  ;;  %11000 = vst [vmem:[#allocation20_spill] sm:$0xff] %v9734_v55 }
 0x128   : > { %7875 = vmatprep.mubr.msk.bf16.mxu0 %vm1689_vm12, %v8292_v7  ;;  %v10994_v7 = vcombine.low %v9259_v51, %v9263_v31  ;;  %v4698_v51 = vsel %vm8707_vm13, %v4693_v12, %v9602_v47  ;;  %v4708_v31 = vsel %vm8707_vm13, %v4703_v38, %v4707_v30  ;;  %v9690_v47 = vsel %vm8963_vm1, %v2320_v10, %v2321_v9  ;;  %v4586_v12 = vld [vmem:[#allocation2 + $0x6c] sm:$0xf] }
 0x129   : > { %v4732_v30 = vsel %vm8707_vm13, %v4727_v0, %v4731_v36  ;;  %v9694_v17 = vrot.slane %v4743_v13, 5  ;;  %v4749_v41 = vrot.slane %v4747_v14, 4  ;;  %v4753_v8 = vshll.u32 %v9668_v24, 16  ;;  %v8295_v14 = vld [vmem:[#allocation2 + $0xb4] sm:$0xff]  }
 0x12a   : > { %v4758_v23 = vshrl.u32 %v4583_v54, 16  ;;  %v4761_v38 = vshll.u32 %v4583_v54, 16  ;;  %v4767_v42 = vshll.u32 %v9683_v3, 16  ;;  %v4771_v34 = vshrl.u32 %v9683_v3, 16 }
 0x12b   : > { %7710 = vmatmul.mubr.msk.bf16.gmra.mrb[24].mxu1 %vm1689_vm12, %v10993_v32  ;;  %v9707_v9 = vsel %vm1738_vm0, %v9455_v40, 0  ;;  %v4782_v25 = vshrl.u32 %v4586_v12, 16  ;;  %v4785_v10 = vshll.u32 %v4586_v12, 16  ;;  %v9709_v28 = vcombine.low %v4698_v51, %v4708_v31  ;;  %v2206_v32 = vld [vmem:[#allocation2 + $0x84] sm:$0xe] }
 0x12c   : > { %7713 = vmatprep.mubr.msk.bf16.mxu1 %vm1689_vm12, %v10994_v7  ;;  %v4791_v0 = vshll.u32 %v9697_v20, 16  ;;  %v4795_v36 = vshrl.u32 %v9697_v20, 16  ;;  %v10996_v13 = vcombine.low %v9300_v37, %v9315_v58  ;;  %v9719_v40 = vcombine.low %v4722_v29, %v4732_v30  ;;  %v9724_v51 = vld [vmem:[#allocation2 + $0x68] sm:$0x1]  ;;  %v4589_v31 = vld [vmem:[#allocation2 + $0x78] sm:$0xf] }
 0x12d   : > { %v4740_v7 = vor.u32 %v4739_v59, %v4736_v16  ;;  %10997 = vst [vmem:[#allocation18_spill] sm:$0xff] %v9724_v51  ;;  %v10998_v54 = vcombine.low %v9470_v56, %v9476_v63  ;;  %v4760_v12 = vrot.slane %v4758_v23, 4  ;;  %v4763_v37 = vrot.slane %v4761_v38, 5  ;;  %v9732_v29 = vld [vmem:[#allocation2 + $0x7c] sm:$0xf]  ;;  %v8296_v16 = vld [vmem:[#allocation2 + $0xc0] sm:$0xff]  }
 0x12e   : > { %v9730_v58 = vrot.slane %v4767_v42, 5  ;;  %10999 = vst [vmem:[#allocation19_spill] sm:$0xff] %v9732_v29  ;;  %v7179_v59 = vrot.slane %v2206_v32, 9  ;;  %v8347_v30 = vld [vmem:[#allocation2 + $0x88] sm:$0xf]  ;;  %v4787_v61 = vrot.slane %v4785_v10, 5  ;;  %v11001_v20 = vcombine.low %v9443_v21, %v9447_v22 }
 0x12f   : > { %7876 = vmatmul.mubr.msk.bf16.gmra.mrb[20].mxu0 %vm1689_vm12, %v8293_v48  ;;  %v4750_v48 = vor.u32 %v4749_v41, %v9694_v17  ;;  %v2325_v41 = vrot.slane %v8347_v30, 5  ;;  %v9736_v57 = vrot.slane %v4791_v0, 5  ;;  %v4797_v56 = vrot.slane %v4795_v36, 4  ;;  %v8348_v38 = vld [vmem:[#allocation2 + $0x8c] sm:$0x1] }
 0x130   : > { %7879 = vmatprep.mubr.msk.bf16.mxu0 %vm1689_vm12, %v8294_v60  ;;  %v9722_v60 = vrot.slane %v4753_v8, 5  ;;  %v4784_v8 = vrot.slane %v4782_v25, 4  ;;  %v4806_v63 = vshrl.u32 %v4589_v31, 16  ;;  %v9738_v23 = vrot.slane %v4740_v7, 4  ;;  %v2207_v36 = vld [vmem:[#allocation2 + $0x90] sm:$0xe] }
 0x131   : > { %v2328_v42 = vrot.slane %v8348_v38, 5  ;;  %v4819_v19 = vshrl.u32 %v9732_v29, 16  ;;  %v9743_v32 = vrot.slane %v4750_v48, 4  ;;  %v4764_v25 = vor.u32 %v4763_v37, %v4760_v12  ;;  %v2208_v48 = vld [vmem:[#allocation2 + $0x9c] sm:$0xe] }
 0x132   : > { %v4777_v0 = vshll.u32 %v9724_v51, 16  ;;  %v9750_v7 = vsel %vm8963_vm1, %v7179_v59, %v2325_v41  ;;  %v4788_v38 = vor.u32 %v4787_v61, %v4784_v8  ;;  %v4801_v45 = vshll.u32 %v9734_v55, 16  ;;  %v8350_v12 = vld [vmem:[#allocation2 + $0xa0] sm:$0xf]  ;;  %v8351_v22 = vld [vmem:[#allocation2 + $0x98] sm:$0x1] }
 0x133   : > { %7714 = vmatmul.mubr.msk.bf16.gmra.mrb[28].mxu1 %vm1689_vm12, %v10996_v13  ;;  %v4773_v13 = vrot.slane %v4771_v34, 4  ;;  %v4815_v34 = vshll.u32 %v9732_v29, 16  ;;  %v2339_v37 = vrot.slane %v8350_v12, 5  ;;  %v7180_v59 = vrot.slane %v2207_v36, 9  ;;  %v9758_v51 = vld [vmem:[#allocation2 + $0x80] sm:$0x1] }
 0x134   : > { %7719 = vmatprep.mubr.msk.bf16.mxu1 %vm1689_vm12, %v10998_v54  ;;  %v4809_v54 = vshll.u32 %v4589_v31, 16  ;;  %v8349_v31 = vld [vmem:[#allocation2 + $0x94] sm:$0xf]  ;;  %v4821_v61 = vrot.slane %v4819_v19, 4  ;;  %v11002_v8 = vcombine.low %v9489_v33, %v9495_v46  ;;  %v4779_v21 = vrot.slane %v4777_v0, 5 }
 0x135   : > { %v4774_v10 = vor.u32 %v4773_v13, %v9730_v58  ;;  %v2332_v30 = vrot.slane %v8349_v31, 5  ;;  %v4808_v13 = vrot.slane %v4806_v63, 4  ;;  %v9760_v31 = vrot.slane %v4815_v34, 5  ;;  %v8352_v19 = vld [vmem:[%s10940_s3 + $0x8] sm:$0x3] }
 0x136   : > { %v4811_v29 = vrot.slane %v4809_v54, 5  ;;  %v4765_v63 = vrot.slane %v4764_v25, 4  ;;  %v4789_v36 = vrot.slane %v4788_v38, 4  ;;  %v4803_v12 = vrot.slane %v4801_v45, 5  ;;  %v8353_v46 = vld [vmem:[#allocation2 + $0xa4] sm:$0x1] }
 0x137   : > { %7880 = vmatmul.mubr.msk.bf16.gmra.mrb[24].mxu0 %vm1689_vm12, %v8295_v14  ;;  %v4798_v14 = vor.u32 %v4797_v56, %v9736_v57  ;;  %v8297_v56 = vld [vmem:[#allocation2 + $0xcc] sm:$0xff]   ;;  %v4775_v54 = vrot.slane %v4774_v10, 4  ;;  %v7181_v55 = vrot.slane %v2208_v48, 9  ;;  %v2341_v33 = vrot.slane %v2339_v37, 4  ;;  %v2209_v0 = vld [vmem:[#allocation2 + $0xa8] sm:$0xe] }
 0x138   : > { %7883 = vmatprep.mubr.msk.bf16.mxu0 %vm1689_vm12, %v8296_v16  ;;  %v2327_v16 = vrot.slane %v2325_v41, 4  ;;  %v2334_v41 = vrot.slane %v2332_v30, 4  ;;  %v2342_v34 = vrot.slane %v8353_v46, 5  ;;  %v4746_v25 = vsel %vm8707_vm13, %v9738_v23, %v9694_v17  ;;  %v8354_v38 = vld [vmem:[#allocation2 + $0xac] sm:$0xf] }
 0x139   : > { %v4822_v10 = vor.u32 %v4821_v61, %v9760_v31  ;;  %v4825_v45 = vshll.u32 %v9758_v51, 16  ;;  %v2346_v48 = vrot.slane %v8354_v38, 5  ;;  %v4770_v17 = vsel %vm8707_vm13, %v4765_v63, %v9730_v58 }
 0x13a   : > { %v9791_v23 = vsel %vm8963_vm1, %v7180_v59, %v2332_v30  ;;  %v9806_v58 = vsel %vm8963_vm1, %v7181_v55, %v2339_v37  ;;  %v4592_v59 = vld [vmem:[#allocation2 + $0x84] sm:$0xf]  ;;  %v11003_v61 = vcombine.low %v9505_v15, %v9516_v5  ;;  %v8355_v55 = vld [vmem:[#allocation2 + $0xb0] sm:$0x1]  ;;  %vm6784_vm6 = vcmask 1044484  }
 0x13b   : > { %7720 = vmatmul.mubr.msk.bf16.vlgmr.msra.gmra.mrb[0].mxu1 %vm1689_vm12, %v11001_v20  ;;  %v2335_v20 = vrot.slane %v8351_v22, 5  ;;  %v2348_v63 = vrot.slane %v2346_v48, 4  ;;  %v2349_v37 = vrot.slane %v8355_v55, 5  ;;  %v11008_v55 = vld [vmem:[#allocation13_spill] sm:$0xff]  ;;  %vm6786_vm7 = vcmask 1045509  }
 0x13c   : > { %7752 = vmatpush3.bf16.msra.mxu1 %v9485_v52  ;;  %7723 = vmatprep.mubr.msk.bf16.mxu1 %vm1689_vm12, %v11002_v8  ;;  %v4799_v52 = vrot.slane %v4798_v14, 4  ;;  %v4812_v8 = vor.u32 %v4811_v29, %v4808_v13  ;;  %v4756_v14 = vsel %vm8707_vm13, %v9743_v32, %v9722_v60  ;;  %v9784_v29 = vsel %vm8963_vm1, %v2327_v16, %v2328_v42 }
 0x13d   : > { %8218 = vmatprep.subr.msk.bf16.mxu1 %vm1738_vm0, %v8352_v19  ;;  %v4780_v13 = vsel %vm8707_vm13, %v4775_v54, %v4779_v21  ;;  %v9799_v60 = vsel %vm8963_vm1, %v2334_v41, %v2335_v20  ;;  %v4794_v42 = vsel %vm8707_vm13, %v4789_v36, %v9736_v57  ;;  %v7182_v16 = vrot.slane %v2209_v0, 9  ;;  %v9818_v54 = vld [vmem:[#allocation2 + $0x88] sm:$0xf]  ;;  %v4595_v41 = vld [vmem:[#allocation2 + $0x90] sm:$0xf] }
 0x13e   : > { %v4804_v32 = vsel %vm8707_vm13, %v4799_v52, %v4803_v12  ;;  %v4813_v30 = vrot.slane %v4812_v8, 4  ;;  %v4823_v57 = vrot.slane %v4822_v10, 4  ;;  %v11004_v21 = vcombine.low %v9520_v44, %v9529_v26  ;;  %v9836_v26 = vld [vmem:[#allocation2 + $0x94] sm:$0xf]  ;;  %v4598_v52 = vld [vmem:[#allocation2 + $0x9c] sm:$0xf] }
 0x13f   : > { %7884 = vmatmul.mubr.msk.bf16.gmra.mrb[28].mxu0 %vm1689_vm12, %v8297_v56  ;;  %v4827_v56 = vrot.slane %v4825_v45, 5  ;;  %v9824_v22 = vcombine.low %v4746_v25, %v4756_v14  ;;  %v9828_v15 = vcombine.low %v4770_v17, %v4780_v13  ;;  %v9832_v36 = vcombine.low %v4794_v42, %v4804_v32  ;;  %v9847_v25 = vld [vmem:[#allocation2 + $0xa0] sm:$0xf]  ;;  %v9855_v0 = vld [vmem:[#allocation2 + $0x8c] sm:$0x1] }
 0x140   : > { %7889 = vmatprep.mubr.msk.bf16.mxu0 %vm1689_vm12, %v9614_v1  ;;  %v9812_v1 = vsel %vm8963_vm1, %v2341_v33, %v2342_v34  ;;  %v4830_v19 = vshrl.u32 %v4592_v59, 16  ;;  %v4833_v44 = vshll.u32 %v4592_v59, 16  ;;  %v4818_v33 = vsel %vm8707_vm13, %v4813_v30, %v9760_v31  ;;  %11006 = vst [vmem:[#allocation22_spill] sm:$0xff] %v9847_v25  ;;  %v9857_v31 = vld [vmem:[#allocation2 + $0xb4] sm:$0xe] }
 0x141   : > { %v9843_v46 = vsel %vm8963_vm1, %v7182_v16, %v2346_v48  ;;  %v4839_v34 = vshll.u32 %v9818_v54, 16  ;;  %v4843_v8 = vshrl.u32 %v9818_v54, 16  ;;  %v4828_v10 = vsel %vm8707_vm13, %v4823_v57, %v4827_v56 }
 0x142   : > { %11005 = vst [vmem:[#allocation21_spill] sm:$0xff] %v9843_v46  ;;  %v9853_v45 = vsel %vm8963_vm1, %v2348_v63, %v2349_v37  ;;  %v4854_v38 = vshrl.u32 %v4595_v41, 16  ;;  %v4857_v48 = vshll.u32 %v4595_v41, 16  ;;  %v4863_v14 = vshll.u32 %v9836_v26, 16  ;;  %v4601_v63 = vld [vmem:[#allocation2 + $0xa8] sm:$0xf] }
 0x143   : > { %7724 = vmatmul.mubr.msk.bf16.gmra.mrb[4].mxu1 %vm1689_vm12, %v11003_v61  ;;  %11007 = vst [vmem:[#allocation23_spill] sm:$0xff] %v9853_v45  ;;  %v4867_v17 = vshrl.u32 %v9836_v26, 16  ;;  %v4878_v13 = vshrl.u32 %v4598_v52, 16  ;;  %v4881_v42 = vshll.u32 %v4598_v52, 16  ;;  %v4832_v32 = vrot.slane %v4830_v19, 4  ;;  %v11012_v52 = vld [vmem:[#allocation15_spill] sm:$0xff] }
 0x144   : > { %7727 = vmatprep.mubr.msk.bf16.mxu1 %vm1689_vm12, %v11004_v21  ;;  %v4835_v30 = vrot.slane %v4833_v44, 5  ;;  %v4887_v16 = vshll.u32 %v9847_v25, 16  ;;  %v4891_v59 = vshrl.u32 %v9847_v25, 16  ;;  %v9868_v61 = vrot.slane %v4839_v34, 5  ;;  %v9880_v19 = vld [vmem:[#allocation2 + $0xac] sm:$0xf] }
 0x145   : > { %v4849_v57 = vshll.u32 %v9855_v0, 16  ;;  %v11009_v37 = vcombine.low %v9541_v18, %v11008_v55  ;;  %v4856_v21 = vrot.slane %v4854_v38, 4  ;;  %v4859_v41 = vrot.slane %v4857_v48, 5  ;;  %11010 = vst [vmem:[#allocation13_spill] sm:$0xff] %v9880_v19  ;;  %v11011_v44 = vld [vmem:[#allocation14_spill] sm:$0xff] }
 0x146   : > { %v11013_v34 = vcombine.low %v11011_v44, %v11012_v52  ;;  %v9888_v12 = vrot.slane %v4863_v14, 5  ;;  %v4869_v18 = vrot.slane %v4867_v17, 4  ;;  %v4880_v55 = vrot.slane %v4878_v13, 4  ;;  %v9899_v17 = vld [vmem:[#allocation2 + $0xb8] sm:$0xf] }
 0x147   : > { %7890 = vmatmul.mubr.msk.bf16.vlgmr.msra.gmra.mrb[0].mxu0 %vm1689_vm12, %v9622_v4  ;;  %v4845_v4 = vrot.slane %v4843_v8, 4  ;;  %v9886_v8 = vld [vmem:[#allocation2 + $0x98] sm:$0x1]  ;;  %v4893_v38 = vrot.slane %v4891_v59, 4  ;;  %v4902_v48 = vshrl.u32 %v4601_v63, 16  ;;  %v4836_v5 = vor.u32 %v4835_v30, %v4832_v32 }
 0x148   : > { %7893 = vmatprep.mubr.msk.bf16.mxu0 %vm1689_vm12, %v9660_v53  ;;  %7922 = vmatpush3.bf16.msra.mxu0 %v9707_v9  ;;  %v9876_v53 = vcombine.low %v4818_v33, %v4828_v10  ;;  %v4883_v33 = vrot.slane %v4881_v42, 5  ;;  %v9890_v10 = vld [vmem:[#allocation2 + $0xa4] sm:$0x1]  ;;  %v4905_v9 = vshll.u32 %v4601_v63, 16  ;;  %v4911_v44 = vshll.u32 %v9880_v19, 16 }
 0x149   : > { %v4846_v20 = vor.u32 %v4845_v4, %v9868_v61  ;;  %v4915_v52 = vshrl.u32 %v9880_v19, 16  ;;  %v9897_v14 = vrot.slane %v4849_v57, 5  ;;  %v9902_v42 = vld [vmem:[#allocation2 + $0xbc] sm:$0x1]  ;;  %v4873_v59 = vshll.u32 %v9886_v8, 16 }
 0x14a   : > { %v4604_v32 = vld [vmem:[#allocation2 + $0xb4] sm:$0xf]  ;;  %v4860_v30 = vor.u32 %v4859_v41, %v4856_v21  ;;  %v4870_v4 = vor.u32 %v4869_v18, %v9888_v12  ;;  %v4884_v63 = vor.u32 %v4883_v33, %v4880_v55  ;;  %v4897_v57 = vshll.u32 %v9890_v10, 16 }
 0x14b   : > { %7728 = vmatmul.mubr.msk.bf16.gmra.mrb[8].mxu1 %vm1689_vm12, %v11009_v37  ;;  %v9892_v37 = vrot.slane %v4887_v16, 5  ;;  %v4904_v13 = vrot.slane %v4902_v48, 4  ;;  %v4907_v19 = vrot.slane %v4905_v9, 5  ;;  %v9913_v16 = vld [vmem:[#allocation2 + $0xb8] sm:$0xf]  ;;  %v9917_v46 = vrot.slane %v4911_v44, 5 }
 0x14c   : > { %7731 = vmatprep.mubr.msk.bf16.mxu1 %vm1689_vm12, %v11013_v34  ;;  %v546_v34 = vld [vmem:[#allocation2 + $0xd4] sm:$0x1]  ;;  %v4926_v21 = vshrl.u32 %v4604_v32, 16  ;;  %v4929_v41 = vshll.u32 %v4604_v32, 16  ;;  %v11015_v18 = vcombine.low %v9618_v6, %v9626_v43  ;;  %v4847_v55 = vrot.slane %v4846_v20, 4 }
 0x14d   : > { %v4894_v56 = vor.u32 %v4893_v38, %v9892_v37  ;;  %v547_v45 = vsel %vm8575_vm5, 0, %v546_v34  ;;  %v11016_v9 = vrot.slane %v9899_v17, 5  ;;  %v4875_v38 = vrot.slane %v4873_v59, 5  ;;  %v9925_v48 = vld [vmem:[#allocation2 + $0xb0] sm:$0x1] }
 0x14e   : > { %548 = vst [vmem:[#allocation2 + $0xd4] sm:$0x1] %v547_v45  ;;  %v11017_v25 = vcombine.low %v9634_v35, %v9640_v27  ;;  %v4861_v44 = vrot.slane %v4860_v30, 4  ;;  %v4871_v45 = vrot.slane %v4870_v4, 4  ;;  %v4939_v6 = vshrl.u32 %v9913_v16, 16 }
 0x14f   : > { %7894 = vmatmul.mubr.msk.bf16.gmra.mrb[4].mxu0 %vm1689_vm12, %v9709_v28  ;;  %v4917_v28 = vrot.slane %v4915_v52, 4  ;;  %v2355_v33 = vrot.slane %v11016_v9, 4  ;;  %v4935_v52 = vshll.u32 %v9913_v16, 16  ;;  %v4607_v43 = vld [vmem:[#allocation2 + $0xc0] sm:$0xf]  ;;  %v4895_v20 = vrot.slane %v4894_v56, 4 }
 0x150   : > { %7897 = vmatprep.mubr.msk.bf16.mxu0 %vm1689_vm12, %v9719_v40  ;;  %v4837_v40 = vrot.slane %v4836_v5, 4  ;;  %v4885_v5 = vrot.slane %v4884_v63, 4  ;;  %v4899_v34 = vrot.slane %v4897_v57, 5  ;;  %v4908_v32 = vor.u32 %v4907_v19, %v4904_v13  ;;  %v9935_v9 = vld [vmem:[#allocation2 + $0xbc] sm:$0x1] }
 0x151   : > { %v4918_v59 = vor.u32 %v4917_v28, %v9917_v46  ;;  %v4928_v35 = vrot.slane %v4926_v21, 4  ;;  %v4931_v27 = vrot.slane %v4929_v41, 5  ;;  %v4852_v4 = vsel %vm8707_vm13, %v4847_v55, %v9897_v14 }
 0x152   : > { %v4842_v30 = vsel %vm8707_vm13, %v4837_v40, %v9868_v61  ;;  %v4950_v63 = vshrl.u32 %v4607_v43, 16  ;;  %v4953_v56 = vshll.u32 %v4607_v43, 16  ;;  %v4866_v19 = vsel %vm8707_vm13, %v4861_v44, %v9888_v12  ;;  %v9952_v61 = vld [vmem:[#allocation2 + $0xc4] sm:$0xf] }
 0x153   : > { %7732 = vmatmul.mubr.msk.bf16.gmra.mrb[12].mxu1 %vm1689_vm12, %v11015_v18  ;;  %v4921_v18 = vshll.u32 %v9925_v48, 16  ;;  %v4876_v13 = vsel %vm8707_vm13, %v4871_v45, %v4875_v38  ;;  %v9950_v57 = vrot.slane %v4935_v52, 5  ;;  %v4941_v28 = vrot.slane %v4939_v6, 4 }
 0x154   : > { %7735 = vmatprep.mubr.msk.bf16.mxu1 %vm1689_vm12, %v11017_v25  ;;  %v4890_v14 = vsel %vm8707_vm13, %v4885_v5, %v9892_v37  ;;  %v9961_v21 = vrot.slane %v4908_v32, 4  ;;  %v4945_v12 = vshll.u32 %v9935_v9, 16  ;;  %v9964_v40 = vrot.slane %v4918_v59, 4  ;;  %v11018_v25 = vld [vmem:[#allocation10_spill] sm:$0xff] }
 0x155   : > { %v622_v41 = vld [vmem:[#allocation2 + $0xd4] sm:$0x1]  ;;  %v9966_v55 = vrot.slane %v4921_v18, 5  ;;  %v4932_v38 = vor.u32 %v4931_v27, %v4928_v35  ;;  %v11019_v44 = vrot.slane %v11018_v25, 4  ;;  %v11021_v37 = vcombine.low %v9666_v39, %v9677_v62 }
 0x156   : > { %v9976_v52 = vrot.slane %v4950_v63, 4  ;;  %v9978_v6 = vrot.slane %v4953_v56, 5  ;;  %v4959_v43 = vshll.u32 %v9952_v61, 16  ;;  %v4963_v5 = vshrl.u32 %v9952_v61, 16 }
 0x157   : > { %7898 = vmatmul.mubr.msk.bf16.gmra.mrb[8].mxu0 %vm1689_vm12, %v9824_v22  ;;  %v4900_v22 = vsel %vm8707_vm13, %v4895_v20, %v4899_v34  ;;  %v623_v45 = vsel %vm8568_vm3, %v11019_v44, %v622_v41  ;;  %v5296_v20 = vld [vmem:[#allocation2 + $0x54] sm:$0xe]  ;;  %v11022_v34 = vcombine.low %v9681_v49, %v9690_v47  ;;  %v9986_v32 = vcombine.low %v4842_v30, %v4852_v4  ;;  %v10003_v47 = vld [vmem:[#allocation2 + $0xc8] sm:$0x1]  ;;  %v10013_v4 = vld [vmem:[#allocation2 + $0xcc] sm:$0xf] }
 0x158   : > { %7901 = vmatprep.mubr.msk.bf16.mxu0 %vm1689_vm12, %v9828_v15  ;;  %624 = vst [vmem:[#allocation2 + $0xd4] sm:$0x1] %v623_v45  ;;  %v11023_v39 = vrot.slane %v9899_v17, 5  ;;  %v11024_v62 = vrot.slane %v9857_v31, 9  ;;  %v11025_v18 = vrot.slane %v9902_v42, 5  ;;  %v4942_v49 = vor.u32 %v4941_v28, %v9950_v57  ;;  %v11030_v15 = vld [vmem:[#allocation20_spill] sm:$0xff] }
 0x159   : > { %v7376_v27 = vcombine.low %v4866_v19, %v4876_v13  ;;  %v10005_v30 = vcombine.low %v4890_v14, %v4900_v22  ;;  %v4914_v31 = vsel %vm8707_vm13, %v9961_v21, %v9917_v46  ;;  %v10011_v17 = vrot.slane %v4945_v12, 5  ;;  %v10015_v42 = vld [vmem:[#allocation2 + $0xd0] sm:$0xf]  ;;  %v5297_v13 = vld [vmem:[#allocation2 + $0x60] sm:$0xe] }
 0x15a   : > { %v9994_v59 = vsel %vm8963_vm1, %v11024_v62, %v11023_v39  ;;  %v10000_v35 = vsel %vm8963_vm1, %v2355_v33, %v11025_v18  ;;  %v4924_v33 = vsel %vm8707_vm13, %v9964_v40, %v9966_v55  ;;  %v10021_v63 = vrot.slane %v4932_v38, 4  ;;  %v5298_v41 = vld [vmem:[#allocation2 + $0x6c] sm:$0xe]  ;;  %v5299_v45 = vld [vmem:[#allocation2 + $0x78] sm:$0xe] }
 0x15b   : > { %7736 = vmatmul.mubr.msk.bf16.gmra.mrb[16].mxu1 %vm1689_vm12, %v11021_v37  ;;  %v7403_v56 = vrot.slane %v5296_v20, 9  ;;  %v5392_v19 = vrot.slane %v9645_v2, 5  ;;  %v4956_v28 = vor.u32 %v9978_v6, %v9976_v52  ;;  %v10026_v14 = vrot.slane %v4959_v43, 5  ;;  %v5300_v20 = vld [vmem:[#allocation2 + $0x84] sm:$0xe] }
 0x15c   : > { %7739 = vmatprep.mubr.msk.bf16.mxu1 %vm1689_vm12, %v11022_v34  ;;  %v10028_v22 = vrot.slane %v4963_v5, 4  ;;  %v10033_v25 = vrot.slane %v4942_v49, 4  ;;  %v5395_v44 = vrot.slane %v9668_v24, 5  ;;  %v4974_v37 = vshrl.u32 %v10013_v4, 16  ;;  %v11026_v24 = vld [vmem:[#allocation18_spill] sm:$0xff] }
 0x15d   : > { %v10037_v38 = vsel %vm8963_vm1, %v7403_v56, %v5392_v19  ;;  %v5394_v2 = vrot.slane %v5392_v19, 4  ;;  %v4977_v43 = vshll.u32 %v10013_v4, 16  ;;  %v7404_v5 = vrot.slane %v5297_v13, 9  ;;  %v5301_v12 = vld [vmem:[#allocation2 + $0x90] sm:$0xe] }
 0x15e   : > { %v4983_v39 = vshll.u32 %v10015_v42, 16  ;;  %v5402_v18 = vrot.slane %v11026_v24, 5  ;;  %v7405_v49 = vrot.slane %v5298_v41, 9  ;;  %v11028_v13 = vcombine.low %v9791_v23, %v9799_v60  ;;  %v3037_v21 = vld [vmem:[#allocation2 + $0x78] sm:$0xf] }
 0x15f   : > { %7902 = vmatmul.mubr.msk.bf16.gmra.mrb[12].mxu0 %vm1689_vm12, %v9832_v36  ;;  %v5399_v36 = vrot.slane %v9683_v3, 5  ;;  %v639_v34 = vld [vmem:[#allocation2 + $0xd4] sm:$0x1]  ;;  %v10048_v62 = vsel %vm8963_vm1, %v5394_v2, %v5395_v44  ;;  %v4987_v3 = vshrl.u32 %v10015_v42, 16  ;;  %v5409_v2 = vrot.slane %v11030_v15, 5 }
 0x160   : > { %7905 = vmatprep.mubr.msk.bf16.mxu0 %vm1689_vm12, %v9876_v53  ;;  %v11027_v53 = vcombine.low %v9750_v7, %v9784_v29  ;;  %v640_v4 = vsel %vm8568_vm3, 0, %v639_v34  ;;  %v11029_v29 = vld [vmem:[#allocation17_spill] sm:$0xff]  ;;  %v7406_v44 = vrot.slane %v5299_v45, 9  ;;  %v11031_v34 = vld [vmem:[#allocation19_spill] sm:$0xff]  ;;  %v7407_v56 = vrot.slane %v5300_v20, 9 }
 0x161   : > { %v10062_v19 = vsel %vm8963_vm1, %v7404_v5, %v5399_v36  ;;  %641 = vst [vmem:[#allocation2 + $0xd4] sm:$0x1] %v640_v4  ;;  %v5401_v7 = vrot.slane %v5399_v36, 4  ;;  %v5406_v41 = vrot.slane %v11029_v29, 5  ;;  %v5413_v24 = vrot.slane %v11031_v34, 5  ;;  %v11034_v34 = vld [vmem:[#allocation23_spill] sm:$0xff] }
 0x162   : > { %v5420_v5 = vrot.slane %v9818_v54, 5  ;;  %v5423_v4 = vrot.slane %v9855_v0, 5  ;;  %v11032_v15 = vcombine.low %v9806_v58, %v9812_v1  ;;  %v11033_v1 = vld [vmem:[#allocation21_spill] sm:$0xff]  ;;  %v4979_v40 = vrot.slane %v4977_v43, 5 }
 0x163   : > { %7740 = vmatmul.mubr.msk.bf16.gmra.mrb[20].mxu1 %vm1689_vm12, %v11027_v53  ;;  %v5416_v53 = vrot.slane %v9758_v51, 5  ;;  %v10075_v23 = vsel %vm8963_vm1, %v5401_v7, %v5402_v18  ;;  %v10079_v60 = vsel %vm8963_vm1, %v7405_v49, %v5406_v41  ;;  %v5408_v36 = vrot.slane %v5406_v41, 4 }
 0x164   : > { %7743 = vmatprep.mubr.msk.bf16.mxu1 %vm1689_vm12, %v11028_v13  ;;  %v7421_v45 = vcombine.low %v10062_v19, %v10075_v23  ;;  %v10086_v51 = vsel %vm8963_vm1, %v7406_v44, %v5413_v24  ;;  %v5415_v54 = vrot.slane %v5413_v24, 4  ;;  %v10090_v20 = vsel %vm8963_vm1, %v7407_v56, %v5420_v5  ;;  %v3040_v19 = vld [vmem:[#allocation2 + $0x84] sm:$0xf]  ;;  %v8368_v23 = vld [vmem:[#allocation2 + $0x74] sm:$0x1] }
 0x165   : > { %v10096_v18 = vsel %vm8963_vm1, %v5408_v36, %v5409_v2  ;;  %v5422_v0 = vrot.slane %v5420_v5, 4  ;;  %v7408_v49 = vrot.slane %v5301_v12, 9  ;;  %v5427_v13 = vrot.slane %v9836_v26, 5  ;;  %v5302_v12 = vld [vmem:[#allocation2 + $0x9c] sm:$0xe] }
 0x166   : > { %v4966_v7 = vor.u32 %v10028_v22, %v10026_v14  ;;  %v7422_v56 = vcombine.low %v10079_v60, %v10096_v18  ;;  %v10106_v29 = vsel %vm8963_vm1, %v5415_v54, %v5416_v53  ;;  %v4957_v2 = vrot.slane %v4956_v28, 4  ;;  %v11037_v5 = vld [vmem:[#allocation22_spill] sm:$0xff] }
 0x167   : > { %7906 = vmatmul.mubr.msk.bf16.gmra.mrb[16].mxu0 %vm1689_vm12, %v9986_v32  ;;  %v5430_v32 = vrot.slane %v9886_v8, 5  ;;  %v7423_v41 = vcombine.low %v10086_v51, %v10106_v29  ;;  %v10113_v26 = vsel %vm8963_vm1, %v5422_v0, %v5423_v4  ;;  %v5429_v22 = vrot.slane %v5427_v13, 4  ;;  %v5303_v0 = vld [vmem:[#allocation2 + $0xa8] sm:$0xe] }
 0x168   : > { %7909 = vmatprep.mubr.msk.bf16.mxu0 %vm1689_vm12, %v7376_v27  ;;  %v10117_v27 = vsel %vm8963_vm1, %v7408_v49, %v5427_v13  ;;  %v7378_v8 = vcombine.low %v4914_v31, %v4924_v33  ;;  %v4976_v44 = vrot.slane %v4974_v37, 4  ;;  %v7424_v58 = vcombine.low %v10090_v20, %v10113_v26  ;;  %v8298_v49 = vld [vmem:[#allocation2 + $0xc] sm:$0xff]  }
 0x169   : > { %v11035_v24 = vcombine.low %v11033_v1, %v11034_v34  ;;  %v10142_v55 = vrot.slane %v4983_v39, 5  ;;  %v4989_v53 = vrot.slane %v4987_v3, 4  ;;  %v10146_v46 = vsel %vm8963_vm1, %v5429_v22, %v5430_v32  ;;  %v10162_v3 = vld [vmem:[#allocation2 + $0xd4] sm:$0x1]  ;;  %v8358_v32 = vld [vmem:[#allocation2 + $0x1c] sm:$0xf] }
 0x16a   : > { %v4967_v52 = vrot.slane %v4966_v7, 4  ;;  %v11036_v6 = vshll.u32 %v10003_v47, 16  ;;  %v7425_v33 = vcombine.low %v10117_v27, %v10146_v46  ;;  %v7409_v28 = vrot.slane %v5302_v12, 9  ;;  %v11038_v12 = vld [vmem:[#allocation12_spill] sm:$0xff]  ;;  %v5291_v1 = vld [vmem:[#allocation2 + $0x18] sm:$0xe] }
 0x16b   : > { %7744 = vmatmul.mubr.msk.bf16.gmra.mrb[24].mxu1 %vm1689_vm12, %v11032_v15  ;;  %v7200_v37 = vcombine.low %v9994_v59, %v10000_v35  ;;  %v4938_v43 = vsel %vm8707_vm13, %v10021_v63, %v9950_v57  ;;  %v4948_v39 = vsel %vm8707_vm13, %v10033_v25, %v10011_v17  ;;  %v5434_v36 = vrot.slane %v11037_v5, 5  ;;  %v11039_v15 = vld [vmem:[#allocation11_spill] sm:$0xff] }
 0x16c   : > { %7747 = vmatprep.mubr.msk.bf16.mxu1 %vm1689_vm12, %v11035_v24  ;;  %v4971_v31 = vrot.slane %v11036_v6, 5  ;;  %v4962_v4 = vsel %vm8707_vm13, %v4957_v2, %v10026_v14  ;;  %v5437_v59 = vrot.slane %v9890_v10, 5  ;;  %v3275_v35 = vshrl.u32 %v3037_v21, 16 }
 0x16d   : > { %v3278_v54 = vshll.u32 %v3037_v21, 16  ;;  %v4980_v57 = vor.u32 %v4979_v40, %v4976_v44  ;;  %v4990_v17 = vor.u32 %v4989_v53, %v10142_v55  ;;  %v10174_v63 = vsel %vm8963_vm1, %v7409_v28, %v5434_v36  ;;  %v11040_v40 = vld [vmem:[#allocation13_spill] sm:$0xff] }
 0x16e   : > { %v5436_v25 = vrot.slane %v5434_v36, 4  ;;  %v4972_v10 = vsel %vm8707_vm13, %v4967_v52, %v4971_v31  ;;  %v4993_v14 = vshll.u32 %v10162_v3, 16  ;;  %v3277_v13 = vrot.slane %v3275_v35, 4  ;;  %v5304_v28 = vld [vmem:[#allocation2 + $0xb4] sm:$0xe] }
 0x16f   : > { %7910 = vmatmul.mubr.msk.bf16.gmra.mrb[20].mxu0 %vm1689_vm12, %v10005_v30  ;;  %v3280_v7 = vrot.slane %v3278_v54, 5  ;;  %v5357_v22 = vrot.slane %v8358_v32, 5  ;;  %v3297_v2 = vsel %vm8707_vm13, %v11039_v15, %v11038_v12  ;;  %v7410_v44 = vrot.slane %v5303_v0, 9  ;;  %v8359_v35 = vld [vmem:[#allocation2 + $0x20] sm:$0x1]  ;;  %v8299_v0 = vld [vmem:[#allocation2 + $0x18] sm:$0xff]  }
 0x170   : > { %7913 = vmatprep.mubr.msk.bf16.mxu0 %vm1689_vm12, %v7378_v8  ;;  %v10182_v30 = vsel %vm8963_vm1, %v5436_v25, %v5437_v59  ;;  %v7379_v8 = vcombine.low %v4938_v43, %v4948_v39  ;;  %v5441_v53 = vrot.slane %v11040_v40, 5  ;;  %v7380_v21 = vcombine.low %v4962_v4, %v4972_v10  ;;  %v11041_v25 = vld [vmem:[#allocation9_spill] sm:$0xff]  ;;  %v5292_v10 = vld [vmem:[#allocation2 + $0x24] sm:$0xe] }
 0x171   : > { %v7426_v34 = vcombine.low %v10174_v63, %v10182_v30  ;;  %v3281_v24 = vor.u32 %v3280_v7, %v3277_v13  ;;  %v4981_v52 = vrot.slane %v4980_v57, 4  ;;  %v4991_v6 = vrot.slane %v4990_v17, 4  ;;  %v8300_v57 = vld [vmem:[#allocation2 + $0x24] sm:$0xff]   ;;  %v5293_v15 = vld [vmem:[#allocation2 + $0x30] sm:$0xe] }
 0x172   : > { %v5444_v31 = vrot.slane %v9925_v48, 5  ;;  %v4995_v5 = vrot.slane %v4993_v14, 5  ;;  %v5443_v43 = vrot.slane %v5441_v53, 4  ;;  %v7398_v39 = vrot.slane %v5291_v1, 9  ;;  %v8360_v14 = vld [vmem:[#allocation2 + $0x28] sm:$0xf] }
 0x173   : > { %7748 = vmatmul.mubr.msk.bf16.gmra.mrb[28].mxu1 %vm1689_vm12, %v7200_v37  ;;  %v3282_v36 = vrot.slane %v3281_v24, 4  ;;  %v10196_v37 = vsel %vm8963_vm1, %v7410_v44, %v5441_v53  ;;  %v5359_v59 = vrot.slane %v5357_v22, 4  ;;  %v5360_v54 = vrot.slane %v8359_v35, 5  ;;  %v8361_v44 = vld [vmem:[#allocation2 + $0x34] sm:$0xf] }
 0x174   : > { %7753 = vmatprep.mubr.msk.bf16.mxu1 %vm1689_vm12, %v8298_v49  ;;  %v10203_v48 = vsel %vm8963_vm1, %v5443_v43, %v5444_v31  ;;  %v7411_v49 = vrot.slane %v5304_v28, 9  ;;  %v4986_v17 = vsel %vm8707_vm13, %v4981_v52, %v10142_v55  ;;  %v5364_v13 = vrot.slane %v8360_v14, 5  ;;  %v5305_v52 = vld [vmem:[#allocation2 + $0xc0] sm:$0xe]  ;;  %v8362_v31 = vld [vmem:[#allocation2 + $0x2c] sm:$0x1] }
 0x175   : > { %v3287_v4 = vsel %vm8707_vm13, %v3282_v36, %v11041_v25  ;;  %v7427_v32 = vcombine.low %v10196_v37, %v10203_v48  ;;  %v4996_v12 = vsel %vm8707_vm13, %v4991_v6, %v4995_v5  ;;  %v5448_v1 = vrot.slane %v9913_v16, 5  ;;  %v11042_v6 = vld [vmem:[#allocation6_spill] sm:$0xff]  ;;  %v8301_v25 = vld [vmem:[#allocation2 + $0x30] sm:$0xff]  }
 0x176   : > { %v10209_v7 = vcombine.low %v3287_v4, %v3297_v2  ;;  %v5451_v55 = vrot.slane %v9935_v9, 5  ;;  %v5358_v24 = vsel %vm8963_vm1, %v7398_v39, %v5357_v22  ;;  %v5361_v2 = vsel %vm8963_vm1, %v5359_v59, %v5360_v54  ;;  %v8363_v43 = vld [vmem:[#allocation2 + $0x38] sm:$0x1]  ;;  %v3052_v30 = vld [vmem:[#allocation2 + $0xb4] sm:$0xf] }
 0x177   : > { %7914 = vmatmul.mubr.msk.bf16.gmra.mrb[24].mxu0 %vm1689_vm12, %v7379_v8  ;;  %v5371_v8 = vrot.slane %v8361_v44, 5  ;;  %v7399_v40 = vrot.slane %v5292_v10, 9  ;;  %v10225_v53 = vsel %vm8963_vm1, %v7411_v49, %v5448_v1  ;;  %v7381_v16 = vcombine.low %v4986_v17, %v4996_v12  ;;  %v8302_v49 = vld [vmem:[#allocation2 + $0x3c] sm:$0xff]  }
 0x178   : > { %7917 = vmatprep.mubr.msk.bf16.mxu0 %vm1689_vm12, %v7380_v21  ;;  %v5450_v21 = vrot.slane %v5448_v1, 4  ;;  %v5366_v9 = vrot.slane %v5364_v13, 4  ;;  %v5367_v22 = vrot.slane %v8362_v31, 5  ;;  %v7400_v28 = vrot.slane %v5293_v15, 9  ;;  %v5294_v12 = vld [vmem:[#allocation2 + $0x3c] sm:$0xe] }
 0x179   : > { %v7415_v5 = vcombine.low %v5358_v24, %v5361_v2  ;;  %v5373_v36 = vrot.slane %v5371_v8, 4  ;;  %v5374_v39 = vrot.slane %v8363_v43, 5  ;;  %v7412_v54 = vrot.slane %v5305_v52, 9  ;;  %v8364_v15 = vld [vmem:[#allocation2 + $0x40] sm:$0xf]  ;;  %v11043_v43 = vld [vmem:[#allocation16_spill] sm:$0xff] }
 0x17a   : > { %v10231_v59 = vsel %vm8963_vm1, %v5450_v21, %v5451_v55  ;;  %v5458_v4 = vrot.slane %v10003_v47, 5  ;;  %v5368_v14 = vsel %vm8963_vm1, %v5366_v9, %v5367_v22  ;;  %v5378_v44 = vrot.slane %v8364_v15, 5  ;;  %v5306_v24 = vld [vmem:[#allocation2 + $0xcc] sm:$0xe]  ;;  %v5295_v2 = vld [vmem:[#allocation2 + $0x48] sm:$0xe] }
 0x17b   : > { %7754 = vmatmul.mubr.msk.bf16.vlgmr.msra.gmra.mrb[0].mxu1 %vm1689_vm12, %v8299_v0  ;;  %v7428_v35 = vcombine.low %v10225_v53, %v10231_v59  ;;  %v5455_v0 = vrot.slane %v9952_v61, 5  ;;  %v5372_v61 = vsel %vm8963_vm1, %v7400_v28, %v5371_v8  ;;  %v5375_v47 = vsel %vm8963_vm1, %v5373_v36, %v5374_v39  ;;  %v8306_v15 = vld [vmem:[#allocation2 + $0x6c] sm:$0xff]  }
 0x17c   : > { %7956 = vmatpush3.bf16.msra.mxu1 %v11042_v6  ;;  %7757 = vmatprep.mubr.msk.bf16.mxu1 %vm1689_vm12, %v8300_v57  ;;  %v5365_v57 = vsel %vm8963_vm1, %v7399_v40, %v5364_v13  ;;  %v8365_v13 = vld [vmem:[#allocation2 + $0x4c] sm:$0xf]  ;;  %v7417_v21 = vcombine.low %v5372_v61, %v5375_v47  ;;  %v7401_v52 = vrot.slane %v5294_v12, 9  ;;  %v8366_v6 = vld [vmem:[#allocation2 + $0x44] sm:$0x1]  ;;  %v5380_v9 = vrot.slane %v5378_v44, 4 }
 0x17d   : > { %v10242_v17 = vsel %vm8963_vm1, %v7412_v54, %v5455_v0  ;;  %v5457_v10 = vrot.slane %v5455_v0, 4  ;;  %v5385_v1 = vrot.slane %v8365_v13, 5  ;;  %v7416_v8 = vcombine.low %v5365_v57, %v5368_v14  ;;  %v8303_v54 = vld [vmem:[#allocation2 + $0x48] sm:$0xff]   ;;  %v8305_v12 = vld [vmem:[#allocation2 + $0x60] sm:$0xff]  }
 0x17e   : > { %v7413_v31 = vrot.slane %v5306_v24, 9  ;;  %v5462_v22 = vrot.slane %v10015_v42, 5  ;;  %v5465_v28 = vrot.slane %v10162_v3, 5  ;;  %v5388_v39 = vrot.slane %v11043_v43, 5  ;;  %v8369_v43 = vld [vmem:[#allocation2 + $0x88] sm:$0xf] }
 0x17f   : > { %7918 = vmatmul.mubr.msk.bf16.gmra.mrb[28].mxu0 %vm1689_vm12, %v7381_v16  ;;  %v10253_v55 = vsel %vm8963_vm1, %v5457_v10, %v5458_v4  ;;  %v5381_v16 = vrot.slane %v8366_v6, 5  ;;  %v5387_v36 = vrot.slane %v5385_v1, 4  ;;  %v8304_v4 = vld [vmem:[#allocation2 + $0x54] sm:$0xff]   ;;  %v5379_v42 = vsel %vm8963_vm1, %v7401_v52, %v5378_v44  ;;  %v8308_v44 = vld [vmem:[#allocation2 + $0x84] sm:$0xff]  }
 0x180   : > { %7923 = vmatprep.mubr.msk.bf16.mxu0 %vm1689_vm12, %v7415_v5  ;;  %v7429_v40 = vcombine.low %v10242_v17, %v10253_v55  ;;  %v7402_v5 = vrot.slane %v5295_v2, 9  ;;  %v10264_v0 = vsel %vm8963_vm1, %v7413_v31, %v5462_v22  ;;  %v11044_v13 = vcombine.low %v10037_v38, %v10048_v62  ;;  %v8309_v6 = vld [vmem:[#allocation2 + $0x90] sm:$0xff]   ;;  %v8310_v31 = vld [vmem:[#allocation2 + $0x9c] sm:$0xff]  }
 0x181   : > { %v5382_v3 = vsel %vm8963_vm1, %v5380_v9, %v5381_v16  ;;  %v5389_v10 = vsel %vm8963_vm1, %v5387_v36, %v5388_v39  ;;  %v3302_v36 = vshll.u32 %v3040_v19, 16  ;;  %v3308_v60 = vshll.u32 %v8369_v43, 16  ;;  %v8311_v39 = vld [vmem:[#allocation2 + $0xa8] sm:$0xff]   ;;  %v8377_v55 = vld [vmem:[#allocation2 + $0xb0] sm:$0x1] }
 0x182   : > { %v5386_v57 = vsel %vm8963_vm1, %v7402_v5, %v5385_v1  ;;  %v7418_v61 = vcombine.low %v5379_v42, %v5382_v3  ;;  %v3034_v1 = vld [vmem:[#allocation2 + $0x6c] sm:$0xf]  ;;  %v3299_v5 = vshrl.u32 %v3040_v19, 16  ;;  %v3312_v18 = vshrl.u32 %v8369_v43, 16  ;;  %v8312_v42 = vld [vmem:[#allocation2 + $0xb4] sm:$0xff]  }
 0x183   : > { %7758 = vmatmul.mubr.msk.bf16.gmra.mrb[4].mxu1 %vm1689_vm12, %v8301_v25  ;;  %v5464_v25 = vrot.slane %v5462_v22, 4  ;;  %v7419_v47 = vcombine.low %v5386_v57, %v5389_v10  ;;  %v3251_v24 = vshrl.u32 %v3034_v1, 16  ;;  %v3254_v2 = vshll.u32 %v3034_v1, 16 }
 0x184   : > { %7761 = vmatprep.mubr.msk.bf16.mxu1 %vm1689_vm12, %v8302_v49  ;;  %v3301_v29 = vrot.slane %v3299_v5, 4  ;;  %v10312_v3 = vrot.slane %v3308_v60, 5  ;;  %v3314_v57 = vrot.slane %v3312_v18, 4  ;;  %vm5832_vm0 = vcmask 64512  }
 0x185   : > { %v10274_v49 = vsel %vm8963_vm1, %v5464_v25, %v5465_v28  ;;  %v3253_v16 = vrot.slane %v3251_v24, 4  ;;  %v3256_v38 = vrot.slane %v3254_v2, 5  ;;  %v8372_v24 = vld [vmem:[#allocation2 + $0x8c] sm:$0x1]  ;;  %vm6778_vm3 = vcmask 1041409  }
 0x186   : > { %v7430_v14 = vcombine.low %v10264_v0, %v10274_v49  ;;  %v3318_v27 = vshll.u32 %v8372_v24, 16  ;;  %vm6782_vm5 = vcmask 1043459   ;;  %vm6788_vm8 = vcmask 1046534  }
 0x187   : > { %7924 = vmatmul.mubr.msk.bf16.vlgmr.msra.gmra.mrb[0].mxu0 %vm1689_vm12, %v7416_v8  ;;  %v8367_v8 = vld [vmem:[#allocation2 + $0x70] sm:$0xf]  ;;  %v3257_v22 = vor.u32 %v3256_v38, %v3253_v16  ;;  %vm6790_vm9 = vcmask 1047559  }
 0x188   : > { %7927 = vmatprep.mubr.msk.bf16.mxu0 %vm1689_vm12, %v7417_v21  ;;  %v3260_v21 = vshll.u32 %v8367_v8, 16  ;;  %v3264_v52 = vshrl.u32 %v8367_v8, 16  ;;  %v3320_v19 = vrot.slane %v3318_v27, 5  ;;  %v3055_v27 = vld [vmem:[#allocation2 + $0xc0] sm:$0xf] }
 0x189   : > { %v3258_v25 = vrot.slane %v3257_v22, 4 }
 0x18a   : > { %v3262_v62 = vrot.slane %v3260_v21, 5  ;;  %v3266_v9 = vrot.slane %v3264_v52, 4 }
 0x18b   : > { %7762 = vmatmul.mubr.msk.bf16.gmra.mrb[8].mxu1 %vm1689_vm12, %v8303_v54 }
 0x18c   : > { %7765 = vmatprep.mubr.msk.bf16.mxu1 %vm1689_vm12, %v8304_v4  ;;  %v3267_v28 = vor.u32 %v3266_v9, %v3262_v62  ;;  %v3046_v4 = vld [vmem:[#allocation2 + $0x9c] sm:$0xf]  ;;  %v3263_v26 = vsel %vm8707_vm13, %v3258_v25, %v3262_v62  ;;  %v8313_v9 = vld [vmem:[#allocation2 + $0xc0] sm:$0xff]  }
 0x18e   : > { %v3268_v51 = vrot.slane %v3267_v28, 4  ;;  %v8373_v28 = vld [vmem:[#allocation2 + $0x98] sm:$0x1] }
 0x18f   : > { %7928 = vmatmul.mubr.msk.bf16.gmra.mrb[4].mxu0 %vm1689_vm12, %v7418_v61  ;;  %v3342_v5 = vshll.u32 %v8373_v28, 16 }
 0x190   : > { %7931 = vmatprep.mubr.msk.bf16.mxu0 %vm1689_vm12, %v7419_v47  ;;  %v8370_v47 = vld [vmem:[#allocation2 + $0x94] sm:$0xf] }
 0x193   : > { %7766 = vmatmul.mubr.msk.bf16.gmra.mrb[12].mxu1 %vm1689_vm12, %v8305_v12  ;;  %v3332_v12 = vshll.u32 %v8370_v47, 16 }
 0x194   : > { %7769 = vmatprep.mubr.msk.bf16.mxu1 %vm1689_vm12, %v8306_v15  ;;  %v3336_v15 = vshrl.u32 %v8370_v47, 16 }
 0x195   : > { %v10325_v21 = vrot.slane %v3332_v12, 5 }
 0x196   : > { %v3338_v52 = vrot.slane %v3336_v15, 4 }
 0x197   : > { %7932 = vmatmul.mubr.msk.bf16.gmra.mrb[8].mxu0 %vm1689_vm12, %v11044_v13  ;;  %v8371_v13 = vld [vmem:[#allocation2 + $0xa0] sm:$0xf] }
 0x198   : > { %7935 = vmatprep.mubr.msk.bf16.mxu0 %vm1689_vm12, %v7421_v45  ;;  %v3270_v45 = vshll.u32 %v8368_v23, 16  ;;  %v3356_v1 = vshll.u32 %v8371_v13, 16  ;;  %v3360_v20 = vshrl.u32 %v8371_v13, 16  ;;  %v3339_v43 = vor.u32 %v3338_v52, %v10325_v21 }
 0x19a   : > { %v3272_v54 = vrot.slane %v3270_v45, 5  ;;  %v10327_v38 = vrot.slane %v3356_v1, 5  ;;  %v3362_v62 = vrot.slane %v3360_v20, 4 }
 0x19b   : > { %7770 = vmatmul.mubr.msk.bf16.gmra.mrb[16].mxu1 %vm1689_vm12, %v8307_v50  ;;  %v3347_v50 = vshrl.u32 %v3046_v4, 16 }
 0x19c   : > { %7773 = vmatprep.mubr.msk.bf16.mxu1 %vm1689_vm12, %v8308_v44  ;;  %v3350_v44 = vshll.u32 %v3046_v4, 16  ;;  %v3363_v18 = vor.u32 %v3362_v62, %v10327_v38  ;;  %v3398_v4 = vshll.u32 %v3052_v30, 16 }
 0x19e   : > { %v3352_v16 = vrot.slane %v3350_v44, 5  ;;  %v3364_v12 = vrot.slane %v3363_v18, 4 }
 0x19f   : > { %7936 = vmatmul.mubr.msk.bf16.gmra.mrb[12].mxu0 %vm1689_vm12, %v7422_v56  ;;  %v3043_v56 = vld [vmem:[#allocation2 + $0x90] sm:$0xf] }
 0x1a0   : > { %7939 = vmatprep.mubr.msk.bf16.mxu0 %vm1689_vm12, %v7423_v41  ;;  %v3304_v41 = vrot.slane %v3302_v36, 5  ;;  %v3323_v10 = vshrl.u32 %v3043_v56, 16  ;;  %v3326_v61 = vshll.u32 %v3043_v56, 16  ;;  %v3049_v36 = vld [vmem:[#allocation2 + $0xa8] sm:$0xf] }
 0x1a1   : > { %v8374_v56 = vld [vmem:[#allocation2 + $0xa4] sm:$0x1] }
 0x1a2   : > { %v3305_v46 = vor.u32 %v3304_v41, %v3301_v29  ;;  %v3325_v2 = vrot.slane %v3323_v10, 4  ;;  %v3328_v8 = vrot.slane %v3326_v61, 5  ;;  %v3366_v63 = vshll.u32 %v8374_v56, 16 }
 0x1a3   : > { %7774 = vmatmul.mubr.msk.bf16.gmra.mrb[20].mxu1 %vm1689_vm12, %v8309_v6  ;;  %v3349_v6 = vrot.slane %v3347_v50, 4  ;;  %v3344_v29 = vrot.slane %v3342_v5, 5  ;;  %v3395_v41 = vshrl.u32 %v3052_v30, 16  ;;  %v3340_v61 = vrot.slane %v3339_v43, 4 }
 0x1a4   : > { %7777 = vmatprep.mubr.msk.bf16.mxu1 %vm1689_vm12, %v8310_v31  ;;  %v3306_v23 = vrot.slane %v3305_v46, 4  ;;  %v3329_v22 = vor.u32 %v3328_v8, %v3325_v2  ;;  %v3368_v15 = vrot.slane %v3366_v63, 5  ;;  %v3419_v2 = vshrl.u32 %v3055_v27, 16 }
 0x1a5   : > { %v3353_v60 = vor.u32 %v3352_v16, %v3349_v6  ;;  %v3422_v8 = vshll.u32 %v3055_v27, 16 }
 0x1a6   : > { %v3311_v37 = vsel %vm8707_vm13, %v3306_v23, %v10312_v3  ;;  %v3369_v59 = vsel %vm8707_vm13, %v3364_v12, %v3368_v15 }
 0x1a7   : > { %7940 = vmatmul.mubr.msk.bf16.gmra.mrb[16].mxu0 %vm1689_vm12, %v7424_v58  ;;  %v3273_v58 = vsel %vm8707_vm13, %v3268_v51, %v3272_v54  ;;  %v8375_v54 = vld [vmem:[#allocation2 + $0xac] sm:$0xf]  ;;  %v3354_v47 = vrot.slane %v3353_v60, 4  ;;  %v3424_v28 = vrot.slane %v3422_v8, 5 }
 0x1a8   : > { %7943 = vmatprep.mubr.msk.bf16.mxu0 %vm1689_vm12, %v7425_v33  ;;  %v3315_v33 = vor.u32 %v3314_v57, %v10312_v3  ;;  %v7259_v31 = vcombine.low %v3263_v26, %v3273_v58  ;;  %v3380_v25 = vshll.u32 %v8375_v54, 16  ;;  %v3384_v51 = vshrl.u32 %v8375_v54, 16 }
 0x1a9   : > { %v3397_v3 = vrot.slane %v3395_v41, 4  ;;  %v3400_v26 = vrot.slane %v3398_v4, 5  ;;  %v3359_v53 = vsel %vm8707_vm13, %v3354_v47, %v10327_v38  ;;  %v8379_v38 = vld [vmem:[#allocation2 + $0xbc] sm:$0x1] }
 0x1aa   : > { %v3316_v45 = vrot.slane %v3315_v33, 4  ;;  %v3382_v13 = vrot.slane %v3380_v25, 5  ;;  %v3386_v1 = vrot.slane %v3384_v51, 4  ;;  %v3345_v33 = vsel %vm8707_vm13, %v3340_v61, %v3344_v29 }
 0x1ab   : > { %7778 = vmatmul.mubr.msk.bf16.gmra.mrb[24].mxu1 %vm1689_vm12, %v8311_v39  ;;  %v3374_v39 = vshll.u32 %v3049_v36, 16  ;;  %v3401_v16 = vor.u32 %v3400_v26, %v3397_v3 }
 0x1ac   : > { %7781 = vmatprep.mubr.msk.bf16.mxu1 %vm1689_vm12, %v8312_v42  ;;  %v3321_v48 = vsel %vm8707_vm13, %v3316_v45, %v3320_v19  ;;  %v8376_v42 = vld [vmem:[#allocation2 + $0xb8] sm:$0xf]  ;;  %v3387_v17 = vor.u32 %v3386_v1, %v3382_v13 }
 0x1ad   : > { %v3404_v57 = vshll.u32 %v8376_v42, 16  ;;  %v3408_v10 = vshrl.u32 %v8376_v42, 16  ;;  %v3376_v44 = vrot.slane %v3374_v39, 5  ;;  %v7261_v20 = vcombine.low %v3311_v37, %v3321_v48 }
 0x1ae   : > { %v3388_v23 = vrot.slane %v3387_v17, 4  ;;  %v3402_v43 = vrot.slane %v3401_v16, 4 }
 0x1af   : > { %7944 = vmatmul.mubr.msk.bf16.gmra.mrb[20].mxu0 %vm1689_vm12, %v7426_v34  ;;  %v3371_v34 = vshrl.u32 %v3049_v36, 16  ;;  %v3406_v58 = vrot.slane %v3404_v57, 5  ;;  %v3410_v24 = vrot.slane %v3408_v10, 4 }
 0x1b0   : > { %7947 = vmatprep.mubr.msk.bf16.mxu0 %vm1689_vm12, %v7427_v32  ;;  %v3330_v32 = vrot.slane %v3329_v22, 4  ;;  %v3421_v22 = vrot.slane %v3419_v2, 4 }
 0x1b1   : > { %v3373_v50 = vrot.slane %v3371_v34, 4  ;;  %v3411_v62 = vor.u32 %v3410_v24, %v3406_v58  ;;  %v3407_v34 = vsel %vm8707_vm13, %v3402_v43, %v3406_v58 }
 0x1b2   : > { %v3335_v46 = vsel %vm8707_vm13, %v3330_v32, %v10325_v21  ;;  %v8378_v21 = vld [vmem:[#allocation2 + $0xc4] sm:$0xf]  ;;  %v3425_v0 = vor.u32 %v3424_v28, %v3421_v22 }
 0x1b3   : > { %7782 = vmatmul.mubr.msk.bf16.gmra.mrb[28].mxu1 %vm1689_vm12, %v8313_v9  ;;  %v3428_v52 = vshll.u32 %v8378_v21, 16  ;;  %v3432_v6 = vshrl.u32 %v8378_v21, 16  ;;  %v3414_v9 = vshll.u32 %v8379_v38, 16  ;;  %v3412_v60 = vrot.slane %v3411_v62, 4 }
 0x1b4   : > { %7803 = vmatprep.mubr.msk.bf16.mxu1 %vm1689_vm12, %v7259_v31  ;;  %v7262_v31 = vcombine.low %v3335_v46, %v3345_v33  ;;  %v3426_v51 = vrot.slane %v3425_v0, 4 }
 0x1b5   : > { %v3430_v5 = vrot.slane %v3428_v52, 5  ;;  %v3434_v36 = vrot.slane %v3432_v6, 4  ;;  %v3416_v18 = vrot.slane %v3414_v9, 5 }
 0x1b7   : > { %7948 = vmatmul.mubr.msk.bf16.gmra.mrb[24].mxu0 %vm1689_vm12, %v7428_v35  ;;  %v3377_v35 = vor.u32 %v3376_v44, %v3373_v50  ;;  %v3435_v49 = vor.u32 %v3434_v36, %v3430_v5  ;;  %v3417_v39 = vsel %vm8707_vm13, %v3412_v60, %v3416_v18  ;;  %v3431_v32 = vsel %vm8707_vm13, %v3426_v51, %v3430_v5 }
 0x1b8   : > { %7951 = vmatprep.mubr.msk.bf16.mxu0 %vm1689_vm12, %v7429_v40  ;;  %v3390_v40 = vshll.u32 %v8377_v55, 16  ;;  %v7265_v25 = vcombine.low %v3407_v34, %v3417_v39  ;;  %v8463_v50 = vmov 1983009808  }
 0x1b9   : > { %v3378_v19 = vrot.slane %v3377_v35, 4  ;;  %v3436_v37 = vrot.slane %v3435_v49, 4  ;;  %v5931_v44 = vunpack.c.l.s4 %v8463_v50 }
 0x1ba   : > { %v3392_v45 = vrot.slane %v3390_v40, 5 }
 0x1bb   : > { %7804 = vmatmul.mubr.msk.bf16.vlgmr.msra.gmra.mrb[16].mxu1 %vm1689_vm12, %v10209_v7  ;;  %v7263_v7 = vcombine.low %v3359_v53, %v3369_v59  ;;  %v3383_v56 = vsel %vm8707_vm13, %v3378_v19, %v3382_v13  ;;  %v5933_v13 = vlaneseq  ;;  %v5932_v46 = vunpack.c.0.s8 %v5931_v44 }
 0x1bc   : > { %7807 = vmatprep.mubr.msk.bf16.mxu1 %vm1689_vm12, %v7261_v20  ;;  %v3393_v63 = vsel %vm8707_vm13, %v3388_v23, %v3392_v45 }
 0x1bd   : > { %v7264_v54 = vcombine.low %v3383_v56, %v3393_v63  ;;  %v5934_v33 = vshrl.u32 %v5933_v13, 7 }
 0x1bf   : > { %7952 = vmatmul.mubr.msk.bf16.gmra.mrb[28].mxu0 %vm1689_vm12, %v7430_v14  ;;  %v8380_v14 = vld [vmem:[#allocation2 + $0xc8] sm:$0x1]  ;;  %v10414_v62 = vsub.s32 %v5932_v46, %v5934_v33 }
 0x1c0   : > { %v3438_v30 = vshll.u32 %v8380_v14, 16 }
 0x1c2   : > { %v3440_v48 = vrot.slane %v3438_v30, 5 }
 0x1c3   : > { %7808 = vmatmul.mubr.msk.bf16.gmra.mrb[20].mxu1 %vm1689_vm12, %v7262_v31 }
 0x1c4   : > { %7811 = vmatprep.mubr.msk.bf16.mxu1 %vm1689_vm12, %v7263_v7  ;;  %v3441_v29 = vsel %vm8707_vm13, %v3436_v37, %v3440_v48 }
 0x1c5   : > { %v7266_v41 = vcombine.low %v3431_v32, %v3441_v29 }
 0x1cb   : > { %7812 = vmatmul.mubr.msk.bf16.gmra.mrb[24].mxu1 %vm1689_vm12, %v7264_v54 }
 0x1cc   : > { %7815 = vmatprep.mubr.msk.bf16.mxu1 %vm1689_vm12, %v7265_v25 }
 0x1d3   : > { %7816 = vmatmul.mubr.msk.bf16.gmra.mrb[28].mxu1 %vm1689_vm12, %v7266_v41 }
 0x24e   : > { %v7755_v4 = vpop.f32.mrb[0].mxu1 }
 0x24f   : > { %v2851_v42 = vpop.f32.mrb[1].mxu1 }
 0x250   : > { %v7756_v57 = vpop.f32.mrb[2].mxu1 }
 0x251   : > { %v2854_v10 = vpop.f32.mrb[3].mxu1 }
 0x256   : > { %v7759_v61 = vpop.f32.mrb[4].mxu1 }
 0x257   : > { %v2867_v47 = vpop.f32.mrb[5].mxu1 }
 0x258   : > { %v7760_v12 = vpop.f32.mrb[6].mxu1 }
 0x259   : > { %v2870_v15 = vpop.f32.mrb[7].mxu1 }
 0x25a   : > { %v7925_v1 = vpop.f32.mrb[0].mxu0 }
 0x25b   : > { %v7957_v20 = vadd.f32 %v7925_v1, %v7755_v4  ;;  %v5602_v3 = vpop.f32.mrb[1].mxu0 }
 0x25c   : > { %v7958_v26 = vadd.f32 %v5602_v3, %v2851_v42  ;;  %v7926_v58 = vpop.f32.mrb[2].mxu0 }
 0x25d   : > { %v5770_v27 = vadd.f32 %v7957_v20, %v10391_v11  ;;  %v7959_v53 = vadd.f32 %v7926_v58, %v7756_v57  ;;  %v5605_v59 = vpop.f32.mrb[3].mxu0 }
 0x25e   : > { %v10393_v24 = vpop.f32.mrb[8].mxu1  ;;  %v5768_v17 = vadd.f32 %v7958_v26, %v10391_v11  ;;  %v7960_v55 = vadd.f32 %v5605_v59, %v2854_v10 }
 0x25f   : > { %v10396_v35 = vpop.f32.mrb[9].mxu1  ;;  %v5802_v2 = vmax.f32 %v5770_v27, 0.0  ;;  %v5771_v8 = vadd.f32 %v7959_v53, %v10391_v11 }
 0x260   : > { %v10405_v40 = vpop.f32.mrb[10].mxu1  ;;  %v5800_v52 = vmax.f32 %v5768_v17, 0.0  ;;  %v5769_v6 = vadd.f32 %v7960_v55, %v10391_v11 }
 0x261   : > { %v10408_v21 = vpop.f32.mrb[11].mxu1  ;;  %5835 = vst.msk [vmem:[%s10402_s11 + $0x10] sm:$0xff] %vm5832_vm0, %v5802_v2  ;;  %v5866_v16 = vsel %vm5832_vm0, %v5802_v2, -inf  ;;  %v5803_v38 = vmax.f32 %v5771_v8, 0.0 }
 0x262   : > { %5833 = vst.msk [vmem:[%s10402_s11] sm:$0xff] %vm5832_vm0, %v5800_v52  ;;  %v5865_v9 = vsel %vm5832_vm0, %v5800_v52, -inf  ;;  %v5801_v31 = vmax.f32 %v5769_v6, 0.0  ;;  %v7929_v7 = vpop.f32.mrb[4].mxu0 }
 0x263   : > { %v5867_v19 = vmax.f32 %v5865_v9, %v5866_v16  ;;  %5836 = vst.msk [vmem:[%s10402_s11 + $0x18] sm:$0xff] %vm5832_vm0, %v5803_v38  ;;  %v5869_v23 = vsel %vm5832_vm0, %v5803_v38, -inf  ;;  %v7961_v45 = vadd.f32 %v7929_v7, %v7759_v61  ;;  %v5618_v22 = vpop.f32.mrb[5].mxu0 }
 0x264   : > { %5834 = vst.msk [vmem:[%s10402_s11 + $0x8] sm:$0xff] %vm5832_vm0, %v5801_v31  ;;  %v5868_v28 = vsel %vm5832_vm0, %v5801_v31, -inf  ;;  %v7962_v5 = vadd.f32 %v5618_v22, %v2867_v47  ;;  %v7930_v36 = vpop.f32.mrb[6].mxu0 }
 0x265   : > { %v5929_v60 = vcombine.high %v5867_v19, %v5867_v19  ;;  %v5936_v18 = vrot.slane %v5867_v19, %v10414_v62  ;;  %v5870_v56 = vmax.f32 %v5868_v28, %v5869_v23  ;;  %v10429_v63 = vadd.f32 %v7961_v45, %v10391_v11  ;;  %v5621_v0 = vpop.f32.mrb[7].mxu0 }
 0x266   : > { %v10425_v43 = vpop.f32.mrb[12].mxu1  ;;  %v10434_v14 = vadd.f32 %v7962_v5, %v10391_v11  ;;  %v10436_v30 = vadd.f32 %v7930_v36, %v7760_v12  ;;  %v10438_v34 = vadd.f32 %v5621_v0, %v2870_v15 }
 0x267   : > { %v10431_v49 = vpop.f32.mrb[13].mxu1  ;;  %v5943_v39 = vrot.slane %v5929_v60, %v10414_v62  ;;  %v5944_v54 = vcombine.high %v5936_v18, %v5936_v18  ;;  %v6266_v25 = vsel %vm6265_vm2, %v5936_v18, -inf  ;;  %v5946_v37 = vcombine.high %v5870_v56, %v5870_v56 }
 0x268   : > { %v10442_v51 = vpop.f32.mrb[14].mxu1  ;;  %v6267_v48 = vrot.slane %v6266_v25, 4  ;;  %v5953_v32 = vrot.slane %v5870_v56, %v10414_v62  ;;  %v5806_v41 = vmax.f32 %v10429_v63, 0.0  ;;  %v5804_v4 = vmax.f32 %v10434_v14, 0.0 }
 0x269   : > { %v10445_v29 = vpop.f32.mrb[15].mxu1  ;;  %v5945_v42 = vcombine.high %v5943_v39, %v5943_v39  ;;  %v6273_v57 = vsel %vm6265_vm2, %v5944_v54, -inf  ;;  %v6280_v10 = vsel %vm6265_vm2, %v5943_v39, -inf  ;;  %v5960_v61 = vrot.slane %v5946_v37, %v10414_v62 }
 0x26a   : > { %v6268_v47 = vmax.f32 %v6266_v25, %v6267_v48  ;;  %v6274_v12 = vrot.slane %v6273_v57, 4  ;;  %v6281_v15 = vrot.slane %v6280_v10, 4  ;;  %v5961_v50 = vcombine.high %v5953_v32, %v5953_v32  ;;  %5839 = vst.msk [vmem:[%s10402_s11 + $0x30] sm:$0xff] %vm5832_vm0, %v5806_v41  ;;  %5837 = vst.msk [vmem:[%s10402_s11 + $0x20] sm:$0xff] %vm5832_vm0, %v5804_v4  ;;  %v10460_v44 = vpop.f32.mrb[8].mxu0 }
 0x26b   : > { %v6287_v13 = vsel %vm6265_vm2, %v5945_v42, -inf  ;;  %v5962_v1 = vcombine.high %v5960_v61, %v5960_v61  ;;  %v6294_v20 = vsel %vm6265_vm2, %v5953_v32, -inf  ;;  %v6308_v3 = vsel %vm6265_vm2, %v5960_v61, -inf  ;;  %v10465_v26 = vpop.f32.mrb[9].mxu0 }
 0x26c   : > { %v6269_v58 = vrot.slane %v6268_v47, 2  ;;  %v6275_v27 = vmax.f32 %v6273_v57, %v6274_v12  ;;  %v6282_v46 = vmax.f32 %v6280_v10, %v6281_v15  ;;  %v6288_v33 = vrot.slane %v6287_v13, 4  ;;  %v10467_v53 = vpop.f32.mrb[10].mxu0 }
 0x26d   : > { %v6295_v59 = vrot.slane %v6294_v20, 4  ;;  %v6301_v17 = vsel %vm6265_vm2, %v5961_v50, -inf  ;;  %v6309_v55 = vrot.slane %v6308_v3, 4  ;;  %v6315_v2 = vsel %vm6265_vm2, %v5962_v1, -inf  ;;  %v10471_v8 = vpop.f32.mrb[11].mxu0 }
 0x26e   : > { %v6270_v52 = vmax.f32 %v6268_v47, %v6269_v58  ;;  %v6276_v6 = vrot.slane %v6275_v27, 2  ;;  %v6283_v16 = vrot.slane %v6282_v46, 2  ;;  %v6289_v38 = vmax.f32 %v6287_v13, %v6288_v33 }
 0x26f   : > { %v6296_v9 = vmax.f32 %v6294_v20, %v6295_v59  ;;  %v6302_v31 = vrot.slane %v6301_v17, 4  ;;  %v6310_v7 = vmax.f32 %v6308_v3, %v6309_v55  ;;  %v6316_v19 = vrot.slane %v6315_v2, 4 }
 0x270   : > { %v6271_v23 = vrot.slane %v6270_v52, 1  ;;  %v6277_v45 = vmax.f32 %v6275_v27, %v6276_v6  ;;  %v6284_v22 = vmax.f32 %v6282_v46, %v6283_v16  ;;  %v6290_v28 = vrot.slane %v6289_v38, 2 }
 0x271   : > { %v6297_v5 = vrot.slane %v6296_v9, 2  ;;  %v6303_v36 = vmax.f32 %v6301_v17, %v6302_v31  ;;  %v6311_v60 = vrot.slane %v6310_v7, 2  ;;  %v6317_v18 = vmax.f32 %v6315_v2, %v6316_v19 }
 0x272   : > { %v6272_v56 = vmax.f32 %v6270_v52, %v6271_v23  ;;  %v6278_v0 = vrot.slane %v6277_v45, 1  ;;  %v6285_v39 = vrot.slane %v6284_v22, 1  ;;  %v6291_v54 = vmax.f32 %v6289_v38, %v6290_v28  ;;  %v10473_v25 = vpop.f32.mrb[12].mxu0 }
 0x273   : > { %v6298_v37 = vmax.f32 %v6296_v9, %v6297_v5  ;;  %v6304_v48 = vrot.slane %v6303_v36, 2  ;;  %v6312_v32 = vmax.f32 %v6310_v7, %v6311_v60  ;;  %v6318_v42 = vrot.slane %v6317_v18, 2  ;;  %v10475_v57 = vpop.f32.mrb[13].mxu0 }
 0x274   : > { %v6279_v10 = vmax.f32 %v6277_v45, %v6278_v0  ;;  %v6286_v61 = vmax.f32 %v6284_v22, %v6285_v39  ;;  %v6292_v47 = vrot.slane %v6291_v54, 1  ;;  %v5872_v12 = vsel %vm5832_vm0, %v5806_v41, -inf  ;;  %v10480_v15 = vpop.f32.mrb[14].mxu0 }
 0x275   : > { %v6299_v50 = vrot.slane %v6298_v37, 1  ;;  %v6305_v13 = vmax.f32 %v6303_v36, %v6304_v48  ;;  %v6313_v1 = vrot.slane %v6312_v32, 1  ;;  %v6319_v20 = vmax.f32 %v6317_v18, %v6318_v42  ;;  %v10483_v3 = vpop.f32.mrb[15].mxu0 }
 0x276   : > { %v6293_v58 = vmax.f32 %v6291_v54, %v6292_v47  ;;  %v6779_v27 = vsel %vm6778_vm3, %v6279_v10, %v6272_v56  ;;  %v5871_v46 = vsel %vm5832_vm0, %v5804_v4, -inf  ;;  %v5775_v63 = vadd.f32 %v10436_v30, %v10391_v11 }
 0x277   : > { %v6781_v41 = vsel %vm6780_vm4, %v6286_v61, %v6779_v27  ;;  %v6300_v33 = vmax.f32 %v6298_v37, %v6299_v50  ;;  %v6306_v59 = vrot.slane %v6305_v13, 1  ;;  %v6314_v17 = vmax.f32 %v6312_v32, %v6313_v1 }
 0x278   : > { %v6320_v55 = vrot.slane %v6319_v20, 1  ;;  %v6783_v2 = vsel %vm6782_vm5, %v6293_v58, %v6781_v41  ;;  %v5873_v52 = vmax.f32 %v5871_v46, %v5872_v12  ;;  %v5807_v6 = vmax.f32 %v5775_v63, 0.0 }
 0x279   : > { %v6307_v14 = vmax.f32 %v6305_v13, %v6306_v59  ;;  %v6785_v4 = vsel %vm6784_vm6, %v6300_v33, %v6783_v2  ;;  %v5773_v30 = vadd.f32 %v10438_v34, %v10391_v11  ;;  %v7965_v16 = vadd.f32 %v10460_v44, %v10393_v24 }
 0x27a   : > { %v6321_v38 = vmax.f32 %v6319_v20, %v6320_v55  ;;  %v5963_v9 = vcombine.high %v5873_v52, %v5873_v52  ;;  %v5970_v31 = vrot.slane %v5873_v52, %v10414_v62  ;;  %5840 = vst.msk [vmem:[%s10402_s11 + $0x38] sm:$0xff] %vm5832_vm0, %v5807_v6  ;;  %v5875_v7 = vsel %vm5832_vm0, %v5807_v6, -inf  ;;  %v10506_v19 = vpop.f32.mrb[16].mxu0 }
 0x27b   : > { %v6787_v23 = vsel %vm6786_vm7, %v6307_v14, %v6785_v4  ;;  %v5805_v45 = vmax.f32 %v5773_v30, 0.0  ;;  %v5778_v34 = vadd.f32 %v7965_v16, %v10391_v11  ;;  %v7966_v24 = vadd.f32 %v10465_v26, %v10396_v35  ;;  %v10512_v44 = vpop.f32.mrb[17].mxu0 }
 0x27c   : > { %v6789_v22 = vsel %vm6788_vm8, %v6314_v17, %v6787_v23  ;;  %v5977_v28 = vrot.slane %v5963_v9, %v10414_v62  ;;  %v5978_v5 = vcombine.high %v5970_v31, %v5970_v31  ;;  %v6322_v36 = vsel %vm6265_vm2, %v5970_v31, -inf  ;;  %v10517_v60 = vpop.f32.mrb[18].mxu0 }
 0x27d   : > { %v6791_v18 = vsel %vm6790_vm9, %v6321_v38, %v6789_v22  ;;  %v6323_v56 = vrot.slane %v6322_v36, 4  ;;  %5838 = vst.msk [vmem:[%s10402_s11 + $0x28] sm:$0xff] %vm5832_vm0, %v5805_v45  ;;  %v5874_v0 = vsel %vm5832_vm0, %v5805_v45, -inf  ;;  %v5810_v35 = vmax.f32 %v5778_v34, 0.0  ;;  %v10523_v26 = vpop.f32.mrb[19].mxu0 }
 0x27e   : > { %6849 = vst.msk [vmem:[%s10526_s13] sm:$0xff] %vm5832_vm0, %v6791_v18  ;;  %v5979_v39 = vcombine.high %v5977_v28, %v5977_v28  ;;  %v6329_v54 = vsel %vm6265_vm2, %v5978_v5, -inf  ;;  %v6336_v37 = vsel %vm6265_vm2, %v5977_v28, -inf  ;;  %v5876_v48 = vmax.f32 %v5874_v0, %v5875_v7 }
 0x27f   : > { %v6324_v32 = vmax.f32 %v6322_v36, %v6323_v56  ;;  %v6330_v42 = vrot.slane %v6329_v54, 4  ;;  %v6337_v10 = vrot.slane %v6336_v37, 4  ;;  %5843 = vst.msk [vmem:[%s10402_s11 + $0x50] sm:$0xff] %vm5832_vm0, %v5810_v35  ;;  %v5878_v61 = vsel %vm5832_vm0, %v5810_v35, -inf }
 0x280   : > { %v6343_v47 = vsel %vm6265_vm2, %v5979_v39, -inf  ;;  %v5980_v12 = vcombine.high %v5876_v48, %v5876_v48  ;;  %v5987_v50 = vrot.slane %v5876_v48, %v10414_v62  ;;  %v5776_v13 = vadd.f32 %v7966_v24, %v10391_v11 }
 0x281   : > { %v6325_v1 = vrot.slane %v6324_v32, 2  ;;  %v6331_v20 = vmax.f32 %v6329_v54, %v6330_v42  ;;  %v6338_v58 = vmax.f32 %v6336_v37, %v6337_v10  ;;  %v6344_v27 = vrot.slane %v6343_v47, 4 }
 0x282   : > { %v5994_v46 = vrot.slane %v5980_v12, %v10414_v62  ;;  %v5995_v63 = vcombine.high %v5987_v50, %v5987_v50  ;;  %v6350_v41 = vsel %vm6265_vm2, %v5987_v50, -inf  ;;  %v5808_v33 = vmax.f32 %v5776_v13, 0.0  ;;  %v10540_v59 = vpop.f32.mrb[20].mxu0 }
 0x283   : > { %v6326_v17 = vmax.f32 %v6324_v32, %v6325_v1  ;;  %v6332_v55 = vrot.slane %v6331_v20, 2  ;;  %v6339_v2 = vrot.slane %v6338_v58, 2  ;;  %v6345_v52 = vmax.f32 %v6343_v47, %v6344_v27  ;;  %v10542_v6 = vpop.f32.mrb[21].mxu0 }
 0x284   : > { %v5996_v14 = vcombine.high %v5994_v46, %v5994_v46  ;;  %v6351_v4 = vrot.slane %v6350_v41, 4  ;;  %v6357_v30 = vsel %vm6265_vm2, %v5995_v63, -inf  ;;  %v6364_v16 = vsel %vm6265_vm2, %v5994_v46, -inf  ;;  %5841 = vst.msk [vmem:[%s10402_s11 + $0x40] sm:$0xff] %vm5832_vm0, %v5808_v33  ;;  %v10548_v38 = vpop.f32.mrb[22].mxu0 }
 0x285   : > { %v6327_v9 = vrot.slane %v6326_v17, 1  ;;  %v6333_v31 = vmax.f32 %v6331_v20, %v6332_v55  ;;  %v6340_v7 = vmax.f32 %v6338_v58, %v6339_v2  ;;  %v6346_v23 = vrot.slane %v6345_v52, 2  ;;  %v10550_v45 = vpop.f32.mrb[23].mxu0 }
 0x286   : > { %v6352_v34 = vmax.f32 %v6350_v41, %v6351_v4  ;;  %v6358_v24 = vrot.slane %v6357_v30, 4  ;;  %v6365_v22 = vrot.slane %v6364_v16, 4  ;;  %v6371_v28 = vsel %vm6265_vm2, %v5996_v14, -inf }
 0x287   : > { %v6328_v5 = vmax.f32 %v6326_v17, %v6327_v9  ;;  %v6334_v36 = vrot.slane %v6333_v31, 1  ;;  %v6341_v18 = vrot.slane %v6340_v7, 1  ;;  %v6347_v56 = vmax.f32 %v6345_v52, %v6346_v23 }
 0x288   : > { %v6353_v0 = vrot.slane %v6352_v34, 2  ;;  %v6359_v35 = vmax.f32 %v6357_v30, %v6358_v24  ;;  %v6366_v39 = vmax.f32 %v6364_v16, %v6365_v22  ;;  %v6372_v54 = vrot.slane %v6371_v28, 4 }
 0x289   : > { %v6335_v37 = vmax.f32 %v6333_v31, %v6334_v36  ;;  %v6342_v48 = vmax.f32 %v6340_v7, %v6341_v18  ;;  %v6348_v32 = vrot.slane %v6347_v56, 1  ;;  %v5877_v42 = vsel %vm5832_vm0, %v5808_v33, -inf }
 0x28a   : > { %v6354_v10 = vmax.f32 %v6352_v34, %v6353_v0  ;;  %v6360_v47 = vrot.slane %v6359_v35, 2  ;;  %v6367_v12 = vrot.slane %v6366_v39, 2  ;;  %v6373_v50 = vmax.f32 %v6371_v28, %v6372_v54  ;;  %v10554_v13 = vpop.f32.mrb[24].mxu0 }
 0x28b   : > { %v6349_v1 = vmax.f32 %v6347_v56, %v6348_v32  ;;  %v6792_v20 = vsel %vm6778_vm3, %v6335_v37, %v6328_v5  ;;  %v5879_v58 = vmax.f32 %v5877_v42, %v5878_v61  ;;  %v7967_v27 = vadd.f32 %v10467_v53, %v10405_v40  ;;  %v10559_v46 = vpop.f32.mrb[25].mxu0 }
 0x28c   : > { %v6793_v63 = vsel %vm6780_vm4, %v6342_v48, %v6792_v20  ;;  %v6355_v41 = vrot.slane %v6354_v10, 1  ;;  %v6361_v17 = vmax.f32 %v6359_v35, %v6360_v47  ;;  %v6368_v33 = vmax.f32 %v6366_v39, %v6367_v12  ;;  %v10562_v55 = vpop.f32.mrb[26].mxu0 }
 0x28d   : > { %v6374_v2 = vrot.slane %v6373_v50, 2  ;;  %v6794_v52 = vsel %vm6782_vm5, %v6349_v1, %v6793_v63  ;;  %v5997_v14 = vcombine.high %v5879_v58, %v5879_v58  ;;  %v6004_v4 = vrot.slane %v5879_v58, %v10414_v62  ;;  %v10568_v61 = vpop.f32.mrb[27].mxu0 }
 0x28e   : > { %v10566_v30 = vpop.f32.mrb[16].mxu1  ;;  %v6356_v40 = vmax.f32 %v6354_v10, %v6355_v41  ;;  %v6362_v53 = vrot.slane %v6361_v17, 1  ;;  %v6369_v16 = vrot.slane %v6368_v33, 1  ;;  %v5779_v9 = vadd.f32 %v7967_v27, %v10391_v11 }
 0x28f   : > { %v10571_v31 = vpop.f32.mrb[17].mxu1  ;;  %v6375_v7 = vmax.f32 %v6373_v50, %v6374_v2  ;;  %v6011_v23 = vrot.slane %v5997_v14, %v10414_v62  ;;  %v6012_v34 = vcombine.high %v6004_v4, %v6004_v4  ;;  %v6378_v24 = vsel %vm6265_vm2, %v6004_v4, -inf }
 0x290   : > { %v10575_v22 = vpop.f32.mrb[18].mxu1  ;;  %v6363_v28 = vmax.f32 %v6361_v17, %v6362_v53  ;;  %v6370_v5 = vmax.f32 %v6368_v33, %v6369_v16  ;;  %v6795_v36 = vsel %vm6784_vm6, %v6356_v40, %v6794_v52  ;;  %v6379_v18 = vrot.slane %v6378_v24, 4 }
 0x291   : > { %v10578_v56 = vpop.f32.mrb[19].mxu1  ;;  %v6376_v0 = vrot.slane %v6375_v7, 1  ;;  %v6013_v35 = vcombine.high %v6011_v23, %v6011_v23  ;;  %v6385_v39 = vsel %vm6265_vm2, %v6012_v34, -inf  ;;  %v6392_v54 = vsel %vm6265_vm2, %v6011_v23, -inf }
 0x292   : > { %v6796_v37 = vsel %vm6786_vm7, %v6363_v28, %v6795_v36  ;;  %v6380_v48 = vmax.f32 %v6378_v24, %v6379_v18  ;;  %v6386_v32 = vrot.slane %v6385_v39, 4  ;;  %v6393_v42 = vrot.slane %v6392_v54, 4  ;;  %v10583_v10 = vpop.f32.mrb[28].mxu0 }
 0x293   : > { %v6377_v47 = vmax.f32 %v6375_v7, %v6376_v0  ;;  %v6797_v12 = vsel %vm6788_vm8, %v6370_v5, %v6796_v37  ;;  %v6399_v50 = vsel %vm6265_vm2, %v6013_v35, -inf  ;;  %v5811_v1 = vmax.f32 %v5779_v9, 0.0  ;;  %v10587_v20 = vpop.f32.mrb[29].mxu0 }
 0x294   : > { %v6381_v58 = vrot.slane %v6380_v48, 2  ;;  %v6387_v27 = vmax.f32 %v6385_v39, %v6386_v32  ;;  %v6394_v63 = vmax.f32 %v6392_v54, %v6393_v42  ;;  %v6400_v41 = vrot.slane %v6399_v50, 4  ;;  %v10589_v17 = vpop.f32.mrb[30].mxu0 }
 0x295   : > { %11045 = vst [vmem:[#allocation14_spill] sm:$0xff] %v10589_v17  ;;  %v6798_v33 = vsel %vm6790_vm9, %v6377_v47, %v6797_v12  ;;  %5844 = vst.msk [vmem:[%s10402_s11 + $0x58] sm:$0xff] %vm5832_vm0, %v5811_v1  ;;  %v5881_v2 = vsel %vm5832_vm0, %v5811_v1, -inf  ;;  %v7968_v52 = vadd.f32 %v10471_v8, %v10408_v21  ;;  %v7969_v14 = vadd.f32 %v10473_v25, %v10425_v43  ;;  %v10601_v40 = vpop.f32.mrb[31].mxu0 }
 0x296   : > { %v10599_v4 = vpop.f32.mrb[20].mxu1  ;;  %11046 = vst [vmem:[#allocation15_spill] sm:$0xff] %v10601_v40  ;;  %6850 = vst.msk [vmem:[%s10526_s13 + $0x8] sm:$0xff] %vm5832_vm0, %v6798_v33  ;;  %v6382_v53 = vmax.f32 %v6380_v48, %v6381_v58  ;;  %v6388_v16 = vrot.slane %v6387_v27, 2  ;;  %v6395_v9 = vrot.slane %v6394_v63, 2  ;;  %v6401_v7 = vmax.f32 %v6399_v50, %v6400_v41 }
 0x297   : > { %v10605_v23 = vpop.f32.mrb[21].mxu1  ;;  %v5777_v34 = vadd.f32 %v7968_v52, %v10391_v11  ;;  %v5782_v24 = vadd.f32 %v7969_v14, %v10391_v11  ;;  %v7970_v21 = vadd.f32 %v10475_v57, %v10431_v49  ;;  %v7971_v43 = vadd.f32 %v10480_v15, %v10442_v51 }
 0x298   : > { %v10613_v8 = vpop.f32.mrb[22].mxu1  ;;  %v6383_v25 = vrot.slane %v6382_v53, 1  ;;  %v6389_v28 = vmax.f32 %v6387_v27, %v6388_v16  ;;  %v6396_v5 = vmax.f32 %v6394_v63, %v6395_v9  ;;  %v6402_v36 = vrot.slane %v6401_v7, 2 }
 0x299   : > { %v10615_v18 = vpop.f32.mrb[23].mxu1  ;;  %v5809_v0 = vmax.f32 %v5777_v34, 0.0  ;;  %v5814_v35 = vmax.f32 %v5782_v24, 0.0  ;;  %v5780_v39 = vadd.f32 %v7970_v21, %v10391_v11  ;;  %v5783_v49 = vadd.f32 %v7971_v43, %v10391_v11 }
 0x29a   : > { %v6384_v57 = vmax.f32 %v6382_v53, %v6383_v25  ;;  %v6390_v54 = vrot.slane %v6389_v28, 1  ;;  %v6397_v51 = vrot.slane %v6396_v5, 1  ;;  %v6403_v15 = vmax.f32 %v6401_v7, %v6402_v36 }
 0x29b   : > { %5842 = vst.msk [vmem:[%s10402_s11 + $0x48] sm:$0xff] %vm5832_vm0, %v5809_v0  ;;  %v5880_v37 = vsel %vm5832_vm0, %v5809_v0, -inf  ;;  %5847 = vst.msk [vmem:[%s10402_s11 + $0x70] sm:$0xff] %vm5832_vm0, %v5814_v35  ;;  %v5884_v48 = vsel %vm5832_vm0, %v5814_v35, -inf  ;;  %v5812_v32 = vmax.f32 %v5780_v39, 0.0  ;;  %v5815_v42 = vmax.f32 %v5783_v49, 0.0 }
 0x29c   : > { %v6391_v47 = vmax.f32 %v6389_v28, %v6390_v54  ;;  %v6398_v12 = vmax.f32 %v6396_v5, %v6397_v51  ;;  %v6404_v50 = vrot.slane %v6403_v15, 1  ;;  %v5882_v1 = vmax.f32 %v5880_v37, %v5881_v2 }
 0x29d   : > { %5845 = vst.msk [vmem:[%s10402_s11 + $0x60] sm:$0xff] %vm5832_vm0, %v5812_v32  ;;  %v5883_v58 = vsel %vm5832_vm0, %v5812_v32, -inf  ;;  %5848 = vst.msk [vmem:[%s10402_s11 + $0x78] sm:$0xff] %vm5832_vm0, %v5815_v42  ;;  %v10631_v27 = vsel %vm5832_vm0, %v5815_v42, -inf  ;;  %v7972_v63 = vadd.f32 %v10483_v3, %v10445_v29  ;;  %v7973_v41 = vadd.f32 %v10506_v19, %v10566_v30 }
 0x29e   : > { %v10637_v33 = vpop.f32.mrb[24].mxu1  ;;  %v6405_v52 = vmax.f32 %v6403_v15, %v6404_v50  ;;  %v6799_v2 = vsel %vm6778_vm3, %v6391_v47, %v6384_v57  ;;  %v6014_v14 = vcombine.high %v5882_v1, %v5882_v1  ;;  %v6021_v53 = vrot.slane %v5882_v1, %v10414_v62 }
 0x29f   : > { %v10641_v16 = vpop.f32.mrb[25].mxu1  ;;  %v6800_v9 = vsel %vm6780_vm4, %v6398_v12, %v6799_v2  ;;  %v5885_v7 = vmax.f32 %v5883_v58, %v5884_v48  ;;  %v5781_v34 = vadd.f32 %v7972_v63, %v10391_v11  ;;  %v10646_v29 = vadd.f32 %v7973_v41, %v10391_v11 }
 0x2a0   : > { %v10648_v3 = vpop.f32.mrb[26].mxu1  ;;  %v6028_v19 = vrot.slane %v6014_v14, %v10414_v62  ;;  %v6029_v30 = vcombine.high %v6021_v53, %v6021_v53  ;;  %v6406_v24 = vsel %vm6265_vm2, %v6021_v53, -inf  ;;  %v6801_v21 = vsel %vm6782_vm5, %v6405_v52, %v6800_v9 }
 0x2a1   : > { %v10653_v43 = vpop.f32.mrb[27].mxu1  ;;  %v6407_v25 = vrot.slane %v6406_v24, 4  ;;  %v6031_v28 = vcombine.high %v5885_v7, %v5885_v7  ;;  %v6038_v5 = vrot.slane %v5885_v7, %v10414_v62  ;;  %v5813_v36 = vmax.f32 %v5781_v34, 0.0 }
 0x2a2   : > { %v6030_v0 = vcombine.high %v6028_v19, %v6028_v19  ;;  %v6413_v35 = vsel %vm6265_vm2, %v6029_v30, -inf  ;;  %v6420_v39 = vsel %vm6265_vm2, %v6028_v19, -inf  ;;  %v5818_v49 = vmax.f32 %v10646_v29, 0.0 }
 0x2a3   : > { %v6408_v57 = vmax.f32 %v6406_v24, %v6407_v25  ;;  %v6414_v54 = vrot.slane %v6413_v35, 4  ;;  %v6421_v51 = vrot.slane %v6420_v39, 4  ;;  %v6045_v15 = vrot.slane %v6031_v28, %v10414_v62  ;;  %5846 = vst.msk [vmem:[%s10402_s11 + $0x68] sm:$0xff] %vm5832_vm0, %v5813_v36 }
 0x2a4   : > { %v6427_v37 = vsel %vm6265_vm2, %v6030_v0, -inf  ;;  %v6046_v48 = vcombine.high %v6038_v5, %v6038_v5  ;;  %v6434_v32 = vsel %vm6265_vm2, %v6038_v5, -inf  ;;  %v5886_v42 = vsel %vm5832_vm0, %v5813_v36, -inf  ;;  %5851 = vst.msk [vmem:[%s10402_s11 + $0x90] sm:$0xff] %vm5832_vm0, %v5818_v49 }
 0x2a5   : > { %v6409_v47 = vrot.slane %v6408_v57, 2  ;;  %v6415_v12 = vmax.f32 %v6413_v35, %v6414_v54  ;;  %v6422_v50 = vmax.f32 %v6420_v39, %v6421_v51  ;;  %v6428_v1 = vrot.slane %v6427_v37, 4 }
 0x2a6   : > { %v10667_v58 = vpop.f32.mrb[28].mxu1  ;;  %v6047_v63 = vcombine.high %v6045_v15, %v6045_v15  ;;  %v6435_v41 = vrot.slane %v6434_v32, 4  ;;  %v6441_v52 = vsel %vm6265_vm2, %v6046_v48, -inf  ;;  %v6448_v2 = vsel %vm6265_vm2, %v6045_v15, -inf }
 0x2a7   : > { %v10671_v14 = vpop.f32.mrb[29].mxu1  ;;  %v6410_v53 = vmax.f32 %v6408_v57, %v6409_v47  ;;  %v6416_v9 = vrot.slane %v6415_v12, 2  ;;  %v6423_v7 = vrot.slane %v6422_v50, 2  ;;  %v6429_v34 = vmax.f32 %v6427_v37, %v6428_v1 }
 0x2a8   : > { %v10673_v29 = vpop.f32.mrb[30].mxu1  ;;  %v6436_v19 = vmax.f32 %v6434_v32, %v6435_v41  ;;  %v6442_v30 = vrot.slane %v6441_v52, 4  ;;  %v6449_v24 = vrot.slane %v6448_v2, 4  ;;  %v6455_v25 = vsel %vm6265_vm2, %v6047_v63, -inf }
 0x2a9   : > { %11047 = vst [vmem:[#allocation8_spill] sm:$0xff] %v10673_v29  ;;  %v10676_v28 = vpop.f32.mrb[31].mxu1  ;;  %v6411_v5 = vrot.slane %v6410_v53, 1  ;;  %v6417_v36 = vmax.f32 %v6415_v12, %v6416_v9  ;;  %v6424_v0 = vmax.f32 %v6422_v50, %v6423_v7  ;;  %v6430_v35 = vrot.slane %v6429_v34, 2 }
 0x2aa   : > { %11048 = vst [vmem:[#allocation10_spill] sm:$0xff] %v10676_v28  ;;  %v6437_v39 = vrot.slane %v6436_v19, 2  ;;  %v6443_v54 = vmax.f32 %v6441_v52, %v6442_v30  ;;  %v6450_v51 = vmax.f32 %v6448_v2, %v6449_v24  ;;  %v6456_v57 = vrot.slane %v6455_v25, 4 }
 0x2ab   : > { %v6412_v15 = vmax.f32 %v6410_v53, %v6411_v5  ;;  %v6418_v48 = vrot.slane %v6417_v36, 1  ;;  %v6425_v37 = vrot.slane %v6424_v0, 1  ;;  %v6431_v47 = vmax.f32 %v6429_v34, %v6430_v35 }
 0x2ac   : > { %v6438_v1 = vmax.f32 %v6436_v19, %v6437_v39  ;;  %v6444_v32 = vrot.slane %v6443_v54, 2  ;;  %v6451_v41 = vrot.slane %v6450_v51, 2  ;;  %v6457_v40 = vmax.f32 %v6455_v25, %v6456_v57 }
 0x2ad   : > { %v6419_v17 = vmax.f32 %v6417_v36, %v6418_v48  ;;  %v6426_v63 = vmax.f32 %v6424_v0, %v6425_v37  ;;  %v6432_v29 = vrot.slane %v6431_v47, 1  ;;  %v6802_v28 = vsel %vm6784_vm6, %v6412_v15, %v6801_v21 }
 0x2ae   : > { %v6439_v12 = vrot.slane %v6438_v1, 1  ;;  %v6445_v50 = vmax.f32 %v6443_v54, %v6444_v32  ;;  %v6452_v9 = vmax.f32 %v6450_v51, %v6451_v41  ;;  %v6458_v52 = vrot.slane %v6457_v40, 2 }
 0x2af   : > { %v6433_v2 = vmax.f32 %v6431_v47, %v6432_v29  ;;  %v6803_v53 = vsel %vm6786_vm7, %v6419_v17, %v6802_v28  ;;  %v5888_v7 = vmax.f32 %v5886_v42, %v10631_v27  ;;  %v5890_v34 = vsel %vm5832_vm0, %v5818_v49, -inf }
 0x2b0   : > { %v6804_v19 = vsel %vm6788_vm8, %v6426_v63, %v6803_v53  ;;  %v6440_v30 = vmax.f32 %v6438_v1, %v6439_v12  ;;  %v6446_v24 = vrot.slane %v6445_v50, 1  ;;  %v6453_v25 = vrot.slane %v6452_v9, 1 }
 0x2b1   : > { %v6805_v5 = vsel %vm6790_vm9, %v6433_v2, %v6804_v19  ;;  %v6459_v21 = vmax.f32 %v6457_v40, %v6458_v52  ;;  %v6048_v36 = vcombine.high %v5888_v7, %v5888_v7  ;;  %v6055_v0 = vrot.slane %v5888_v7, %v10414_v62 }
 0x2b2   : > { %6851 = vst.msk [vmem:[%s10526_s13 + $0x10] sm:$0xff] %vm5832_vm0, %v6805_v5  ;;  %v6447_v29 = vmax.f32 %v6445_v50, %v6446_v24  ;;  %v6454_v35 = vmax.f32 %v6452_v9, %v6453_v25  ;;  %v7974_v17 = vadd.f32 %v10512_v44, %v10571_v31  ;;  %v7975_v27 = vadd.f32 %v10517_v60, %v10575_v22 }
 0x2b3   : > { %v6460_v49 = vrot.slane %v6459_v21, 1  ;;  %v6062_v42 = vrot.slane %v6048_v36, %v10414_v62  ;;  %v6063_v28 = vcombine.high %v6055_v0, %v6055_v0  ;;  %v6462_v39 = vsel %vm6265_vm2, %v6055_v0, -inf }
 0x2b4   : > { %v6806_v40 = vsel %vm6778_vm3, %v6447_v29, %v6440_v30  ;;  %v6463_v54 = vrot.slane %v6462_v39, 4  ;;  %v5784_v51 = vadd.f32 %v7974_v17, %v10391_v11  ;;  %v5787_v57 = vadd.f32 %v7975_v27, %v10391_v11 }
 0x2b5   : > { %v6461_v15 = vmax.f32 %v6459_v21, %v6460_v49  ;;  %v6807_v44 = vsel %vm6780_vm4, %v6454_v35, %v6806_v40  ;;  %v6064_v31 = vcombine.high %v6062_v42, %v6062_v42  ;;  %v6469_v60 = vsel %vm6265_vm2, %v6063_v28, -inf }
 0x2b6   : > { %v6464_v22 = vmax.f32 %v6462_v39, %v6463_v54  ;;  %v6470_v48 = vrot.slane %v6469_v60, 4  ;;  %v6476_v37 = vsel %vm6265_vm2, %v6062_v42, -inf  ;;  %v5816_v47 = vmax.f32 %v5784_v51, 0.0 }
 0x2b7   : > { %v6477_v1 = vrot.slane %v6476_v37, 4  ;;  %v6483_v32 = vsel %vm6265_vm2, %v6064_v31, -inf  ;;  %v6808_v41 = vsel %vm6782_vm5, %v6461_v15, %v6807_v44  ;;  %v5819_v63 = vmax.f32 %v5787_v57, 0.0 }
 0x2b8   : > { %v6465_v12 = vrot.slane %v6464_v22, 2  ;;  %v6471_v50 = vmax.f32 %v6469_v60, %v6470_v48  ;;  %v6484_v9 = vrot.slane %v6483_v32, 4  ;;  %5849 = vst.msk [vmem:[%s10402_s11 + $0x80] sm:$0xff] %vm5832_vm0, %v5816_v47  ;;  %v5889_v52 = vsel %vm5832_vm0, %v5816_v47, -inf }
 0x2b9   : > { %v6478_v2 = vmax.f32 %v6476_v37, %v6477_v1  ;;  %v5891_v53 = vmax.f32 %v5889_v52, %v5890_v34  ;;  %5852 = vst.msk [vmem:[%s10402_s11 + $0x98] sm:$0xff] %vm5832_vm0, %v5819_v63  ;;  %v5893_v7 = vsel %vm5832_vm0, %v5819_v63, -inf  ;;  %v7976_v19 = vadd.f32 %v10523_v26, %v10578_v56 }
 0x2ba   : > { %v6466_v30 = vmax.f32 %v6464_v22, %v6465_v12  ;;  %v6472_v24 = vrot.slane %v6471_v50, 2  ;;  %v6485_v25 = vmax.f32 %v6483_v32, %v6484_v9  ;;  %v7977_v5 = vadd.f32 %v10540_v59, %v10599_v4 }
 0x2bb   : > { %v6479_v21 = vrot.slane %v6478_v2, 2  ;;  %v6065_v36 = vcombine.high %v5891_v53, %v5891_v53  ;;  %v6072_v0 = vrot.slane %v5891_v53, %v10414_v62  ;;  %v5785_v29 = vadd.f32 %v7976_v19, %v10391_v11 }
 0x2bc   : > { %v6467_v34 = vrot.slane %v6466_v30, 1  ;;  %v6473_v35 = vmax.f32 %v6471_v50, %v6472_v24  ;;  %v6486_v17 = vrot.slane %v6485_v25, 2  ;;  %v5790_v27 = vadd.f32 %v7977_v5, %v10391_v11 }
 0x2bd   : > { %v6480_v49 = vmax.f32 %v6478_v2, %v6479_v21  ;;  %v6079_v26 = vrot.slane %v6065_v36, %v10414_v62  ;;  %v6080_v56 = vcombine.high %v6072_v0, %v6072_v0  ;;  %v6490_v42 = vsel %vm6265_vm2, %v6072_v0, -inf }
 0x2be   : > { %v6468_v28 = vmax.f32 %v6466_v30, %v6467_v34  ;;  %v6474_v39 = vrot.slane %v6473_v35, 1  ;;  %v6487_v59 = vmax.f32 %v6485_v25, %v6486_v17  ;;  %v6491_v4 = vrot.slane %v6490_v42, 4 }
 0x2bf   : > { %v6481_v40 = vrot.slane %v6480_v49, 1  ;;  %v6081_v54 = vcombine.high %v6079_v26, %v6079_v26  ;;  %v6497_v51 = vsel %vm6265_vm2, %v6080_v56, -inf  ;;  %v6504_v57 = vsel %vm6265_vm2, %v6079_v26, -inf }
 0x2c0   : > { %v6475_v15 = vmax.f32 %v6473_v35, %v6474_v39  ;;  %v6488_v44 = vrot.slane %v6487_v59, 1  ;;  %v6809_v31 = vsel %vm6784_vm6, %v6468_v28, %v6808_v41  ;;  %v6492_v60 = vmax.f32 %v6490_v42, %v6491_v4  ;;  %v10740_v39 = vld [vmem:[%s10941_s4] ss:$0 sm:$0xff] }
 0x2c1   : > { %v6482_v22 = vmax.f32 %v6480_v49, %v6481_v40  ;;  %v6498_v48 = vrot.slane %v6497_v51, 4  ;;  %v6505_v37 = vrot.slane %v6504_v57, 4  ;;  %v6511_v47 = vsel %vm6265_vm2, %v6081_v54, -inf }
 0x2c2   : > { %v6489_v1 = vmax.f32 %v6487_v59, %v6488_v44  ;;  %v6810_v32 = vsel %vm6786_vm7, %v6475_v15, %v6809_v31  ;;  %v6493_v63 = vrot.slane %v6492_v60, 2  ;;  %v6512_v12 = vrot.slane %v6511_v47, 4 }
 0x2c3   : > { %v6811_v50 = vsel %vm6788_vm8, %v6482_v22, %v6810_v32  ;;  %v6499_v9 = vmax.f32 %v6497_v51, %v6498_v48  ;;  %v6506_v52 = vmax.f32 %v6504_v57, %v6505_v37  ;;  %v5817_v2 = vmax.f32 %v5785_v29, 0.0 }
 0x2c4   : > { %v6812_v41 = vsel %vm6790_vm9, %v6489_v1, %v6811_v50  ;;  %v6494_v53 = vmax.f32 %v6492_v60, %v6493_v63  ;;  %v6513_v19 = vmax.f32 %v6511_v47, %v6512_v12  ;;  %v5822_v30 = vmax.f32 %v5790_v27, 0.0 }
 0x2c5   : > { %6852 = vst.msk [vmem:[%s10526_s13 + $0x18] sm:$0xff] %vm5832_vm0, %v6812_v41  ;;  %v6500_v24 = vrot.slane %v6499_v9, 2  ;;  %v6507_v25 = vrot.slane %v6506_v52, 2  ;;  %5850 = vst.msk [vmem:[%s10402_s11 + $0x88] sm:$0xff] %vm5832_vm0, %v5817_v2  ;;  %v5892_v5 = vsel %vm5832_vm0, %v5817_v2, -inf  ;;  %v7978_v21 = vadd.f32 %v10542_v6, %v10605_v23 }
 0x2c6   : > { %v6495_v36 = vrot.slane %v6494_v53, 1  ;;  %v6514_v0 = vrot.slane %v6513_v19, 2  ;;  %v5894_v34 = vmax.f32 %v5892_v5, %v5893_v7  ;;  %5855 = vst.msk [vmem:[%s10402_s11 + $0xb0] sm:$0xff] %vm5832_vm0, %v5822_v30  ;;  %v5896_v29 = vsel %vm5832_vm0, %v5822_v30, -inf }
 0x2c7   : > { %v6501_v35 = vmax.f32 %v6499_v9, %v6500_v24  ;;  %v6508_v17 = vmax.f32 %v6506_v52, %v6507_v25  ;;  %v5788_v27 = vadd.f32 %v7978_v21, %v10391_v11  ;;  %v7979_v49 = vadd.f32 %v10548_v38, %v10613_v8 }
 0x2c8   : > { %v6496_v26 = vmax.f32 %v6494_v53, %v6495_v36  ;;  %v6515_v56 = vmax.f32 %v6513_v19, %v6514_v0  ;;  %v6082_v42 = vcombine.high %v5894_v34, %v5894_v34  ;;  %v6089_v6 = vrot.slane %v5894_v34, %v10414_v62 }
 0x2c9   : > { %v6502_v23 = vrot.slane %v6501_v35, 1  ;;  %v6509_v28 = vrot.slane %v6508_v17, 1  ;;  %v5820_v7 = vmax.f32 %v5788_v27, 0.0  ;;  %v5791_v59 = vadd.f32 %v10740_v39, %v7979_v49 }
 0x2ca   : > { %v6516_v11 = vrot.slane %v6515_v56, 1  ;;  %v6096_v4 = vrot.slane %v6082_v42, %v10414_v62  ;;  %v6097_v38 = vcombine.high %v6089_v6, %v6089_v6  ;;  %v6518_v8 = vsel %vm6265_vm2, %v6089_v6, -inf }
 0x2cb   : > { %v6503_v40 = vmax.f32 %v6501_v35, %v6502_v23  ;;  %v6510_v54 = vmax.f32 %v6508_v17, %v6509_v28  ;;  %v6519_v51 = vrot.slane %v6518_v8, 4  ;;  %5853 = vst.msk [vmem:[%s10402_s11 + $0xa0] sm:$0xff] %vm5832_vm0, %v5820_v7  ;;  %v5895_v57 = vsel %vm5832_vm0, %v5820_v7, -inf }
 0x2cc   : > { %v6517_v15 = vmax.f32 %v6515_v56, %v6516_v11  ;;  %v6098_v44 = vcombine.high %v6096_v4, %v6096_v4  ;;  %v6525_v31 = vsel %vm6265_vm2, %v6097_v38, -inf  ;;  %v6532_v60 = vsel %vm6265_vm2, %v6096_v4, -inf }
 0x2cd   : > { %v6813_v22 = vsel %vm6778_vm3, %v6503_v40, %v6496_v26  ;;  %v6520_v48 = vmax.f32 %v6518_v8, %v6519_v51  ;;  %v6526_v37 = vrot.slane %v6525_v31, 4  ;;  %v6533_v47 = vrot.slane %v6532_v60, 4 }
 0x2ce   : > { %v6814_v1 = vsel %vm6780_vm4, %v6510_v54, %v6813_v22  ;;  %v6539_v32 = vsel %vm6265_vm2, %v6098_v44, -inf  ;;  %v5897_v63 = vmax.f32 %v5895_v57, %v5896_v29  ;;  %v5823_v12 = vmax.f32 %v5791_v59, 0.0 }
 0x2cf   : > { %v6521_v50 = vrot.slane %v6520_v48, 2  ;;  %v6527_v9 = vmax.f32 %v6525_v31, %v6526_v37  ;;  %v6534_v52 = vmax.f32 %v6532_v60, %v6533_v47  ;;  %v6540_v2 = vrot.slane %v6539_v32, 4 }
 0x2d0   : > { %v6815_v41 = vsel %vm6782_vm5, %v6517_v15, %v6814_v1  ;;  %v6099_v53 = vcombine.high %v5897_v63, %v5897_v63  ;;  %v6106_v19 = vrot.slane %v5897_v63, %v10414_v62  ;;  %5856 = vst.msk [vmem:[%s10402_s11 + $0xb8] sm:$0xff] %vm5832_vm0, %v5823_v12  ;;  %v5899_v30 = vsel %vm5832_vm0, %v5823_v12, -inf }
 0x2d1   : > { %v6522_v24 = vmax.f32 %v6520_v48, %v6521_v50  ;;  %v6528_v25 = vrot.slane %v6527_v9, 2  ;;  %v6535_v5 = vrot.slane %v6534_v52, 2  ;;  %v6541_v21 = vmax.f32 %v6539_v32, %v6540_v2 }
 0x2d2   : > { %v6113_v36 = vrot.slane %v6099_v53, %v10414_v62  ;;  %v6114_v0 = vcombine.high %v6106_v19, %v6106_v19  ;;  %v6546_v34 = vsel %vm6265_vm2, %v6106_v19, -inf  ;;  %v7980_v29 = vadd.f32 %v10550_v45, %v10615_v18 }
 0x2d3   : > { %v6523_v35 = vrot.slane %v6522_v24, 1  ;;  %v6529_v17 = vmax.f32 %v6527_v9, %v6528_v25  ;;  %v6536_v27 = vmax.f32 %v6534_v52, %v6535_v5  ;;  %v6542_v49 = vrot.slane %v6541_v21, 2 }
 0x2d4   : > { %v6115_v26 = vcombine.high %v6113_v36, %v6113_v36  ;;  %v6547_v56 = vrot.slane %v6546_v34, 4  ;;  %v6553_v42 = vsel %vm6265_vm2, %v6114_v0, -inf  ;;  %v6560_v6 = vsel %vm6265_vm2, %v6113_v36, -inf }
 0x2d5   : > { %v6524_v23 = vmax.f32 %v6522_v24, %v6523_v35  ;;  %v6530_v28 = vrot.slane %v6529_v17, 1  ;;  %v6537_v7 = vrot.slane %v6536_v27, 1  ;;  %v6543_v59 = vmax.f32 %v6541_v21, %v6542_v49 }
 0x2d6   : > { %v6548_v11 = vmax.f32 %v6546_v34, %v6547_v56  ;;  %v6554_v4 = vrot.slane %v6553_v42, 4  ;;  %v6561_v38 = vrot.slane %v6560_v6, 4  ;;  %v6567_v8 = vsel %vm6265_vm2, %v6115_v26, -inf }
 0x2d7   : > { %v6531_v45 = vmax.f32 %v6529_v17, %v6530_v28  ;;  %v6538_v18 = vmax.f32 %v6536_v27, %v6537_v7  ;;  %v6544_v40 = vrot.slane %v6543_v59, 1  ;;  %v6816_v54 = vsel %vm6784_vm6, %v6524_v23, %v6815_v41 }
 0x2d8   : > { %v6549_v51 = vrot.slane %v6548_v11, 2  ;;  %v6555_v57 = vmax.f32 %v6553_v42, %v6554_v4  ;;  %v6562_v15 = vmax.f32 %v6560_v6, %v6561_v38  ;;  %v6568_v44 = vrot.slane %v6567_v8, 4 }
 0x2d9   : > { %v6545_v31 = vmax.f32 %v6543_v59, %v6544_v40  ;;  %v6817_v60 = vsel %vm6786_vm7, %v6531_v45, %v6816_v54  ;;  %v5789_v22 = vadd.f32 %v10740_v39, %v7980_v29  ;;  %v7981_v48 = vadd.f32 %v10554_v13, %v10637_v33 }
 0x2da   : > { %v6818_v37 = vsel %vm6788_vm8, %v6538_v18, %v6817_v60  ;;  %v6550_v47 = vmax.f32 %v6548_v11, %v6549_v51  ;;  %v6556_v1 = vrot.slane %v6555_v57, 2  ;;  %v6563_v32 = vrot.slane %v6562_v15, 2 }
 0x2db   : > { %v6819_v63 = vsel %vm6790_vm9, %v6545_v31, %v6818_v37  ;;  %v6569_v12 = vmax.f32 %v6567_v8, %v6568_v44  ;;  %v5821_v50 = vmax.f32 %v5789_v22, 0.0  ;;  %v5794_v9 = vadd.f32 %v10740_v39, %v7981_v48 }
 0x2dc   : > { %6853 = vst.msk [vmem:[%s10526_s13 + $0x20] sm:$0xff] %vm5832_vm0, %v6819_v63  ;;  %v6551_v52 = vrot.slane %v6550_v47, 1  ;;  %v6557_v2 = vmax.f32 %v6555_v57, %v6556_v1  ;;  %v6564_v41 = vmax.f32 %v6562_v15, %v6563_v32  ;;  %v7982_v13 = vadd.f32 %v10559_v46, %v10641_v16 }
 0x2dd   : > { %v6570_v33 = vrot.slane %v6569_v12, 2  ;;  %5854 = vst.msk [vmem:[%s10402_s11 + $0xa8] sm:$0xff] %vm5832_vm0, %v5821_v50  ;;  %v5898_v53 = vsel %vm5832_vm0, %v5821_v50, -inf  ;;  %v5826_v19 = vmax.f32 %v5794_v9, 0.0  ;;  %v7983_v24 = vadd.f32 %v10562_v55, %v10648_v3 }
 0x2de   : > { %v6552_v25 = vmax.f32 %v6550_v47, %v6551_v52  ;;  %v6558_v5 = vrot.slane %v6557_v2, 1  ;;  %v6565_v21 = vrot.slane %v6564_v41, 1  ;;  %v5900_v36 = vmax.f32 %v5898_v53, %v5899_v30 }
 0x2df   : > { %v6571_v0 = vmax.f32 %v6569_v12, %v6570_v33  ;;  %5859 = vst.msk [vmem:[%s10402_s11 + $0xd0] sm:$0xff] %vm5832_vm0, %v5826_v19  ;;  %v5902_v34 = vsel %vm5832_vm0, %v5826_v19, -inf  ;;  %v5792_v46 = vadd.f32 %v10740_v39, %v7982_v13  ;;  %v5795_v16 = vadd.f32 %v10740_v39, %v7983_v24 }
 0x2e0   : > { %v6559_v29 = vmax.f32 %v6557_v2, %v6558_v5  ;;  %v6566_v35 = vmax.f32 %v6564_v41, %v6565_v21  ;;  %v6116_v17 = vcombine.high %v5900_v36, %v5900_v36  ;;  %v6123_v55 = vrot.slane %v5900_v36, %v10414_v62 }
 0x2e1   : > { %v6572_v3 = vrot.slane %v6571_v0, 1  ;;  %v5824_v27 = vmax.f32 %v5792_v46, 0.0  ;;  %v5827_v49 = vmax.f32 %v5795_v16, 0.0  ;;  %v7984_v30 = vadd.f32 %v10568_v61, %v10653_v43 }
 0x2e2   : > { %v6820_v26 = vsel %vm6778_vm3, %v6559_v29, %v6552_v25  ;;  %v6130_v56 = vrot.slane %v6116_v17, %v10414_v62  ;;  %v6131_v42 = vcombine.high %v6123_v55, %v6123_v55  ;;  %v6574_v6 = vsel %vm6265_vm2, %v6123_v55, -inf }
 0x2e3   : > { %v6573_v23 = vmax.f32 %v6571_v0, %v6572_v3  ;;  %v6821_v28 = vsel %vm6780_vm4, %v6566_v35, %v6820_v26  ;;  %v6575_v7 = vrot.slane %v6574_v6, 4  ;;  %5857 = vst.msk [vmem:[%s10402_s11 + $0xc0] sm:$0xff] %vm5832_vm0, %v5824_v27  ;;  %v5901_v59 = vsel %vm5832_vm0, %v5824_v27, -inf  ;;  %5860 = vst.msk [vmem:[%s10402_s11 + $0xd8] sm:$0xff] %vm5832_vm0, %v5827_v49 }
 0x2e4   : > { %v6132_v11 = vcombine.high %v6130_v56, %v6130_v56  ;;  %v6581_v61 = vsel %vm6265_vm2, %v6131_v42, -inf  ;;  %v6588_v43 = vsel %vm6265_vm2, %v6130_v56, -inf  ;;  %v5903_v4 = vmax.f32 %v5901_v59, %v5902_v34 }
 0x2e5   : > { %v6576_v38 = vmax.f32 %v6574_v6, %v6575_v7  ;;  %v6582_v8 = vrot.slane %v6581_v61, 4  ;;  %v6589_v45 = vrot.slane %v6588_v43, 4  ;;  %v6822_v18 = vsel %vm6782_vm5, %v6573_v23, %v6821_v28 }
 0x2e6   : > { %v6595_v40 = vsel %vm6265_vm2, %v6132_v11, -inf  ;;  %v6133_v54 = vcombine.high %v5903_v4, %v5903_v4  ;;  %v6140_v51 = vrot.slane %v5903_v4, %v10414_v62  ;;  %v5905_v57 = vsel %vm5832_vm0, %v5827_v49, -inf }
 0x2e7   : > { %v6577_v15 = vrot.slane %v6576_v38, 2  ;;  %v6583_v44 = vmax.f32 %v6581_v61, %v6582_v8  ;;  %v6590_v31 = vmax.f32 %v6588_v43, %v6589_v45  ;;  %v6596_v60 = vrot.slane %v6595_v40, 4 }
 0x2e8   : > { %v6147_v22 = vrot.slane %v6133_v54, %v10414_v62  ;;  %v6148_v48 = vcombine.high %v6140_v51, %v6140_v51  ;;  %v6602_v37 = vsel %vm6265_vm2, %v6140_v51, -inf  ;;  %v5793_v47 = vadd.f32 %v10740_v39, %v7984_v30  ;;  %v11049_v51 = vld [vmem:[#allocation8_spill] sm:$0xff] }
 0x2e9   : > { %v6578_v1 = vmax.f32 %v6576_v38, %v6577_v15  ;;  %v6584_v32 = vrot.slane %v6583_v44, 2  ;;  %v6591_v63 = vrot.slane %v6590_v31, 2  ;;  %v6597_v12 = vmax.f32 %v6595_v40, %v6596_v60  ;;  %v11050_v15 = vld [vmem:[#allocation14_spill] sm:$0xff] }
 0x2ea   : > { %v6149_v50 = vcombine.high %v6147_v22, %v6147_v22  ;;  %v6603_v9 = vrot.slane %v6602_v37, 4  ;;  %v6609_v52 = vsel %vm6265_vm2, %v6148_v48, -inf  ;;  %v6616_v2 = vsel %vm6265_vm2, %v6147_v22, -inf }
 0x2eb   : > { %v6579_v41 = vrot.slane %v6578_v1, 1  ;;  %v6585_v13 = vmax.f32 %v6583_v44, %v6584_v32  ;;  %v6592_v33 = vmax.f32 %v6590_v31, %v6591_v63  ;;  %v6598_v53 = vrot.slane %v6597_v12, 2 }
 0x2ec   : > { %v6604_v19 = vmax.f32 %v6602_v37, %v6603_v9  ;;  %v6610_v24 = vrot.slane %v6609_v52, 4  ;;  %v6617_v25 = vrot.slane %v6616_v2, 4  ;;  %v6623_v5 = vsel %vm6265_vm2, %v6149_v50, -inf }
 0x2ed   : > { %v6580_v21 = vmax.f32 %v6578_v1, %v6579_v41  ;;  %v6586_v36 = vrot.slane %v6585_v13, 1  ;;  %v6593_v0 = vrot.slane %v6592_v33, 1  ;;  %v6599_v34 = vmax.f32 %v6597_v12, %v6598_v53 }
 0x2ee   : > { %v6605_v46 = vrot.slane %v6604_v19, 2  ;;  %v6611_v16 = vmax.f32 %v6609_v52, %v6610_v24  ;;  %v6618_v29 = vmax.f32 %v6616_v2, %v6617_v25  ;;  %v6624_v35 = vrot.slane %v6623_v5, 4 }
 0x2ef   : > { %v6587_v17 = vmax.f32 %v6585_v13, %v6586_v36  ;;  %v6594_v55 = vmax.f32 %v6592_v33, %v6593_v0  ;;  %v6600_v3 = vrot.slane %v6599_v34, 1  ;;  %v6823_v27 = vsel %vm6784_vm6, %v6580_v21, %v6822_v18  ;;  %v11051_v36 = vld [vmem:[#allocation10_spill] sm:$0xff]  ;;  %v11052_v0 = vld [vmem:[#allocation15_spill] sm:$0xff] }
 0x2f0   : > { %v6606_v49 = vmax.f32 %v6604_v19, %v6605_v46  ;;  %v6612_v30 = vrot.slane %v6611_v16, 2  ;;  %v6619_v26 = vrot.slane %v6618_v29, 2  ;;  %v6625_v56 = vmax.f32 %v6623_v5, %v6624_v35 }
 0x2f1   : > { %v6601_v42 = vmax.f32 %v6599_v34, %v6600_v3  ;;  %v6824_v6 = vsel %vm6786_vm7, %v6587_v17, %v6823_v27  ;;  %v5825_v23 = vmax.f32 %v5793_v47, 0.0  ;;  %v7985_v28 = vadd.f32 %v10583_v10, %v10667_v58 }
 0x2f2   : > { %v6825_v7 = vsel %vm6788_vm8, %v6594_v55, %v6824_v6  ;;  %v6607_v59 = vrot.slane %v6606_v49, 1  ;;  %v6613_v11 = vmax.f32 %v6611_v16, %v6612_v30  ;;  %v6620_v61 = vmax.f32 %v6618_v29, %v6619_v26 }
 0x2f3   : > { %v6826_v43 = vsel %vm6790_vm9, %v6601_v42, %v6825_v7  ;;  %v6626_v4 = vrot.slane %v6625_v56, 2  ;;  %5858 = vst.msk [vmem:[%s10402_s11 + $0xc8] sm:$0xff] %vm5832_vm0, %v5825_v23  ;;  %v5904_v38 = vsel %vm5832_vm0, %v5825_v23, -inf  ;;  %v5798_v8 = vadd.f32 %v10740_v39, %v7985_v28 }
 0x2f4   : > { %6854 = vst.msk [vmem:[%s10526_s13 + $0x28] sm:$0xff] %vm5832_vm0, %v6826_v43  ;;  %v6614_v45 = vrot.slane %v6613_v11, 1  ;;  %v6621_v18 = vrot.slane %v6620_v61, 1  ;;  %v5906_v10 = vmax.f32 %v5904_v38, %v5905_v57  ;;  %v7986_v54 = vadd.f32 %v10587_v20, %v10671_v14 }
 0x2f5   : > { %v6627_v58 = vmax.f32 %v6625_v56, %v6626_v4  ;;  %v5830_v40 = vmax.f32 %v5798_v8, 0.0  ;;  %v7987_v44 = vadd.f32 %v11050_v15, %v11049_v51  ;;  %v6608_v31 = vmax.f32 %v6606_v49, %v6607_v59 }
 0x2f6   : > { %v6615_v60 = vmax.f32 %v6613_v11, %v6614_v45  ;;  %v6150_v22 = vcombine.high %v5906_v10, %v5906_v10  ;;  %v6157_v48 = vrot.slane %v5906_v10, %v10414_v62  ;;  %v6622_v37 = vmax.f32 %v6620_v61, %v6621_v18 }
 0x2f7   : > { %v6628_v47 = vrot.slane %v6627_v58, 1  ;;  %5863 = vst.msk [vmem:[%s10402_s11 + $0xf0] sm:$0xff] %vm5832_vm0, %v5830_v40  ;;  %v5796_v1 = vadd.f32 %v10740_v39, %v7986_v54  ;;  %v5799_v57 = vadd.f32 %v10740_v39, %v7987_v44  ;;  %v5908_v9 = vsel %vm5832_vm0, %v5830_v40, -inf }
 0x2f8   : > { %v6827_v32 = vsel %vm6778_vm3, %v6615_v60, %v6608_v31  ;;  %v6164_v20 = vrot.slane %v6150_v22, %v10414_v62  ;;  %v6165_v14 = vcombine.high %v6157_v48, %v6157_v48  ;;  %v6630_v63 = vsel %vm6265_vm2, %v6157_v48, -inf }
 0x2f9   : > { %v6629_v12 = vmax.f32 %v6627_v58, %v6628_v47  ;;  %v6631_v50 = vrot.slane %v6630_v63, 4  ;;  %v5828_v52 = vmax.f32 %v5796_v1, 0.0  ;;  %v5831_v33 = vmax.f32 %v5799_v57, 0.0 }
 0x2fa   : > { %v6166_v2 = vcombine.high %v6164_v20, %v6164_v20  ;;  %v6637_v41 = vsel %vm6265_vm2, %v6165_v14, -inf  ;;  %v6644_v13 = vsel %vm6265_vm2, %v6164_v20, -inf  ;;  %v6828_v53 = vsel %vm6780_vm4, %v6622_v37, %v6827_v32 }
 0x2fb   : > { %v6632_v19 = vmax.f32 %v6630_v63, %v6631_v50  ;;  %v6638_v24 = vrot.slane %v6637_v41, 4  ;;  %v6645_v25 = vrot.slane %v6644_v13, 4  ;;  %5861 = vst.msk [vmem:[%s10402_s11 + $0xe0] sm:$0xff] %vm5832_vm0, %v5828_v52  ;;  %v5907_v21 = vsel %vm5832_vm0, %v5828_v52, -inf  ;;  %5864 = vst.msk [vmem:[%s10402_s11 + $0xf8] sm:$0xff] %vm5832_vm0, %v5831_v33 }
 0x2fc   : > { %v6651_v5 = vsel %vm6265_vm2, %v6166_v2, -inf  ;;  %v7988_v34 = vadd.f32 %v11052_v0, %v11051_v36  ;;  %v6829_v17 = vsel %vm6782_vm5, %v6629_v12, %v6828_v53  ;;  %v5909_v55 = vmax.f32 %v5907_v21, %v5908_v9 }
 0x2fd   : > { %v6633_v46 = vrot.slane %v6632_v19, 2  ;;  %v6639_v16 = vmax.f32 %v6637_v41, %v6638_v24  ;;  %v6646_v29 = vmax.f32 %v6644_v13, %v6645_v25  ;;  %v6652_v35 = vrot.slane %v6651_v5, 4 }
 0x2fe   : > { %v5797_v3 = vadd.f32 %v10740_v39, %v7988_v34  ;;  %v6167_v56 = vcombine.high %v5909_v55, %v5909_v55  ;;  %v6174_v42 = vrot.slane %v5909_v55, %v10414_v62  ;;  %v5911_v6 = vsel %vm5832_vm0, %v5831_v33, -inf }
 0x2ff   : > { %v6634_v27 = vmax.f32 %v6632_v19, %v6633_v46  ;;  %v6640_v49 = vrot.slane %v6639_v16, 2  ;;  %v6647_v30 = vrot.slane %v6646_v29, 2  ;;  %v6653_v26 = vmax.f32 %v6651_v5, %v6652_v35 }
 0x300   : > { %v5829_v23 = vmax.f32 %v5797_v3, 0.0  ;;  %v6181_v61 = vrot.slane %v6167_v56, %v10414_v62  ;;  %v6182_v43 = vcombine.high %v6174_v42, %v6174_v42  ;;  %v6658_v39 = vsel %vm6265_vm2, %v6174_v42, -inf }
 0x301   : > { %v6635_v28 = vrot.slane %v6634_v27, 1  ;;  %v6641_v7 = vmax.f32 %v6639_v16, %v6640_v49  ;;  %v6648_v59 = vmax.f32 %v6646_v29, %v6647_v30  ;;  %v6654_v11 = vrot.slane %v6653_v26, 2 }
 0x302   : > { %5862 = vst.msk [vmem:[%s10402_s11 + $0xe8] sm:$0xff] %vm5832_vm0, %v5829_v23  ;;  %v5910_v4 = vsel %vm5832_vm0, %v5829_v23, -inf  ;;  %v6183_v10 = vcombine.high %v6181_v61, %v6181_v61  ;;  %v6659_v58 = vrot.slane %v6658_v39, 4  ;;  %v6665_v40 = vsel %vm6265_vm2, %v6182_v43, -inf  ;;  %s8388_s11 = scalar_lea.vmem %s8387_s8, 2048 }
 0x303   : > { %v6636_v38 = vmax.f32 %v6634_v27, %v6635_v28  ;;  %v6642_v8 = vrot.slane %v6641_v7, 1  ;;  %v6649_v45 = vrot.slane %v6648_v59, 1  ;;  %v6655_v18 = vmax.f32 %v6653_v26, %v6654_v11  ;;  %p8390_p2 = scmp.lt.s32.totalorder %s8388_s11, %s8382_s28 }
 0x304   : > { %v6672_v54 = vsel %vm6265_vm2, %v6181_v61, -inf  ;;  %v6660_v60 = vmax.f32 %v6658_v39, %v6659_v58  ;;  %v6666_v22 = vrot.slane %v6665_v40, 4  ;;  %v6679_v37 = vsel %vm6265_vm2, %v6183_v10, -inf }
 0x305   : > { %v6643_v51 = vmax.f32 %v6641_v7, %v6642_v8  ;;  %v6650_v15 = vmax.f32 %v6648_v59, %v6649_v45  ;;  %v6656_v44 = vrot.slane %v6655_v18, 1  ;;  %v6830_v31 = vsel %vm6784_vm6, %v6636_v38, %v6829_v17  ;;  %p8391_p3 = por %p8390_p2, %p8389_p1 }
 0x306   : > { %v6673_v48 = vrot.slane %v6672_v54, 4  ;;  %v6680_v57 = vrot.slane %v6679_v37, 4  ;;  %v5912_v32 = vmax.f32 %v5910_v4, %v5911_v6  ;;  %v6661_v14 = vrot.slane %v6660_v60, 2 }
 0x307   : > { %v6657_v47 = vmax.f32 %v6655_v18, %v6656_v44  ;;  %v6831_v1 = vsel %vm6786_vm7, %v6643_v51, %v6830_v31  ;;  %v6667_v63 = vmax.f32 %v6665_v40, %v6666_v22  ;;  %p8392_p5 = pnand %p8391_p3, %p8385_p0 }
 0x308   : > { %v6832_v20 = vsel %vm6788_vm8, %v6650_v15, %v6831_v1  ;;  %v6674_v12 = vmax.f32 %v6672_v54, %v6673_v48  ;;  %v6681_v9 = vmax.f32 %v6679_v37, %v6680_v57  ;;  %v6184_v52 = vcombine.high %v5912_v32, %v5912_v32 }
 0x309   : > { %v6833_v50 = vsel %vm6790_vm9, %v6657_v47, %v6832_v20  ;;  %v6191_v2 = vrot.slane %v5912_v32, %v10414_v62  ;;  %v6662_v41 = vmax.f32 %v6660_v60, %v6661_v14  ;;  %v6668_v13 = vrot.slane %v6667_v63, 2 }
 0x30a   : > { %6855 = vst.msk [vmem:[%s10526_s13 + $0x30] sm:$0xff] %vm5832_vm0, %v6833_v50  ;;  %v6675_v33 = vrot.slane %v6674_v12, 2  ;;  %v6682_v53 = vrot.slane %v6681_v9, 2  ;;  %v6198_v19 = vrot.slane %v6184_v52, %v10414_v62 }
 0x30b   : > { %v6199_v24 = vcombine.high %v6191_v2, %v6191_v2  ;;  %v6686_v25 = vsel %vm6265_vm2, %v6191_v2, -inf  ;;  %v6663_v5 = vrot.slane %v6662_v41, 1  ;;  %v6669_v21 = vmax.f32 %v6667_v63, %v6668_v13 }
 0x30c   : > { %v6676_v36 = vmax.f32 %v6674_v12, %v6675_v33  ;;  %v6687_v0 = vrot.slane %v6686_v25, 4  ;;  %v6683_v34 = vmax.f32 %v6681_v9, %v6682_v53  ;;  %v6200_v46 = vcombine.high %v6198_v19, %v6198_v19 }
 0x30d   : > { %v6693_v16 = vsel %vm6265_vm2, %v6199_v24, -inf  ;;  %v6700_v29 = vsel %vm6265_vm2, %v6198_v19, -inf  ;;  %v6664_v35 = vmax.f32 %v6662_v41, %v6663_v5  ;;  %v6670_v17 = vrot.slane %v6669_v21, 1 }
 0x30e   : > { %v6677_v55 = vrot.slane %v6676_v36, 1  ;;  %v6688_v3 = vmax.f32 %v6686_v25, %v6687_v0  ;;  %v6684_v27 = vrot.slane %v6683_v34, 1  ;;  %v6694_v49 = vrot.slane %v6693_v16, 4 }
 0x30f   : > { %v6701_v62 = vrot.slane %v6700_v29, 4  ;;  %v6707_v30 = vsel %vm6265_vm2, %v6200_v46, -inf  ;;  %v6671_v26 = vmax.f32 %v6669_v21, %v6670_v17 }
 0x310   : > { %v6678_v56 = vmax.f32 %v6676_v36, %v6677_v55  ;;  %v6689_v42 = vrot.slane %v6688_v3, 2  ;;  %v6708_v6 = vrot.slane %v6707_v30, 4  ;;  %v6685_v23 = vmax.f32 %v6683_v34, %v6684_v27 }
 0x311   : > { %v6695_v28 = vmax.f32 %v6693_v16, %v6694_v49  ;;  %v6702_v7 = vmax.f32 %v6700_v29, %v6701_v62  ;;  %v6834_v59 = vsel %vm6778_vm3, %v6671_v26, %v6664_v35 }
 0x312   : > { %v6690_v11 = vmax.f32 %v6688_v3, %v6689_v42  ;;  %v6709_v61 = vmax.f32 %v6707_v30, %v6708_v6  ;;  %v6835_v43 = vsel %vm6780_vm4, %v6678_v56, %v6834_v59 }
 0x313   : > { %v6696_v39 = vrot.slane %v6695_v28, 2  ;;  %v6703_v4 = vrot.slane %v6702_v7, 2  ;;  %v6836_v10 = vsel %vm6782_vm5, %v6685_v23, %v6835_v43 }
 0x314   : > { %v6691_v38 = vrot.slane %v6690_v11, 1  ;;  %v6710_v8 = vrot.slane %v6709_v61, 2 }
 0x315   : > { %v6697_v45 = vmax.f32 %v6695_v28, %v6696_v39  ;;  %v6704_v18 = vmax.f32 %v6702_v7, %v6703_v4 }
 0x316   : > { %v6692_v58 = vmax.f32 %v6690_v11, %v6691_v38  ;;  %v6711_v40 = vmax.f32 %v6709_v61, %v6710_v8 }
 0x317   : > { %v6698_v54 = vrot.slane %v6697_v45, 1  ;;  %v6705_v51 = vrot.slane %v6704_v18, 1 }
 0x318   : > { %v6712_v15 = vrot.slane %v6711_v40, 1  ;;  %v6837_v44 = vsel %vm6784_vm6, %v6692_v58, %v6836_v10 }
 0x319   : > { %v6699_v31 = vmax.f32 %v6697_v45, %v6698_v54  ;;  %v6706_v60 = vmax.f32 %v6704_v18, %v6705_v51 }
 0x31a   : > { %v6713_v22 = vmax.f32 %v6711_v40, %v6712_v15 }
 0x31b   : > { %v6838_v48 = vsel %vm6786_vm7, %v6699_v31, %v6837_v44 }
 0x31c   : > { %v6839_v37 = vsel %vm6788_vm8, %v6706_v60, %v6838_v48 }
 0x31d   : > { %v6840_v47 = vsel %vm6790_vm9, %v6713_v22, %v6839_v37 }
 0x31e   : > { %6856 = vst.msk [vmem:[%s10526_s13 + $0x38] sm:$0xff] %vm5832_vm0, %v6840_v47 }
 0x31f   : > { %8395 = shalt.err (!%p8392_p5)
}
 0x320   : > { %s8396_s14 = scalar_lea.hbm %s10881_s27, 1024  ;;  %s8400_s15 = scalar_lea.hbm %s10943_s6, 2048 }
 0x321   : > { %p8397_p6 = scmp.ne.s32.totalorder %s10881_s27, %s8396_s14  ;;  %p8401_p10 = scmp.lt.u32.totalorder %s10881_s27, %s10943_s6 }
 0x322   : > { %p8402_p11 = scmp.lt.u32.totalorder %s8400_s15, %s8396_s14  ;;  %p8404_p13 = scmp.lt.u32.totalorder %s8396_s14, %s10881_s27 }
 0x323   : > { %p8398_p7 = pnand %p8397_p6, %p8542_p4 }
 0x324   : > { %p8403_p12 = por %p8402_p11, %p8401_p10 }
 0x325   : > { %p8399_p9 = pneg %p8398_p7 }
 0x326   : > { %p8405_p0 = por %p8404_p13, %p8403_p12 }
 0x328   : > { %p8406_p1 = pnand %p8405_p0, %p8399_p9 }
 0x32a   : > { %8409 = shalt.err (!%p8406_p1)
}
 0x32b   : > { %s8465_s20 = smov 128   ;;  %s8466_s17 = smov 8  }
 0x32c   : > { %8223 = dma.vmem_to_hbm [thread:$0]  (%p8542_p4), %s10883_s19, 1024, %s10881_s27, %s10891_s24, %s8465_s20, %s8465_s20, %s8466_s17  }
 0x32d PF: > { %p8229_p2 = scmp.ge.s32.totalorder %s8460_s26, 2  ;;  %s6915_s28 = sand.u32 1, %s8440_s21  }
 0x32e   : > { %s6916_s30 = scalar_lea.sflag [#allocation4], %s6915_s28 }
 0x32f   : > { %p8226_p3 = pnand %p8229_p2, %p8549_p8 }
 0x331   : > { %8435 = dma.done.wait (!%p8226_p3), %s6916_s30, 1024  }
 0x332   : > { %8437 = vsyncadd (!%p8226_p3), %s6916_s30, 4294966272  ;;  %s20_s26 = sadd.s32 1, %s8460_s26   ;;  %s11053_s21 = smov %s8444_s22 }
 0x333   : > { %p17_p5 = scmp.ge.s32.totalorder %s20_s26, 4   ;;  %s11054_s22 = smov %s8448_s23 }
 0x334   : > { %s11055_s23 = smov %s8555_s10  ;;  %s11056_s24 = smov %s8456_s25 }
 0x335   : > { %s11057_s25 = smov %s11059_s29  ;;  %19 = sbr.rel (!%p17_p5) target bundleno = 4 (0x4), region = 108 }
 0x33c   :  { %6921 = vsyncpa [#allocation4], 1 }
 0x33d   :  { %6923 = vsyncpa [#allocation4 + $0x1], 1 }

</bundles_post_ra>
